<compile_context>
chip_gen: v5e
topology: v5e:2x2
jax: 0.10.0
libtpu: 0.0.40
codegen_flags: <defaults>
</compile_context>

<pallas_src>
import numpy as np
import jax
import jax.numpy as jnp
from jax.experimental import pallas as pl
from jax.experimental.pallas import tpu as pltpu


# ----------------------------------------------------------------------------
# Mirror DownsamplingStack layer construction and fold each conv1d into an
# exact dense matrix (flat index convention: idx = channel * L + position).
# ----------------------------------------------------------------------------
def build_spec_layer_specs(feature_channels, channels, latent_dim):
    specs = []
    curr = feature_channels
    while curr > 1:
        first = curr == feature_channels
        out_size = curr // 2                      # scale_factor = 2
        last = out_size == 1                      # target_size = 1
        k = 7 if curr > 8 else 3
        specs.append(dict(L_in=curr, K=k, pad=k // 2, stride=2,
                          C_in=1 if first else channels,
                          C_out=latent_dim if last else channels))
        curr = out_size
    return specs


def conv1d_to_dense(w, L_in, stride, pad):
    # w: (C_out, C_in, K), no bias  ->  dense (C_in*L_in, C_out*L_out)
    C_out, C_in, K = w.shape
    L_out = (L_in + 2 * pad - K) // stride + 1
    M = np.zeros((C_in * L_in, C_out * L_out), dtype=np.float32)
    for co in range(C_out):
        for ci in range(C_in):
            for lo in range(L_out):
                for k in range(K):
                    li = lo * stride - pad + k
                    if 0 <= li < L_in:              # zero padding
                        M[ci * L_in + li, co * L_out + lo] += w[co, ci, k]
    return M, L_out


def init_params(key, feature_channels, channels, latent_dim):
    specs = build_spec_layer_specs(feature_channels, channels, latent_dim)
    dense_T = []
    for s in specs:
        key, sub = jax.random.split(key)
        fan_in = s['C_in'] * s['K']
        w = jax.random.normal(sub, (s['C_out'], s['C_in'], s['K']),
                              jnp.float32) / np.sqrt(fan_in)
        M, _ = conv1d_to_dense(np.asarray(w), s['L_in'], s['stride'], s['pad'])
        dense_T.append(jnp.asarray(M.T))            # (Cout*Lout, Cin*Lin)
    key, k1, k2 = jax.random.split(key, 3)
    # to_latent: Conv1d(latent, latent, 1, bias=False) -> weight (latent, latent, 1)
    w_tl = jax.random.normal(k1, (latent_dim, latent_dim, 1),
                             jnp.float32) / np.sqrt(latent_dim)
    # frame_judge: Conv1d(latent, 1, 1, bias=False) -> weight (1, latent, 1)
    w_j = jax.random.normal(k2, (1, latent_dim, 1),
                            jnp.float32) / np.sqrt(latent_dim)
    return {
        'dense_convs_T': dense_T,        # list of (Cout*Lout, Cin*Lin)
        'to_latent': w_tl[:, :, 0],      # (latent, latent):  lat = W @ h
        'judge_vec': w_j[0, :, 0],       # (latent,)
    }


# ----------------------------------------------------------------------------
# Pallas kernel: spec_encoder + to_latent for one time tile (all batches).
# refs: x (B, F, tile_t), W_i^T..., W_to_latent, out (B, latent, tile_t),
#       sums (latent, B) f32 column sums of the latent (for frame_judge).
# ----------------------------------------------------------------------------
def make_kernel(num_layers, batch, latent_dim, tile_t, chunk_t, compute_dtype):
    n_chunks = tile_t // chunk_t

    def kernel(*refs):
        x_ref = refs[0]                              # (B, F, tile_t)
        w_refs = refs[1:1 + num_layers]              # dense conv matrices (transposed)
        wl_ref = refs[1 + num_layers]                # to_latent (latent, latent)
        out_ref = refs[2 + num_layers]               # (B, latent, tile_t)
        sum_ref = refs[3 + num_layers]               # (latent, B) f32

        # Hoist weight loads out of the loops (small, stay resident in vregs).
        ws = [w_refs[i][...] for i in range(num_layers)]
        wl = wl_ref[...]

        for b in range(batch):                       # static, batch is small
            col_sum = jnp.zeros((latent_dim, 1), jnp.float32)
            # Chunk the tile so f32 intermediates stay ~(64, chunk_t) = a few
            # vregs and never spill, even when tile_t is 1024-2048 wide.
            for c in range(n_chunks):                # static offsets -> aligned
                off = c * chunk_t
                h = x_ref[b, :, pl.ds(off, chunk_t)].astype(compute_dtype)
                for i in range(num_layers):
                    # (Cout*Lout, Cin*Lin) @ (Cin*Lin, chunk_t)
                    h = jnp.dot(ws[i], h, preferred_element_type=jnp.float32)
                    # leaky_relu(0.2) on the f32 accumulator, cast just before
                    # the next dot (keeps elementwise math in f32 for v5e).
                    h = jnp.maximum(h, 0.2 * h).astype(compute_dtype)
                lat = jnp.dot(wl, h, preferred_element_type=jnp.float32)
                out_ref[b, :, pl.ds(off, chunk_t)] = lat.astype(out_ref.dtype)
                # Cross-lane reduce lands on the XLU slot (free in this
                # mem-bound regime); accumulated in f32 from the f32 latent.
                col_sum = col_sum + jnp.sum(lat, axis=-1, keepdims=True)
            sum_ref[:, b:b + 1] = col_sum
    return kernel


def spectrum_discriminator_forward(x, params, *, tile_t=1024, chunk_t=256,
                                   out_dtype=jnp.bfloat16,
                                   compute_dtype=jnp.bfloat16):
    B, F, T = x.shape
    tile_t = min(tile_t, T)
    chunk_t = min(chunk_t, tile_t)
    assert T % tile_t == 0, (T, tile_t)
    assert tile_t % chunk_t == 0, (tile_t, chunk_t)
    assert chunk_t % 128 == 0, chunk_t               # lane-dense chunks

    dense_ws = [w.astype(compute_dtype) for w in params['dense_convs_T']]
    w_tl = params['to_latent'].astype(compute_dtype)
    latent_dim = w_tl.shape[0]
    num_layers = len(dense_ws)
    n_tiles = T // tile_t

    in_specs = [pl.BlockSpec((B, F, tile_t), lambda t: (0, 0, t))]
    for w in dense_ws:
        in_specs.append(pl.BlockSpec(w.shape, lambda t: (0, 0)))
    in_specs.append(pl.BlockSpec(w_tl.shape, lambda t: (0, 0)))

    out_specs = (
        pl.BlockSpec((B, latent_dim, tile_t), lambda t: (0, 0, t)),
        pl.BlockSpec((None, latent_dim, B), lambda t: (t, 0, 0)),
    )
    out_shapes = (
        jax.ShapeDtypeStruct((B, latent_dim, T), out_dtype),
        jax.ShapeDtypeStruct((n_tiles, latent_dim, B), jnp.float32),
    )

    # Explicit VMEM budget: double-buffered x/out/sums blocks + resident weights,
    # plus headroom for compiler-internal scratch; capped for v7x's 64 MiB VMEM.
    out_itemsize = np.dtype(out_dtype).itemsize
    block_bytes = (B * F * tile_t * 4
                   + B * latent_dim * tile_t * out_itemsize
                   + latent_dim * B * 4)
    weight_bytes = (sum(int(np.prod(w.shape)) for w in dense_ws)
                    + latent_dim * latent_dim) * 2
    vmem_limit = int(min(64 << 20,
                         max(32 << 20, 2 * (block_bytes + weight_bytes) + (8 << 20))))

    x_latent, lat_sums = pl.pallas_call(
        make_kernel(num_layers, B, latent_dim, tile_t, chunk_t, compute_dtype),
        grid=(n_tiles,),
        in_specs=in_specs,
        out_specs=out_specs,
        out_shape=out_shapes,
        compiler_params=pltpu.CompilerParams(
            dimension_semantics=("parallel",),       # no cross-step state
            vmem_limit_bytes=vmem_limit),
    )(x, *dense_ws, w_tl)

    # frame_judge(x).mean().view(1): frame_judge is linear with no bias, so
    # mean_{b,t}(w_j . lat[b,:,t]) == w_j . mean_{b,t} lat[b,:,t]  (exact).
    # The per-tile column sums were produced by the kernel, so x_latent is
    # never re-read from HBM.
    total = jnp.sum(lat_sums, axis=(0, 2))           # (latent,)
    f_j = (jnp.dot(total, params['judge_vec'].astype(jnp.float32))
           / jnp.float32(B * T)).reshape(1)
    return x_latent, f_j


if __name__ == "__main__":
    feature_channels, channels, latent_dim = 16, 8, 32
    B, T = 2, 2048
    tile_t, chunk_t = 1024, 256

    key = jax.random.PRNGKey(0)
    key, pk, xk = jax.random.split(key, 3)
    params = init_params(pk, feature_channels, channels, latent_dim)
    x = jax.random.normal(xk, (B, feature_channels, T), jnp.float32)

    x_latent, f_j = spectrum_discriminator_forward(
        x, params, tile_t=tile_t, chunk_t=chunk_t)
    jax.block_until_ready((x_latent, f_j))

    assert x_latent.shape == (B, latent_dim, T), x_latent.shape
    assert f_j.shape == (1,), f_j.shape
    assert bool(jnp.isfinite(f_j).all())
    print("KERNEL_OK")
</pallas_src>

<mosaic_0001>
module attributes {stable_mosaic.version = 11 : i64} {
  func.func @kernel(%arg0: i32, %arg1: memref<2x16x1024xf32, #tpu.memory_space<vmem>>, %arg2: memref<64x16xbf16, #tpu.memory_space<vmem>>, %arg3: memref<32x64xbf16, #tpu.memory_space<vmem>>, %arg4: memref<16x32xbf16, #tpu.memory_space<vmem>>, %arg5: memref<32x16xbf16, #tpu.memory_space<vmem>>, %arg6: memref<32x32xbf16, #tpu.memory_space<vmem>>, %arg7: memref<2x32x1024xbf16, #tpu.memory_space<vmem>>, %arg8: memref<1x32x2xf32, #tpu.memory_space<vmem>>) attributes {dimension_semantics = [#tpu.dimension_semantics<parallel>], iteration_bounds = array<i64: 2>, scalar_prefetch = 0 : i64, scratch_operands = 0 : i64, tpu.core_type = #tpu.core_type<tc>, window_params = [{transform_indices = @transform_0, window_bounds = array<i64: 2, 16, 1024>}, {pipeline_mode = #tpu.pipeline_mode<synchronous>, transform_indices = @transform_1, window_bounds = array<i64: 64, 16>}, {pipeline_mode = #tpu.pipeline_mode<synchronous>, transform_indices = @transform_2, window_bounds = array<i64: 32, 64>}, {pipeline_mode = #tpu.pipeline_mode<synchronous>, transform_indices = @transform_3, window_bounds = array<i64: 16, 32>}, {pipeline_mode = #tpu.pipeline_mode<synchronous>, transform_indices = @transform_4, window_bounds = array<i64: 32, 16>}, {pipeline_mode = #tpu.pipeline_mode<synchronous>, transform_indices = @transform_5, window_bounds = array<i64: 32, 32>}, {transform_indices = @transform_6, window_bounds = array<i64: 2, 32, 1024>}, {transform_indices = @transform_7, window_bounds = array<i64: 1, 32, 2>}]} {
    %c0 = arith.constant 0 : index
    %c0_0 = arith.constant 0 : index
    %0 = vector.load %arg2[%c0, %c0_0] : memref<64x16xbf16, #tpu.memory_space<vmem>>, vector<64x16xbf16>
    %c0_1 = arith.constant 0 : index
    %c0_2 = arith.constant 0 : index
    %1 = vector.load %arg3[%c0_1, %c0_2] : memref<32x64xbf16, #tpu.memory_space<vmem>>, vector<32x64xbf16>
    %c0_3 = arith.constant 0 : index
    %c0_4 = arith.constant 0 : index
    %2 = vector.load %arg4[%c0_3, %c0_4] : memref<16x32xbf16, #tpu.memory_space<vmem>>, vector<16x32xbf16>
    %c0_5 = arith.constant 0 : index
    %c0_6 = arith.constant 0 : index
    %3 = vector.load %arg5[%c0_5, %c0_6] : memref<32x16xbf16, #tpu.memory_space<vmem>>, vector<32x16xbf16>
    %c0_7 = arith.constant 0 : index
    %c0_8 = arith.constant 0 : index
    %4 = vector.load %arg6[%c0_7, %c0_8] : memref<32x32xbf16, #tpu.memory_space<vmem>>, vector<32x32xbf16>
    %cst = arith.constant 0.000000e+00 : f32
    %5 = vector.broadcast %cst : f32 to vector<32x1xf32>
    %c0_9 = arith.constant 0 : index
    %c0_10 = arith.constant 0 : index
    %c0_11 = arith.constant 0 : index
    %6 = vector.load %arg1[%c0_9, %c0_10, %c0_11] : memref<2x16x1024xf32, #tpu.memory_space<vmem>>, vector<1x16x256xf32>
    %7 = vector.shape_cast %6 : vector<1x16x256xf32> to vector<16x256xf32>
    %8 = arith.truncf %7 : vector<16x256xf32> to vector<16x256xbf16>
    %cst_12 = arith.constant dense<0.000000e+00> : vector<64x256xf32>
    %9 = tpu.matmul %0, %8, %cst_12 {dimension_numbers = #tpu.dot_dimension_numbers<[1], [0], [0], [1], [0, 0, 1, 1], [], []>} : vector<64x16xbf16>, vector<16x256xbf16>, vector<64x256xf32> -> vector<64x256xf32>
    %cst_13 = arith.constant 2.000000e-01 : f32
    %10 = vector.broadcast %cst_13 : f32 to vector<64x256xf32>
    %11 = arith.mulf %10, %9 : vector<64x256xf32>
    %12 = arith.maximumf %9, %11 : vector<64x256xf32>
    %13 = arith.truncf %12 : vector<64x256xf32> to vector<64x256xbf16>
    %cst_14 = arith.constant dense<0.000000e+00> : vector<32x256xf32>
    %14 = tpu.matmul %1, %13, %cst_14 {dimension_numbers = #tpu.dot_dimension_numbers<[1], [0], [0], [1], [0, 0, 1, 1], [], []>} : vector<32x64xbf16>, vector<64x256xbf16>, vector<32x256xf32> -> vector<32x256xf32>
    %cst_15 = arith.constant 2.000000e-01 : f32
    %15 = vector.broadcast %cst_15 : f32 to vector<32x256xf32>
    %16 = arith.mulf %15, %14 : vector<32x256xf32>
    %17 = arith.maximumf %14, %16 : vector<32x256xf32>
    %18 = arith.truncf %17 : vector<32x256xf32> to vector<32x256xbf16>
    %cst_16 = arith.constant dense<0.000000e+00> : vector<16x256xf32>
    %19 = tpu.matmul %2, %18, %cst_16 {dimension_numbers = #tpu.dot_dimension_numbers<[1], [0], [0], [1], [0, 0, 1, 1], [], []>} : vector<16x32xbf16>, vector<32x256xbf16>, vector<16x256xf32> -> vector<16x256xf32>
    %cst_17 = arith.constant 2.000000e-01 : f32
    %20 = vector.broadcast %cst_17 : f32 to vector<16x256xf32>
    %21 = arith.mulf %20, %19 : vector<16x256xf32>
    %22 = arith.maximumf %19, %21 : vector<16x256xf32>
    %23 = arith.truncf %22 : vector<16x256xf32> to vector<16x256xbf16>
    %cst_18 = arith.constant dense<0.000000e+00> : vector<32x256xf32>
    %24 = tpu.matmul %3, %23, %cst_18 {dimension_numbers = #tpu.dot_dimension_numbers<[1], [0], [0], [1], [0, 0, 1, 1], [], []>} : vector<32x16xbf16>, vector<16x256xbf16>, vector<32x256xf32> -> vector<32x256xf32>
    %cst_19 = arith.constant 2.000000e-01 : f32
    %25 = vector.broadcast %cst_19 : f32 to vector<32x256xf32>
    %26 = arith.mulf %25, %24 : vector<32x256xf32>
    %27 = arith.maximumf %24, %26 : vector<32x256xf32>
    %28 = arith.truncf %27 : vector<32x256xf32> to vector<32x256xbf16>
    %cst_20 = arith.constant dense<0.000000e+00> : vector<32x256xf32>
    %29 = tpu.matmul %4, %28, %cst_20 {dimension_numbers = #tpu.dot_dimension_numbers<[1], [0], [0], [1], [0, 0, 1, 1], [], []>} : vector<32x32xbf16>, vector<32x256xbf16>, vector<32x256xf32> -> vector<32x256xf32>
    %30 = arith.truncf %29 : vector<32x256xf32> to vector<32x256xbf16>
    %c0_21 = arith.constant 0 : index
    %c0_22 = arith.constant 0 : index
    %c0_23 = arith.constant 0 : index
    %31 = vector.load %arg7[%c0_21, %c0_22, %c0_23] : memref<2x32x1024xbf16, #tpu.memory_space<vmem>>, vector<1x32x256xbf16>
    %32 = vector.shape_cast %31 : vector<1x32x256xbf16> to vector<32x256xbf16>
    %33 = vector.shape_cast %30 : vector<32x256xbf16> to vector<1x32x256xbf16>
    tpu.vector_store %arg7[%c0_21, %c0_22, %c0_23], %33 {strides = array<i32>} : memref<2x32x1024xbf16, #tpu.memory_space<vmem>>, vector<1x32x256xbf16>,
    %cst_24 = arith.constant dense<0.000000e+00> : vector<32xf32>
    %34 = vector.multi_reduction <add>, %29, %cst_24 [1] : vector<32x256xf32> to vector<32xf32>
    %35 = vector.shape_cast %34 : vector<32xf32> to vector<32x1xf32>
    %36 = arith.addf %5, %35 : vector<32x1xf32>
    %c0_25 = arith.constant 0 : index
    %c0_26 = arith.constant 0 : index
    %c256 = arith.constant 256 : index
    %37 = vector.load %arg1[%c0_25, %c0_26, %c256] : memref<2x16x1024xf32, #tpu.memory_space<vmem>>, vector<1x16x256xf32>
    %38 = vector.shape_cast %37 : vector<1x16x256xf32> to vector<16x256xf32>
    %39 = arith.truncf %38 : vector<16x256xf32> to vector<16x256xbf16>
    %cst_27 = arith.constant dense<0.000000e+00> : vector<64x256xf32>
    %40 = tpu.matmul %0, %39, %cst_27 {dimension_numbers = #tpu.dot_dimension_numbers<[1], [0], [0], [1], [0, 0, 1, 1], [], []>} : vector<64x16xbf16>, vector<16x256xbf16>, vector<64x256xf32> -> vector<64x256xf32>
    %cst_28 = arith.constant 2.000000e-01 : f32
    %41 = vector.broadcast %cst_28 : f32 to vector<64x256xf32>
    %42 = arith.mulf %41, %40 : vector<64x256xf32>
    %43 = arith.maximumf %40, %42 : vector<64x256xf32>
    %44 = arith.truncf %43 : vector<64x256xf32> to vector<64x256xbf16>
    %cst_29 = arith.constant dense<0.000000e+00> : vector<32x256xf32>
    %45 = tpu.matmul %1, %44, %cst_29 {dimension_numbers = #tpu.dot_dimension_numbers<[1], [0], [0], [1], [0, 0, 1, 1], [], []>} : vector<32x64xbf16>, vector<64x256xbf16>, vector<32x256xf32> -> vector<32x256xf32>
    %cst_30 = arith.constant 2.000000e-01 : f32
    %46 = vector.broadcast %cst_30 : f32 to vector<32x256xf32>
    %47 = arith.mulf %46, %45 : vector<32x256xf32>
    %48 = arith.maximumf %45, %47 : vector<32x256xf32>
    %49 = arith.truncf %48 : vector<32x256xf32> to vector<32x256xbf16>
    %cst_31 = arith.constant dense<0.000000e+00> : vector<16x256xf32>
    %50 = tpu.matmul %2, %49, %cst_31 {dimension_numbers = #tpu.dot_dimension_numbers<[1], [0], [0], [1], [0, 0, 1, 1], [], []>} : vector<16x32xbf16>, vector<32x256xbf16>, vector<16x256xf32> -> vector<16x256xf32>
    %cst_32 = arith.constant 2.000000e-01 : f32
    %51 = vector.broadcast %cst_32 : f32 to vector<16x256xf32>
    %52 = arith.mulf %51, %50 : vector<16x256xf32>
    %53 = arith.maximumf %50, %52 : vector<16x256xf32>
    %54 = arith.truncf %53 : vector<16x256xf32> to vector<16x256xbf16>
    %cst_33 = arith.constant dense<0.000000e+00> : vector<32x256xf32>
    %55 = tpu.matmul %3, %54, %cst_33 {dimension_numbers = #tpu.dot_dimension_numbers<[1], [0], [0], [1], [0, 0, 1, 1], [], []>} : vector<32x16xbf16>, vector<16x256xbf16>, vector<32x256xf32> -> vector<32x256xf32>
    %cst_34 = arith.constant 2.000000e-01 : f32
    %56 = vector.broadcast %cst_34 : f32 to vector<32x256xf32>
    %57 = arith.mulf %56, %55 : vector<32x256xf32>
    %58 = arith.maximumf %55, %57 : vector<32x256xf32>
    %59 = arith.truncf %58 : vector<32x256xf32> to vector<32x256xbf16>
    %cst_35 = arith.constant dense<0.000000e+00> : vector<32x256xf32>
    %60 = tpu.matmul %4, %59, %cst_35 {dimension_numbers = #tpu.dot_dimension_numbers<[1], [0], [0], [1], [0, 0, 1, 1], [], []>} : vector<32x32xbf16>, vector<32x256xbf16>, vector<32x256xf32> -> vector<32x256xf32>
    %61 = arith.truncf %60 : vector<32x256xf32> to vector<32x256xbf16>
    %c0_36 = arith.constant 0 : index
    %c0_37 = arith.constant 0 : index
    %c256_38 = arith.constant 256 : index
    %62 = vector.load %arg7[%c0_36, %c0_37, %c256_38] : memref<2x32x1024xbf16, #tpu.memory_space<vmem>>, vector<1x32x256xbf16>
    %63 = vector.shape_cast %62 : vector<1x32x256xbf16> to vector<32x256xbf16>
    %64 = vector.shape_cast %61 : vector<32x256xbf16> to vector<1x32x256xbf16>
    tpu.vector_store %arg7[%c0_36, %c0_37, %c256_38], %64 {strides = array<i32>} : memref<2x32x1024xbf16, #tpu.memory_space<vmem>>, vector<1x32x256xbf16>,
    %cst_39 = arith.constant dense<0.000000e+00> : vector<32xf32>
    %65 = vector.multi_reduction <add>, %60, %cst_39 [1] : vector<32x256xf32> to vector<32xf32>
    %66 = vector.shape_cast %65 : vector<32xf32> to vector<32x1xf32>
    %67 = arith.addf %36, %66 : vector<32x1xf32>
    %c0_40 = arith.constant 0 : index
    %c0_41 = arith.constant 0 : index
    %c512 = arith.constant 512 : index
    %68 = vector.load %arg1[%c0_40, %c0_41, %c512] : memref<2x16x1024xf32, #tpu.memory_space<vmem>>, vector<1x16x256xf32>
    %69 = vector.shape_cast %68 : vector<1x16x256xf32> to vector<16x256xf32>
    %70 = arith.truncf %69 : vector<16x256xf32> to vector<16x256xbf16>
    %cst_42 = arith.constant dense<0.000000e+00> : vector<64x256xf32>
    %71 = tpu.matmul %0, %70, %cst_42 {dimension_numbers = #tpu.dot_dimension_numbers<[1], [0], [0], [1], [0, 0, 1, 1], [], []>} : vector<64x16xbf16>, vector<16x256xbf16>, vector<64x256xf32> -> vector<64x256xf32>
    %cst_43 = arith.constant 2.000000e-01 : f32
    %72 = vector.broadcast %cst_43 : f32 to vector<64x256xf32>
    %73 = arith.mulf %72, %71 : vector<64x256xf32>
    %74 = arith.maximumf %71, %73 : vector<64x256xf32>
    %75 = arith.truncf %74 : vector<64x256xf32> to vector<64x256xbf16>
    %cst_44 = arith.constant dense<0.000000e+00> : vector<32x256xf32>
    %76 = tpu.matmul %1, %75, %cst_44 {dimension_numbers = #tpu.dot_dimension_numbers<[1], [0], [0], [1], [0, 0, 1, 1], [], []>} : vector<32x64xbf16>, vector<64x256xbf16>, vector<32x256xf32> -> vector<32x256xf32>
    %cst_45 = arith.constant 2.000000e-01 : f32
    %77 = vector.broadcast %cst_45 : f32 to vector<32x256xf32>
    %78 = arith.mulf %77, %76 : vector<32x256xf32>
    %79 = arith.maximumf %76, %78 : vector<32x256xf32>
    %80 = arith.truncf %79 : vector<32x256xf32> to vector<32x256xbf16>
    %cst_46 = arith.constant dense<0.000000e+00> : vector<16x256xf32>
    %81 = tpu.matmul %2, %80, %cst_46 {dimension_numbers = #tpu.dot_dimension_numbers<[1], [0], [0], [1], [0, 0, 1, 1], [], []>} : vector<16x32xbf16>, vector<32x256xbf16>, vector<16x256xf32> -> vector<16x256xf32>
    %cst_47 = arith.constant 2.000000e-01 : f32
    %82 = vector.broadcast %cst_47 : f32 to vector<16x256xf32>
    %83 = arith.mulf %82, %81 : vector<16x256xf32>
    %84 = arith.maximumf %81, %83 : vector<16x256xf32>
    %85 = arith.truncf %84 : vector<16x256xf32> to vector<16x256xbf16>
    %cst_48 = arith.constant dense<0.000000e+00> : vector<32x256xf32>
    %86 = tpu.matmul %3, %85, %cst_48 {dimension_numbers = #tpu.dot_dimension_numbers<[1], [0], [0], [1], [0, 0, 1, 1], [], []>} : vector<32x16xbf16>, vector<16x256xbf16>, vector<32x256xf32> -> vector<32x256xf32>
    %cst_49 = arith.constant 2.000000e-01 : f32
    %87 = vector.broadcast %cst_49 : f32 to vector<32x256xf32>
    %88 = arith.mulf %87, %86 : vector<32x256xf32>
    %89 = arith.maximumf %86, %88 : vector<32x256xf32>
    %90 = arith.truncf %89 : vector<32x256xf32> to vector<32x256xbf16>
    %cst_50 = arith.constant dense<0.000000e+00> : vector<32x256xf32>
    %91 = tpu.matmul %4, %90, %cst_50 {dimension_numbers = #tpu.dot_dimension_numbers<[1], [0], [0], [1], [0, 0, 1, 1], [], []>} : vector<32x32xbf16>, vector<32x256xbf16>, vector<32x256xf32> -> vector<32x256xf32>
    %92 = arith.truncf %91 : vector<32x256xf32> to vector<32x256xbf16>
    %c0_51 = arith.constant 0 : index
    %c0_52 = arith.constant 0 : index
    %c512_53 = arith.constant 512 : index
    %93 = vector.load %arg7[%c0_51, %c0_52, %c512_53] : memref<2x32x1024xbf16, #tpu.memory_space<vmem>>, vector<1x32x256xbf16>
    %94 = vector.shape_cast %93 : vector<1x32x256xbf16> to vector<32x256xbf16>
    %95 = vector.shape_cast %92 : vector<32x256xbf16> to vector<1x32x256xbf16>
    tpu.vector_store %arg7[%c0_51, %c0_52, %c512_53], %95 {strides = array<i32>} : memref<2x32x1024xbf16, #tpu.memory_space<vmem>>, vector<1x32x256xbf16>,
    %cst_54 = arith.constant dense<0.000000e+00> : vector<32xf32>
    %96 = vector.multi_reduction <add>, %91, %cst_54 [1] : vector<32x256xf32> to vector<32xf32>
    %97 = vector.shape_cast %96 : vector<32xf32> to vector<32x1xf32>
    %98 = arith.addf %67, %97 : vector<32x1xf32>
    %c0_55 = arith.constant 0 : index
    %c0_56 = arith.constant 0 : index
    %c768 = arith.constant 768 : index
    %99 = vector.load %arg1[%c0_55, %c0_56, %c768] : memref<2x16x1024xf32, #tpu.memory_space<vmem>>, vector<1x16x256xf32>
    %100 = vector.shape_cast %99 : vector<1x16x256xf32> to vector<16x256xf32>
    %101 = arith.truncf %100 : vector<16x256xf32> to vector<16x256xbf16>
    %cst_57 = arith.constant dense<0.000000e+00> : vector<64x256xf32>
    %102 = tpu.matmul %0, %101, %cst_57 {dimension_numbers = #tpu.dot_dimension_numbers<[1], [0], [0], [1], [0, 0, 1, 1], [], []>} : vector<64x16xbf16>, vector<16x256xbf16>, vector<64x256xf32> -> vector<64x256xf32>
    %cst_58 = arith.constant 2.000000e-01 : f32
    %103 = vector.broadcast %cst_58 : f32 to vector<64x256xf32>
    %104 = arith.mulf %103, %102 : vector<64x256xf32>
    %105 = arith.maximumf %102, %104 : vector<64x256xf32>
    %106 = arith.truncf %105 : vector<64x256xf32> to vector<64x256xbf16>
    %cst_59 = arith.constant dense<0.000000e+00> : vector<32x256xf32>
    %107 = tpu.matmul %1, %106, %cst_59 {dimension_numbers = #tpu.dot_dimension_numbers<[1], [0], [0], [1], [0, 0, 1, 1], [], []>} : vector<32x64xbf16>, vector<64x256xbf16>, vector<32x256xf32> -> vector<32x256xf32>
    %cst_60 = arith.constant 2.000000e-01 : f32
    %108 = vector.broadcast %cst_60 : f32 to vector<32x256xf32>
    %109 = arith.mulf %108, %107 : vector<32x256xf32>
    %110 = arith.maximumf %107, %109 : vector<32x256xf32>
    %111 = arith.truncf %110 : vector<32x256xf32> to vector<32x256xbf16>
    %cst_61 = arith.constant dense<0.000000e+00> : vector<16x256xf32>
    %112 = tpu.matmul %2, %111, %cst_61 {dimension_numbers = #tpu.dot_dimension_numbers<[1], [0], [0], [1], [0, 0, 1, 1], [], []>} : vector<16x32xbf16>, vector<32x256xbf16>, vector<16x256xf32> -> vector<16x256xf32>
    %cst_62 = arith.constant 2.000000e-01 : f32
    %113 = vector.broadcast %cst_62 : f32 to vector<16x256xf32>
    %114 = arith.mulf %113, %112 : vector<16x256xf32>
    %115 = arith.maximumf %112, %114 : vector<16x256xf32>
    %116 = arith.truncf %115 : vector<16x256xf32> to vector<16x256xbf16>
    %cst_63 = arith.constant dense<0.000000e+00> : vector<32x256xf32>
    %117 = tpu.matmul %3, %116, %cst_63 {dimension_numbers = #tpu.dot_dimension_numbers<[1], [0], [0], [1], [0, 0, 1, 1], [], []>} : vector<32x16xbf16>, vector<16x256xbf16>, vector<32x256xf32> -> vector<32x256xf32>
    %cst_64 = arith.constant 2.000000e-01 : f32
    %118 = vector.broadcast %cst_64 : f32 to vector<32x256xf32>
    %119 = arith.mulf %118, %117 : vector<32x256xf32>
    %120 = arith.maximumf %117, %119 : vector<32x256xf32>
    %121 = arith.truncf %120 : vector<32x256xf32> to vector<32x256xbf16>
    %cst_65 = arith.constant dense<0.000000e+00> : vector<32x256xf32>
    %122 = tpu.matmul %4, %121, %cst_65 {dimension_numbers = #tpu.dot_dimension_numbers<[1], [0], [0], [1], [0, 0, 1, 1], [], []>} : vector<32x32xbf16>, vector<32x256xbf16>, vector<32x256xf32> -> vector<32x256xf32>
    %123 = arith.truncf %122 : vector<32x256xf32> to vector<32x256xbf16>
    %c0_66 = arith.constant 0 : index
    %c0_67 = arith.constant 0 : index
    %c768_68 = arith.constant 768 : index
    %124 = vector.load %arg7[%c0_66, %c0_67, %c768_68] : memref<2x32x1024xbf16, #tpu.memory_space<vmem>>, vector<1x32x256xbf16>
    %125 = vector.shape_cast %124 : vector<1x32x256xbf16> to vector<32x256xbf16>
    %126 = vector.shape_cast %123 : vector<32x256xbf16> to vector<1x32x256xbf16>
    tpu.vector_store %arg7[%c0_66, %c0_67, %c768_68], %126 {strides = array<i32>} : memref<2x32x1024xbf16, #tpu.memory_space<vmem>>, vector<1x32x256xbf16>,
    %cst_69 = arith.constant dense<0.000000e+00> : vector<32xf32>
    %127 = vector.multi_reduction <add>, %122, %cst_69 [1] : vector<32x256xf32> to vector<32xf32>
    %128 = vector.shape_cast %127 : vector<32xf32> to vector<32x1xf32>
    %129 = arith.addf %98, %128 : vector<32x1xf32>
    %c0_70 = arith.constant 0 : index
    %c0_71 = arith.constant 0 : index
    %c0_72 = arith.constant 0 : index
    %130 = vector.load %arg8[%c0_70, %c0_71, %c0_72] : memref<1x32x2xf32, #tpu.memory_space<vmem>>, vector<1x32x1xf32>
    %131 = vector.shape_cast %130 : vector<1x32x1xf32> to vector<32x1xf32>
    %132 = vector.shape_cast %129 : vector<32x1xf32> to vector<1x32x1xf32>
    tpu.vector_store %arg8[%c0_70, %c0_71, %c0_72], %132 {strides = array<i32>} : memref<1x32x2xf32, #tpu.memory_space<vmem>>, vector<1x32x1xf32>,
    %cst_73 = arith.constant 0.000000e+00 : f32
    %133 = vector.broadcast %cst_73 : f32 to vector<32x1xf32>
    %c1 = arith.constant 1 : index
    %c0_74 = arith.constant 0 : index
    %c0_75 = arith.constant 0 : index
    %134 = vector.load %arg1[%c1, %c0_74, %c0_75] : memref<2x16x1024xf32, #tpu.memory_space<vmem>>, vector<1x16x256xf32>
    %135 = vector.shape_cast %134 : vector<1x16x256xf32> to vector<16x256xf32>
    %136 = arith.truncf %135 : vector<16x256xf32> to vector<16x256xbf16>
    %cst_76 = arith.constant dense<0.000000e+00> : vector<64x256xf32>
    %137 = tpu.matmul %0, %136, %cst_76 {dimension_numbers = #tpu.dot_dimension_numbers<[1], [0], [0], [1], [0, 0, 1, 1], [], []>} : vector<64x16xbf16>, vector<16x256xbf16>, vector<64x256xf32> -> vector<64x256xf32>
    %cst_77 = arith.constant 2.000000e-01 : f32
    %138 = vector.broadcast %cst_77 : f32 to vector<64x256xf32>
    %139 = arith.mulf %138, %137 : vector<64x256xf32>
    %140 = arith.maximumf %137, %139 : vector<64x256xf32>
    %141 = arith.truncf %140 : vector<64x256xf32> to vector<64x256xbf16>
    %cst_78 = arith.constant dense<0.000000e+00> : vector<32x256xf32>
    %142 = tpu.matmul %1, %141, %cst_78 {dimension_numbers = #tpu.dot_dimension_numbers<[1], [0], [0], [1], [0, 0, 1, 1], [], []>} : vector<32x64xbf16>, vector<64x256xbf16>, vector<32x256xf32> -> vector<32x256xf32>
    %cst_79 = arith.constant 2.000000e-01 : f32
    %143 = vector.broadcast %cst_79 : f32 to vector<32x256xf32>
    %144 = arith.mulf %143, %142 : vector<32x256xf32>
    %145 = arith.maximumf %142, %144 : vector<32x256xf32>
    %146 = arith.truncf %145 : vector<32x256xf32> to vector<32x256xbf16>
    %cst_80 = arith.constant dense<0.000000e+00> : vector<16x256xf32>
    %147 = tpu.matmul %2, %146, %cst_80 {dimension_numbers = #tpu.dot_dimension_numbers<[1], [0], [0], [1], [0, 0, 1, 1], [], []>} : vector<16x32xbf16>, vector<32x256xbf16>, vector<16x256xf32> -> vector<16x256xf32>
    %cst_81 = arith.constant 2.000000e-01 : f32
    %148 = vector.broadcast %cst_81 : f32 to vector<16x256xf32>
    %149 = arith.mulf %148, %147 : vector<16x256xf32>
    %150 = arith.maximumf %147, %149 : vector<16x256xf32>
    %151 = arith.truncf %150 : vector<16x256xf32> to vector<16x256xbf16>
    %cst_82 = arith.constant dense<0.000000e+00> : vector<32x256xf32>
    %152 = tpu.matmul %3, %151, %cst_82 {dimension_numbers = #tpu.dot_dimension_numbers<[1], [0], [0], [1], [0, 0, 1, 1], [], []>} : vector<32x16xbf16>, vector<16x256xbf16>, vector<32x256xf32> -> vector<32x256xf32>
    %cst_83 = arith.constant 2.000000e-01 : f32
    %153 = vector.broadcast %cst_83 : f32 to vector<32x256xf32>
    %154 = arith.mulf %153, %152 : vector<32x256xf32>
    %155 = arith.maximumf %152, %154 : vector<32x256xf32>
    %156 = arith.truncf %155 : vector<32x256xf32> to vector<32x256xbf16>
    %cst_84 = arith.constant dense<0.000000e+00> : vector<32x256xf32>
    %157 = tpu.matmul %4, %156, %cst_84 {dimension_numbers = #tpu.dot_dimension_numbers<[1], [0], [0], [1], [0, 0, 1, 1], [], []>} : vector<32x32xbf16>, vector<32x256xbf16>, vector<32x256xf32> -> vector<32x256xf32>
    %158 = arith.truncf %157 : vector<32x256xf32> to vector<32x256xbf16>
    %c1_85 = arith.constant 1 : index
    %c0_86 = arith.constant 0 : index
    %c0_87 = arith.constant 0 : index
    %159 = vector.load %arg7[%c1_85, %c0_86, %c0_87] : memref<2x32x1024xbf16, #tpu.memory_space<vmem>>, vector<1x32x256xbf16>
    %160 = vector.shape_cast %159 : vector<1x32x256xbf16> to vector<32x256xbf16>
    %161 = vector.shape_cast %158 : vector<32x256xbf16> to vector<1x32x256xbf16>
    tpu.vector_store %arg7[%c1_85, %c0_86, %c0_87], %161 {strides = array<i32>} : memref<2x32x1024xbf16, #tpu.memory_space<vmem>>, vector<1x32x256xbf16>,
    %cst_88 = arith.constant dense<0.000000e+00> : vector<32xf32>
    %162 = vector.multi_reduction <add>, %157, %cst_88 [1] : vector<32x256xf32> to vector<32xf32>
    %163 = vector.shape_cast %162 : vector<32xf32> to vector<32x1xf32>
    %164 = arith.addf %133, %163 : vector<32x1xf32>
    %c1_89 = arith.constant 1 : index
    %c0_90 = arith.constant 0 : index
    %c256_91 = arith.constant 256 : index
    %165 = vector.load %arg1[%c1_89, %c0_90, %c256_91] : memref<2x16x1024xf32, #tpu.memory_space<vmem>>, vector<1x16x256xf32>
    %166 = vector.shape_cast %165 : vector<1x16x256xf32> to vector<16x256xf32>
    %167 = arith.truncf %166 : vector<16x256xf32> to vector<16x256xbf16>
    %cst_92 = arith.constant dense<0.000000e+00> : vector<64x256xf32>
    %168 = tpu.matmul %0, %167, %cst_92 {dimension_numbers = #tpu.dot_dimension_numbers<[1], [0], [0], [1], [0, 0, 1, 1], [], []>} : vector<64x16xbf16>, vector<16x256xbf16>, vector<64x256xf32> -> vector<64x256xf32>
    %cst_93 = arith.constant 2.000000e-01 : f32
    %169 = vector.broadcast %cst_93 : f32 to vector<64x256xf32>
    %170 = arith.mulf %169, %168 : vector<64x256xf32>
    %171 = arith.maximumf %168, %170 : vector<64x256xf32>
    %172 = arith.truncf %171 : vector<64x256xf32> to vector<64x256xbf16>
    %cst_94 = arith.constant dense<0.000000e+00> : vector<32x256xf32>
    %173 = tpu.matmul %1, %172, %cst_94 {dimension_numbers = #tpu.dot_dimension_numbers<[1], [0], [0], [1], [0, 0, 1, 1], [], []>} : vector<32x64xbf16>, vector<64x256xbf16>, vector<32x256xf32> -> vector<32x256xf32>
    %cst_95 = arith.constant 2.000000e-01 : f32
    %174 = vector.broadcast %cst_95 : f32 to vector<32x256xf32>
    %175 = arith.mulf %174, %173 : vector<32x256xf32>
    %176 = arith.maximumf %173, %175 : vector<32x256xf32>
    %177 = arith.truncf %176 : vector<32x256xf32> to vector<32x256xbf16>
    %cst_96 = arith.constant dense<0.000000e+00> : vector<16x256xf32>
    %178 = tpu.matmul %2, %177, %cst_96 {dimension_numbers = #tpu.dot_dimension_numbers<[1], [0], [0], [1], [0, 0, 1, 1], [], []>} : vector<16x32xbf16>, vector<32x256xbf16>, vector<16x256xf32> -> vector<16x256xf32>
    %cst_97 = arith.constant 2.000000e-01 : f32
    %179 = vector.broadcast %cst_97 : f32 to vector<16x256xf32>
    %180 = arith.mulf %179, %178 : vector<16x256xf32>
    %181 = arith.maximumf %178, %180 : vector<16x256xf32>
    %182 = arith.truncf %181 : vector<16x256xf32> to vector<16x256xbf16>
    %cst_98 = arith.constant dense<0.000000e+00> : vector<32x256xf32>
    %183 = tpu.matmul %3, %182, %cst_98 {dimension_numbers = #tpu.dot_dimension_numbers<[1], [0], [0], [1], [0, 0, 1, 1], [], []>} : vector<32x16xbf16>, vector<16x256xbf16>, vector<32x256xf32> -> vector<32x256xf32>
    %cst_99 = arith.constant 2.000000e-01 : f32
    %184 = vector.broadcast %cst_99 : f32 to vector<32x256xf32>
    %185 = arith.mulf %184, %183 : vector<32x256xf32>
    %186 = arith.maximumf %183, %185 : vector<32x256xf32>
    %187 = arith.truncf %186 : vector<32x256xf32> to vector<32x256xbf16>
    %cst_100 = arith.constant dense<0.000000e+00> : vector<32x256xf32>
    %188 = tpu.matmul %4, %187, %cst_100 {dimension_numbers = #tpu.dot_dimension_numbers<[1], [0], [0], [1], [0, 0, 1, 1], [], []>} : vector<32x32xbf16>, vector<32x256xbf16>, vector<32x256xf32> -> vector<32x256xf32>
    %189 = arith.truncf %188 : vector<32x256xf32> to vector<32x256xbf16>
    %c1_101 = arith.constant 1 : index
    %c0_102 = arith.constant 0 : index
    %c256_103 = arith.constant 256 : index
    %190 = vector.load %arg7[%c1_101, %c0_102, %c256_103] : memref<2x32x1024xbf16, #tpu.memory_space<vmem>>, vector<1x32x256xbf16>
    %191 = vector.shape_cast %190 : vector<1x32x256xbf16> to vector<32x256xbf16>
    %192 = vector.shape_cast %189 : vector<32x256xbf16> to vector<1x32x256xbf16>
    tpu.vector_store %arg7[%c1_101, %c0_102, %c256_103], %192 {strides = array<i32>} : memref<2x32x1024xbf16, #tpu.memory_space<vmem>>, vector<1x32x256xbf16>,
    %cst_104 = arith.constant dense<0.000000e+00> : vector<32xf32>
    %193 = vector.multi_reduction <add>, %188, %cst_104 [1] : vector<32x256xf32> to vector<32xf32>
    %194 = vector.shape_cast %193 : vector<32xf32> to vector<32x1xf32>
    %195 = arith.addf %164, %194 : vector<32x1xf32>
    %c1_105 = arith.constant 1 : index
    %c0_106 = arith.constant 0 : index
    %c512_107 = arith.constant 512 : index
    %196 = vector.load %arg1[%c1_105, %c0_106, %c512_107] : memref<2x16x1024xf32, #tpu.memory_space<vmem>>, vector<1x16x256xf32>
    %197 = vector.shape_cast %196 : vector<1x16x256xf32> to vector<16x256xf32>
    %198 = arith.truncf %197 : vector<16x256xf32> to vector<16x256xbf16>
    %cst_108 = arith.constant dense<0.000000e+00> : vector<64x256xf32>
    %199 = tpu.matmul %0, %198, %cst_108 {dimension_numbers = #tpu.dot_dimension_numbers<[1], [0], [0], [1], [0, 0, 1, 1], [], []>} : vector<64x16xbf16>, vector<16x256xbf16>, vector<64x256xf32> -> vector<64x256xf32>
    %cst_109 = arith.constant 2.000000e-01 : f32
    %200 = vector.broadcast %cst_109 : f32 to vector<64x256xf32>
    %201 = arith.mulf %200, %199 : vector<64x256xf32>
    %202 = arith.maximumf %199, %201 : vector<64x256xf32>
    %203 = arith.truncf %202 : vector<64x256xf32> to vector<64x256xbf16>
    %cst_110 = arith.constant dense<0.000000e+00> : vector<32x256xf32>
    %204 = tpu.matmul %1, %203, %cst_110 {dimension_numbers = #tpu.dot_dimension_numbers<[1], [0], [0], [1], [0, 0, 1, 1], [], []>} : vector<32x64xbf16>, vector<64x256xbf16>, vector<32x256xf32> -> vector<32x256xf32>
    %cst_111 = arith.constant 2.000000e-01 : f32
    %205 = vector.broadcast %cst_111 : f32 to vector<32x256xf32>
    %206 = arith.mulf %205, %204 : vector<32x256xf32>
    %207 = arith.maximumf %204, %206 : vector<32x256xf32>
    %208 = arith.truncf %207 : vector<32x256xf32> to vector<32x256xbf16>
    %cst_112 = arith.constant dense<0.000000e+00> : vector<16x256xf32>
    %209 = tpu.matmul %2, %208, %cst_112 {dimension_numbers = #tpu.dot_dimension_numbers<[1], [0], [0], [1], [0, 0, 1, 1], [], []>} : vector<16x32xbf16>, vector<32x256xbf16>, vector<16x256xf32> -> vector<16x256xf32>
    %cst_113 = arith.constant 2.000000e-01 : f32
    %210 = vector.broadcast %cst_113 : f32 to vector<16x256xf32>
    %211 = arith.mulf %210, %209 : vector<16x256xf32>
    %212 = arith.maximumf %209, %211 : vector<16x256xf32>
    %213 = arith.truncf %212 : vector<16x256xf32> to vector<16x256xbf16>
    %cst_114 = arith.constant dense<0.000000e+00> : vector<32x256xf32>
    %214 = tpu.matmul %3, %213, %cst_114 {dimension_numbers = #tpu.dot_dimension_numbers<[1], [0], [0], [1], [0, 0, 1, 1], [], []>} : vector<32x16xbf16>, vector<16x256xbf16>, vector<32x256xf32> -> vector<32x256xf32>
    %cst_115 = arith.constant 2.000000e-01 : f32
    %215 = vector.broadcast %cst_115 : f32 to vector<32x256xf32>
    %216 = arith.mulf %215, %214 : vector<32x256xf32>
    %217 = arith.maximumf %214, %216 : vector<32x256xf32>
    %218 = arith.truncf %217 : vector<32x256xf32> to vector<32x256xbf16>
    %cst_116 = arith.constant dense<0.000000e+00> : vector<32x256xf32>
    %219 = tpu.matmul %4, %218, %cst_116 {dimension_numbers = #tpu.dot_dimension_numbers<[1], [0], [0], [1], [0, 0, 1, 1], [], []>} : vector<32x32xbf16>, vector<32x256xbf16>, vector<32x256xf32> -> vector<32x256xf32>
    %220 = arith.truncf %219 : vector<32x256xf32> to vector<32x256xbf16>
    %c1_117 = arith.constant 1 : index
    %c0_118 = arith.constant 0 : index
    %c512_119 = arith.constant 512 : index
    %221 = vector.load %arg7[%c1_117, %c0_118, %c512_119] : memref<2x32x1024xbf16, #tpu.memory_space<vmem>>, vector<1x32x256xbf16>
    %222 = vector.shape_cast %221 : vector<1x32x256xbf16> to vector<32x256xbf16>
    %223 = vector.shape_cast %220 : vector<32x256xbf16> to vector<1x32x256xbf16>
    tpu.vector_store %arg7[%c1_117, %c0_118, %c512_119], %223 {strides = array<i32>} : memref<2x32x1024xbf16, #tpu.memory_space<vmem>>, vector<1x32x256xbf16>,
    %cst_120 = arith.constant dense<0.000000e+00> : vector<32xf32>
    %224 = vector.multi_reduction <add>, %219, %cst_120 [1] : vector<32x256xf32> to vector<32xf32>
    %225 = vector.shape_cast %224 : vector<32xf32> to vector<32x1xf32>
    %226 = arith.addf %195, %225 : vector<32x1xf32>
    %c1_121 = arith.constant 1 : index
    %c0_122 = arith.constant 0 : index
    %c768_123 = arith.constant 768 : index
    %227 = vector.load %arg1[%c1_121, %c0_122, %c768_123] : memref<2x16x1024xf32, #tpu.memory_space<vmem>>, vector<1x16x256xf32>
    %228 = vector.shape_cast %227 : vector<1x16x256xf32> to vector<16x256xf32>
    %229 = arith.truncf %228 : vector<16x256xf32> to vector<16x256xbf16>
    %cst_124 = arith.constant dense<0.000000e+00> : vector<64x256xf32>
    %230 = tpu.matmul %0, %229, %cst_124 {dimension_numbers = #tpu.dot_dimension_numbers<[1], [0], [0], [1], [0, 0, 1, 1], [], []>} : vector<64x16xbf16>, vector<16x256xbf16>, vector<64x256xf32> -> vector<64x256xf32>
    %cst_125 = arith.constant 2.000000e-01 : f32
    %231 = vector.broadcast %cst_125 : f32 to vector<64x256xf32>
    %232 = arith.mulf %231, %230 : vector<64x256xf32>
    %233 = arith.maximumf %230, %232 : vector<64x256xf32>
    %234 = arith.truncf %233 : vector<64x256xf32> to vector<64x256xbf16>
    %cst_126 = arith.constant dense<0.000000e+00> : vector<32x256xf32>
    %235 = tpu.matmul %1, %234, %cst_126 {dimension_numbers = #tpu.dot_dimension_numbers<[1], [0], [0], [1], [0, 0, 1, 1], [], []>} : vector<32x64xbf16>, vector<64x256xbf16>, vector<32x256xf32> -> vector<32x256xf32>
    %cst_127 = arith.constant 2.000000e-01 : f32
    %236 = vector.broadcast %cst_127 : f32 to vector<32x256xf32>
    %237 = arith.mulf %236, %235 : vector<32x256xf32>
    %238 = arith.maximumf %235, %237 : vector<32x256xf32>
    %239 = arith.truncf %238 : vector<32x256xf32> to vector<32x256xbf16>
    %cst_128 = arith.constant dense<0.000000e+00> : vector<16x256xf32>
    %240 = tpu.matmul %2, %239, %cst_128 {dimension_numbers = #tpu.dot_dimension_numbers<[1], [0], [0], [1], [0, 0, 1, 1], [], []>} : vector<16x32xbf16>, vector<32x256xbf16>, vector<16x256xf32> -> vector<16x256xf32>
    %cst_129 = arith.constant 2.000000e-01 : f32
    %241 = vector.broadcast %cst_129 : f32 to vector<16x256xf32>
    %242 = arith.mulf %241, %240 : vector<16x256xf32>
    %243 = arith.maximumf %240, %242 : vector<16x256xf32>
    %244 = arith.truncf %243 : vector<16x256xf32> to vector<16x256xbf16>
    %cst_130 = arith.constant dense<0.000000e+00> : vector<32x256xf32>
    %245 = tpu.matmul %3, %244, %cst_130 {dimension_numbers = #tpu.dot_dimension_numbers<[1], [0], [0], [1], [0, 0, 1, 1], [], []>} : vector<32x16xbf16>, vector<16x256xbf16>, vector<32x256xf32> -> vector<32x256xf32>
    %cst_131 = arith.constant 2.000000e-01 : f32
    %246 = vector.broadcast %cst_131 : f32 to vector<32x256xf32>
    %247 = arith.mulf %246, %245 : vector<32x256xf32>
    %248 = arith.maximumf %245, %247 : vector<32x256xf32>
    %249 = arith.truncf %248 : vector<32x256xf32> to vector<32x256xbf16>
    %cst_132 = arith.constant dense<0.000000e+00> : vector<32x256xf32>
    %250 = tpu.matmul %4, %249, %cst_132 {dimension_numbers = #tpu.dot_dimension_numbers<[1], [0], [0], [1], [0, 0, 1, 1], [], []>} : vector<32x32xbf16>, vector<32x256xbf16>, vector<32x256xf32> -> vector<32x256xf32>
    %251 = arith.truncf %250 : vector<32x256xf32> to vector<32x256xbf16>
    %c1_133 = arith.constant 1 : index
    %c0_134 = arith.constant 0 : index
    %c768_135 = arith.constant 768 : index
    %252 = vector.load %arg7[%c1_133, %c0_134, %c768_135] : memref<2x32x1024xbf16, #tpu.memory_space<vmem>>, vector<1x32x256xbf16>
    %253 = vector.shape_cast %252 : vector<1x32x256xbf16> to vector<32x256xbf16>
    %254 = vector.shape_cast %251 : vector<32x256xbf16> to vector<1x32x256xbf16>
    tpu.vector_store %arg7[%c1_133, %c0_134, %c768_135], %254 {strides = array<i32>} : memref<2x32x1024xbf16, #tpu.memory_space<vmem>>, vector<1x32x256xbf16>,
    %cst_136 = arith.constant dense<0.000000e+00> : vector<32xf32>
    %255 = vector.multi_reduction <add>, %250, %cst_136 [1] : vector<32x256xf32> to vector<32xf32>
    %256 = vector.shape_cast %255 : vector<32xf32> to vector<32x1xf32>
    %257 = arith.addf %226, %256 : vector<32x1xf32>
    %c0_137 = arith.constant 0 : index
    %c0_138 = arith.constant 0 : index
    %c1_139 = arith.constant 1 : index
    %258 = vector.load %arg8[%c0_137, %c0_138, %c1_139] : memref<1x32x2xf32, #tpu.memory_space<vmem>>, vector<1x32x1xf32>
    %259 = vector.shape_cast %258 : vector<1x32x1xf32> to vector<32x1xf32>
    %260 = vector.shape_cast %257 : vector<32x1xf32> to vector<1x32x1xf32>
    tpu.vector_store %arg8[%c0_137, %c0_138, %c1_139], %260 {strides = array<i32>} : memref<1x32x2xf32, #tpu.memory_space<vmem>>, vector<1x32x1xf32>,
    return
  }
  func.func @transform_0(%arg0: i32) -> (i32, i32, i32) {
    %c0_i32 = arith.constant 0 : i32
    %c0_i32_0 = arith.constant 0 : i32
    %c0_i32_1 = arith.constant 0 : i32
    return %c0_i32, %c0_i32_0, %arg0 : i32, i32, i32
  }
  func.func @transform_1(%arg0: i32) -> (i32, i32) {
    %c0_i32 = arith.constant 0 : i32
    %c0_i32_0 = arith.constant 0 : i32
    %c0_i32_1 = arith.constant 0 : i32
    return %c0_i32, %c0_i32_0 : i32, i32
  }
  func.func @transform_2(%arg0: i32) -> (i32, i32) {
    %c0_i32 = arith.constant 0 : i32
    %c0_i32_0 = arith.constant 0 : i32
    %c0_i32_1 = arith.constant 0 : i32
    return %c0_i32, %c0_i32_0 : i32, i32
  }
  func.func @transform_3(%arg0: i32) -> (i32, i32) {
    %c0_i32 = arith.constant 0 : i32
    %c0_i32_0 = arith.constant 0 : i32
    %c0_i32_1 = arith.constant 0 : i32
    return %c0_i32, %c0_i32_0 : i32, i32
  }
  func.func @transform_4(%arg0: i32) -> (i32, i32) {
    %c0_i32 = arith.constant 0 : i32
    %c0_i32_0 = arith.constant 0 : i32
    %c0_i32_1 = arith.constant 0 : i32
    return %c0_i32, %c0_i32_0 : i32, i32
  }
  func.func @transform_5(%arg0: i32) -> (i32, i32) {
    %c0_i32 = arith.constant 0 : i32
    %c0_i32_0 = arith.constant 0 : i32
    %c0_i32_1 = arith.constant 0 : i32
    return %c0_i32, %c0_i32_0 : i32, i32
  }
  func.func @transform_6(%arg0: i32) -> (i32, i32, i32) {
    %c0_i32 = arith.constant 0 : i32
    %c0_i32_0 = arith.constant 0 : i32
    %c0_i32_1 = arith.constant 0 : i32
    return %c0_i32, %c0_i32_0, %arg0 : i32, i32, i32
  }
  func.func @transform_7(%arg0: i32) -> (i32, i32, i32) {
    %c0_i32 = arith.constant 0 : i32
    %c0_i32_0 = arith.constant 0 : i32
    %c0_i32_1 = arith.constant 0 : i32
    return %arg0, %c0_i32, %c0_i32_0 : i32, i32, i32
  }
}

</mosaic_0001>

<bundles_post_ra>
// kernel: tpu_custom_call.1
= control target key start
LH: loop header
LB: loop body
LE: loop exit
PB: predicated region body
PF: predicated region fallthrough
CT: control target
= control target key end

     0   :  { %13 = vsyncpa [#allocation3], 0  ;;  %s4416_s0 = inlined_call_operand.hbm [shape: f32[2,16,2048], index: 0, kind: input, shape index: {}]   ;;  %s4417_s1 = inlined_call_operand.vmem [shape: bf16[64,16], index: 1, kind: input, shape index: {}]   ;;  %s4418_s2 = inlined_call_operand.vmem [shape: bf16[32,64], index: 2, kind: input, shape index: {}]   ;;  %s4419_s3 = inlined_call_operand.vmem [shape: bf16[16,32], index: 3, kind: input, shape index: {}]   ;;  %s4420_s4 = inlined_call_operand.vmem [shape: bf16[32,16], index: 4, kind: input, shape index: {}]   ;;  %s4421_s5 = inlined_call_operand.vmem [shape: bf16[32,32], index: 5, kind: input, shape index: {}]   ;;  %s4422_s6 = inlined_call_operand.hbm [shape: bf16[2,32,2048], index: 6, kind: output, shape index: {0}]   ;;  %s4423_s7 = inlined_call_operand.vmem [shape: f32[2,32,2], index: 7, kind: output, shape index: {1}]  }
   0x1   :  { %15 = vsyncpa [#allocation3 + $0x1], 0 }
   0x2   :  { %16 = vsyncpa [#allocation4], 0 }
   0x3   :  { %18 = vsyncpa [#allocation4 + $0x1], 0  ;;  %s3622_s24 = smov 0   ;;  %s3624_s25 = smov 0  }
   0x4   :  { %s3626_s26 = smov 0   ;;  %s3628_s27 = smov 0  }
   0x5 LB: > { %s3643_s28 = sadd.s32 4294967295, %s3574_s27   ;;  %s3122_s29 = sadd.s32 4294967294, %s3574_s27   ;;  %s3574_s27 = sphi %s3628_s27, %s4434_s27   ;;  %s3570_s26 = sphi %s3626_s26, %s4433_s26   ;;  %s3566_s25 = sphi %s3624_s25, %s4432_s25   ;;  %s3562_s24 = sphi %s3622_s24, %s4431_s24  }
   0x6   : > { %s3647_s30 = sadd.s32 1, %s3574_s27   ;;  %s31_s8 = sadd.s32 1, %s3570_s26 }
   0x7   : > { %s28_s9 = ssub.s32 %s3574_s27, %s3647_s30  ;;  %p38_p0 = scmp.ne.s32.totalorder %s3570_s26, %s3566_s25 }
   0x8   : > { %p29_p1 = scmp.eq.s32.totalorder %s28_s9, 0  ;;  %p39_p2 = scmp.eq.s32.totalorder %s3574_s27, 0 }
   0x9   : > { %p44_p3 = scmp.ne.s32.totalorder %s3566_s25, %s3562_s24  ;;  %p45_p4 = scmp.eq.s32.totalorder %s3643_s28, 0 }
   0xa   : > { %s3659_s10 = scalar_select %p29_p1, %s3570_s26, %s31_s8  }
   0xb   : > { %p3661_p5 = por %p39_p2, %p38_p0  ;;  %p3665_p6 = por %p45_p4, %p44_p3 }
   0xc   : > { %4424 = sst [smem:[#allocation8_spill]] %s3659_s10  ;;  %p173_p7 = scmp.eq.s32.totalorder %s3643_s28, 1 }
   0xd   : > { %p179_p8 = scmp.eq.s32.totalorder %s3122_s29, 1  ;;  %p3124_p9 = scmp.ge.s32.totalorder %s3574_s27, 2 }
   0xe   : > { %p3416_p10 = scmp.lt.s32.totalorder %s3574_s27, 2  ;;  %p3672_p11 = por %p173_p7, %p38_p0 }
   0xf   : > { %p3676_p12 = por %p179_p8, %p44_p3  ;;  %s240_s15 = sand.u32 1, %s3570_s26  }
  0x10   : > { %s3390_s16 = sshll.u32 %s3574_s27, 6  ;;  %s3125_s17 = sshll.u32 %s240_s15, 8 }
  0x11   : > { %s249_s20 = scalar_lea.hbm %s4416_s0, %s3390_s16  ;;  %s244_s22 = scalar_lea.vmem [#allocation2], %s3125_s17 }
  0x12   : > { %s250_s21 = sshll.u32 %s249_s20, 4  ;;  %s252_s23 = sshll.u32 %s244_s22, 4  ;;  %s251_s21 = int_to_ptr.hbm [resolvable:$true] %s250_s21  ;;  %s253_s23 = int_to_ptr.vmem [resolvable:$true] %s252_s23 }
  0x13   : > { %p3687_p13 = pnand %p3416_p10, %p3661_p5  ;;  %p3128_p0 = scmp.ge.s32.totalorder %s3574_s27, 1 }
  0x14   : > { %s241_s8 = scalar_lea.sflag [#allocation3], %s240_s15  ;;  %s3478_s9 = sshra.s32 %s251_s21, 4  ;;  %s3479_s9 = int_to_ptr.hbm [resolvable:$true] %s3478_s9 }
  0x15   : > { %s3480_s10 = scalar_lea.hbm %s3479_s9, 256  ;;  %p3482_p2 = pneg %p3687_p13 }
  0x16   : > { %p3481_p1 = scmp.ne.s32.totalorder %s3479_s9, %s3480_s10  ;;  %s3485_s18 = scalar_lea.hbm %s4416_s0, 512 }
  0x17   : > { %p3486_p5 = scmp.lt.s32.totalorder %s3479_s9, %s4416_s0  ;;  %p3487_p7 = scmp.lt.s32.totalorder %s3485_s18, %s3480_s10 }
  0x18   : > { %p3483_p3 = pnand %p3482_p2, %p3481_p1 }
  0x19   : > { %p3488_p8 = por %p3487_p7, %p3486_p5 }
  0x1a   : > { %p3484_p4 = pneg %p3483_p3 }
  0x1c   : > { %p3489_p10 = pnand %p3488_p8, %p3484_p4 }
  0x1e   : > { %3492 = shalt.err (!%p3489_p10)
}
  0x1f   : > { %s3576_s15 = smov 2048   ;;  %s3577_s20 = smov 1024  }
  0x20   : > { %s3578_s22 = smov 64   ;;  %p260_p1 = scmp.lt.s32.totalorder %s3574_s27, 3 }
  0x21   : > { %3411 = dma.hbm_to_vmem [thread:$0]  (!%p3687_p13), %s251_s21, 4096, %s253_s23, %s241_s8, %s3576_s15, %s3577_s20, %s3578_s22  }
  0x22   : > { %p261_p2 = pnand %p3128_p0, %p260_p1 }
  0x23   : > { %s3706_s16 = sand.u32 (!%p261_p2), 1, %s3566_s25  }
  0x24   : > { %264 = sbr.rel (%p261_p2) target bundleno = 4857 (0x12f9), region = 44  ;;  %s3129_s10 = sshll.u32 (!%p261_p2), %s3706_s16, 8 }
  0x25   : > { %s267_s9 = scalar_lea.sflag (!%p261_p2), [#allocation3], %s3706_s16  ;;  %s3712_s17 = scalar_lea.vmem (!%p261_p2), [#allocation2], %s3129_s10 }
  0x29   : > { %3553 = dma.done.wait (%p3665_p6), %s267_s9, 4096  }
  0x2a   : > { %3555 = vsyncadd (%p3665_p6), %s267_s9, 4294963200  ;;  %v337_v0 = vld [vmem:[%s3712_s17] sm:$0xff]  ;;  %v338_v2 = vld [vmem:[%s3712_s17 + $0x8] sm:$0xff]  ;;  %vm363_vm0 = vcmask 130048   ;;  %vm484_vm1 = vcmask 523264   ;;  %vm554_vm2 = vcmask 261120  }
  0x2b   : > { %v339_v1 = vld [vmem:[%s3712_s17 + $0x40] sm:$0xff]  ;;  %v340_v4 = vld [vmem:[%s3712_s17 + $0x48] sm:$0xff]  ;;  %v3743_v8 = vld [vmem:[%s4417_s1 + $0x10] sm:$0xff]  ;;  %s3859_s22 = scalar_lea.vmem [#allocation5], %s3129_s10  ;;  %p309_p6 = scmp.lt.s32.totalorder %s3643_s28, 1  ;;  %vm1708_vm3 = vcmask 7168  }
  0x2c   : > { %v341_v3 = vpack.c.bf16 %v339_v1, %v337_v0  ;;  %v342_v5 = vpack.c.bf16 %v340_v4, %v338_v2  ;;  %v3725_v6 = vld [vmem:[%s4417_s1] sm:$0xff]  ;;  %v3734_v7 = vld [vmem:[%s4417_s1 + $0x8] sm:$0xff]  ;;  %v3752_v9 = vld [vmem:[%s4417_s1 + $0x18] sm:$0xff]  ;;  %s3403_s9 = sshll.u32 %s3643_s28, 5  ;;  %s3018_s8 = sshll.u32 %s3859_s22, 4  ;;  %s3019_s8 = int_to_ptr.vmem [resolvable:$true] %s3018_s8 }
  0x2d   : > { %v3761_v2 = vld [vmem:[%s4418_s2] sm:$0xff]  ;;  %s310_s15 = scalar_select %p309_p6, %s3643_s28, 1 }
  0x2e   : > { %383 = vmatpush.bf16.msra.mxu0 %v341_v3  ;;  %412 = vmatpush.bf16.msra.mxu1 %v342_v5  ;;  %v3770_v3 = vld [vmem:[%s4418_s2 + $0x8] sm:$0xff]  ;;  %s3017_s29 = scalar_lea.hbm %s4422_s6, %s3403_s9  ;;  %s3001_s28 = scalar_lea.sflag [#allocation4], %s3706_s16 }
  0x2f   : > { %s3391_s20 = sshll.u32 %s310_s15, 5  ;;  %s3020_s18 = sshll.u32 %s3017_s29, 4  ;;  %s3021_s18 = int_to_ptr.hbm [resolvable:$true] %s3020_s18 }
  0x30   : > { %s4109_s21 = scalar_lea.vmem %s4423_s7, %s3391_s20  ;;  %s3528_s20 = scalar_lea.hbm %s4422_s6, 512 }
  0x31   : > { %3149 = vmatmul.msk.bf16.vlgmr.msra.gmra.mxu0 %vm363_vm0, %v3725_v6  ;;  %3153 = vmatmul.msk.bf16.vlgmr.msra.gmra.mxu1 %vm363_vm0, %v3725_v6 }
  0x41   : > { %3150 = vmatmul.msk.bf16.gmra.mxu0 %vm363_vm0, %v3734_v7  ;;  %3154 = vmatmul.msk.bf16.gmra.mxu1 %vm363_vm0, %v3734_v7 }
  0x51   : > { %3151 = vmatmul.msk.bf16.gmra.mxu0 %vm363_vm0, %v3743_v8  ;;  %3155 = vmatmul.msk.bf16.gmra.mxu1 %vm363_vm0, %v3743_v8 }
  0x61   : > { %3152 = vmatmul.msk.bf16.gmra.mxu0 %vm363_vm0, %v3752_v9  ;;  %3156 = vmatmul.msk.bf16.gmra.mxu1 %vm363_vm0, %v3752_v9 }
  0xae   : > { %v385_v10 = vpop.f32.mrf.mxu0  ;;  %v414_v11 = vpop.f32.mrf.mxu1 }
  0xaf   : > { %v434_v54 = vmul.f32 0.2, %v385_v10  ;;  %v435_v56 = vmul.f32 0.2, %v414_v11 }
  0xb1   : > { %v450_v62 = vmax.f32 %v385_v10, %v434_v54  ;;  %v451_v63 = vmax.f32 %v414_v11, %v435_v56 }
  0xb6   : > { %v387_v12 = vpop.f32.mrf.mxu0  ;;  %v416_v13 = vpop.f32.mrf.mxu1 }
  0xb7   : > { %v436_v48 = vmul.f32 0.2, %v387_v12  ;;  %v437_v51 = vmul.f32 0.2, %v416_v13 }
  0xb9   : > { %v452_v59 = vmax.f32 %v387_v12, %v436_v48  ;;  %v453_v61 = vmax.f32 %v416_v13, %v437_v51  ;;  %v751_v48 = vld [vmem:[%s3712_s17 + $0x58] sm:$0xff] }
  0xbb   : > { %v466_v0 = vpack.c.bf16 %v452_v59, %v450_v62  ;;  %v467_v1 = vpack.c.bf16 %v453_v61, %v451_v63 }
  0xbe   : > { %v390_v14 = vpop.f32.mrf.mxu0  ;;  %v419_v15 = vpop.f32.mrf.mxu1 }
  0xbf   : > { %v438_v44 = vmul.f32 0.2, %v390_v14  ;;  %v439_v46 = vmul.f32 0.2, %v419_v15 }
  0xc1   : > { %v454_v55 = vmax.f32 %v390_v14, %v438_v44  ;;  %v455_v57 = vmax.f32 %v419_v15, %v439_v46  ;;  %v748_v44 = vld [vmem:[%s3712_s17 + $0x10] sm:$0xff] }
  0xc6   : > { %v392_v16 = vpop.f32.mrf.mxu0  ;;  %v421_v17 = vpop.f32.mrf.mxu1 }
  0xc7   : > { %v440_v38 = vmul.f32 0.2, %v392_v16  ;;  %v441_v41 = vmul.f32 0.2, %v421_v17 }
  0xc9   : > { %v456_v50 = vmax.f32 %v392_v16, %v440_v38  ;;  %v457_v53 = vmax.f32 %v421_v17, %v441_v41 }
  0xcb   : > { %v468_v58 = vpack.c.bf16 %v456_v50, %v454_v55  ;;  %v469_v60 = vpack.c.bf16 %v457_v53, %v455_v57  ;;  %v3792_v57 = vld [vmem:[%s4420_s4] sm:$0xff] }
  0xce   : > { %v395_v18 = vpop.f32.mrf.mxu0  ;;  %v424_v19 = vpop.f32.mrf.mxu1 }
  0xcf   : > { %v442_v32 = vmul.f32 0.2, %v395_v18  ;;  %v443_v35 = vmul.f32 0.2, %v424_v19 }
  0xd1   : > { %v458_v45 = vmax.f32 %v395_v18, %v442_v32  ;;  %v459_v47 = vmax.f32 %v424_v19, %v443_v35 }
  0xd6   : > { %v397_v20 = vpop.f32.mrf.mxu0  ;;  %v426_v21 = vpop.f32.mrf.mxu1 }
  0xd7   : > { %v444_v27 = vmul.f32 0.2, %v397_v20  ;;  %v445_v30 = vmul.f32 0.2, %v426_v21 }
  0xd9   : > { %v460_v40 = vmax.f32 %v397_v20, %v444_v27  ;;  %v461_v43 = vmax.f32 %v426_v21, %v445_v30 }
  0xdb   : > { %v470_v49 = vpack.c.bf16 %v460_v40, %v458_v45  ;;  %v471_v52 = vpack.c.bf16 %v461_v43, %v459_v47  ;;  %v750_v45 = vld [vmem:[%s3712_s17 + $0x50] sm:$0xff]  ;;  %v749_v47 = vld [vmem:[%s3712_s17 + $0x18] sm:$0xff] }
  0xdc   : > { %v752_v53 = vpack.c.bf16 %v750_v45, %v748_v44  ;;  %v753_v55 = vpack.c.bf16 %v751_v48, %v749_v47 }
  0xde   : > { %v400_v22 = vpop.f32.mrf.mxu0  ;;  %v429_v23 = vpop.f32.mrf.mxu1 }
  0xdf   : > { %v446_v24 = vmul.f32 0.2, %v400_v22  ;;  %v447_v25 = vmul.f32 0.2, %v429_v23 }
  0xe1   : > { %v462_v33 = vmax.f32 %v400_v22, %v446_v24  ;;  %v463_v36 = vmax.f32 %v429_v23, %v447_v25 }
  0xe6   : > { %v402_v26 = vpop.f32.mrf.mxu0  ;;  %v431_v29 = vpop.f32.mrf.mxu1 }
  0xe7   : > { %v448_v28 = vmul.f32 0.2, %v402_v26  ;;  %v449_v31 = vmul.f32 0.2, %v431_v29 }
  0xe9   : > { %v464_v34 = vmax.f32 %v402_v26, %v448_v28  ;;  %v465_v37 = vmax.f32 %v431_v29, %v449_v31 }
  0xeb   : > { %v472_v39 = vpack.c.bf16 %v464_v34, %v462_v33  ;;  %v473_v42 = vpack.c.bf16 %v465_v37, %v463_v36  ;;  %v3779_v36 = vld [vmem:[%s4419_s3] sm:$0xff] }
  0xed   : > { %495 = vmatpush.bf16.msra.mxu2 %v472_v39  ;;  %514 = vmatpush.bf16.msra.mxu3 %v473_v42 }
  0xf1   : > { %496 = vmatpush.bf16.msra.mxu2 %v470_v49  ;;  %515 = vmatpush.bf16.msra.mxu3 %v471_v52 }
  0xf5   : > { %497 = vmatpush.bf16.msra.mxu2 %v468_v58  ;;  %516 = vmatpush.bf16.msra.mxu3 %v469_v60  ;;  %v3801_v58 = vld [vmem:[%s4420_s4 + $0x8] sm:$0xff] }
  0xf9   : > { %498 = vmatpush.bf16.msra.mxu2 %v466_v0  ;;  %517 = vmatpush.bf16.msra.mxu3 %v467_v1 }
  0xfc   : > { %3165 = vmatmul.msk.bf16.vlgmr.msra.gmra.mxu2 %vm484_vm1, %v3761_v2  ;;  %3167 = vmatmul.msk.bf16.vlgmr.msra.gmra.mxu3 %vm484_vm1, %v3761_v2 }
 0x10c   : > { %3166 = vmatmul.msk.bf16.gmra.mxu2 %vm484_vm1, %v3770_v3  ;;  %3168 = vmatmul.msk.bf16.gmra.mxu3 %vm484_vm1, %v3770_v3 }
 0x17f   : > { %v500_v4 = vpop.f32.mrf.mxu2  ;;  %v519_v5 = vpop.f32.mrf.mxu3 }
 0x180   : > { %v529_v22 = vmul.f32 0.2, %v500_v4  ;;  %v530_v25 = vmul.f32 0.2, %v519_v5 }
 0x182   : > { %v537_v32 = vmax.f32 %v500_v4, %v529_v22  ;;  %v538_v33 = vmax.f32 %v519_v5, %v530_v25 }
 0x187   : > { %v502_v10 = vpop.f32.mrf.mxu2  ;;  %v521_v11 = vpop.f32.mrf.mxu3 }
 0x188   : > { %v531_v17 = vmul.f32 0.2, %v502_v10  ;;  %v532_v20 = vmul.f32 0.2, %v521_v11 }
 0x18a   : > { %v539_v29 = vmax.f32 %v502_v10, %v531_v17  ;;  %v540_v31 = vmax.f32 %v521_v11, %v532_v20 }
 0x18c   : > { %v545_v34 = vpack.c.bf16 %v539_v29, %v537_v32  ;;  %v546_v35 = vpack.c.bf16 %v540_v31, %v538_v33  ;;  %v3830_v31 = vld [vmem:[%s4421_s5] sm:$0xff] }
 0x18f   : > { %v505_v12 = vpop.f32.mrf.mxu2  ;;  %v524_v13 = vpop.f32.mrf.mxu3 }
 0x190   : > { %v533_v14 = vmul.f32 0.2, %v505_v12  ;;  %v534_v15 = vmul.f32 0.2, %v524_v13 }
 0x192   : > { %v541_v23 = vmax.f32 %v505_v12, %v533_v14  ;;  %v542_v26 = vmax.f32 %v524_v13, %v534_v15 }
 0x197   : > { %v507_v16 = vpop.f32.mrf.mxu2  ;;  %v526_v19 = vpop.f32.mrf.mxu3 }
 0x198   : > { %v535_v18 = vmul.f32 0.2, %v507_v16  ;;  %v536_v21 = vmul.f32 0.2, %v526_v19 }
 0x19a   : > { %v543_v24 = vmax.f32 %v507_v16, %v535_v18  ;;  %v544_v27 = vmax.f32 %v526_v19, %v536_v21 }
 0x19c   : > { %v547_v28 = vpack.c.bf16 %v543_v24, %v541_v23  ;;  %v548_v30 = vpack.c.bf16 %v544_v27, %v542_v26 }
 0x19e   : > { %564 = vmatpush.bf16.msrb.mxu2 %v547_v28  ;;  %578 = vmatpush.bf16.msrb.mxu3 %v548_v30 }
 0x1a2   : > { %565 = vmatpush.bf16.msrb.mxu2 %v545_v34  ;;  %579 = vmatpush.bf16.msrb.mxu3 %v546_v35 }
 0x1a5   : > { %3173 = vmatmul.msk.bf16.vlgmr.msrb.gmra.mxu2 %vm554_vm2, %v3779_v36  ;;  %3174 = vmatmul.msk.bf16.vlgmr.msrb.gmra.mxu3 %vm554_vm2, %v3779_v36 }
 0x228   : > { %v567_v37 = vpop.f32.mrf.mxu2  ;;  %v581_v38 = vpop.f32.mrf.mxu3 }
 0x229   : > { %v586_v39 = vmul.f32 0.2, %v567_v37  ;;  %v587_v40 = vmul.f32 0.2, %v581_v38 }
 0x22b   : > { %v590_v49 = vmax.f32 %v567_v37, %v586_v39  ;;  %v591_v51 = vmax.f32 %v581_v38, %v587_v40  ;;  %v3839_v37 = vld [vmem:[%s4421_s5 + $0x8] sm:$0xff] }
 0x230   : > { %v569_v41 = vpop.f32.mrf.mxu2  ;;  %v583_v43 = vpop.f32.mrf.mxu3 }
 0x231   : > { %v588_v42 = vmul.f32 0.2, %v569_v41  ;;  %v589_v46 = vmul.f32 0.2, %v583_v43 }
 0x233   : > { %v592_v50 = vmax.f32 %v569_v41, %v588_v42  ;;  %v593_v52 = vmax.f32 %v583_v43, %v589_v46 }
 0x235   : > { %v594_v54 = vpack.c.bf16 %v592_v50, %v590_v49  ;;  %v595_v56 = vpack.c.bf16 %v593_v52, %v591_v51 }
 0x237   : > { %619 = vmatpush.bf16.msra.mxu2 %v594_v54  ;;  %638 = vmatpush.bf16.msra.mxu3 %v595_v56 }
 0x23a   : > { %3183 = vmatmul.msk.bf16.vlgmr.msra.gmra.mxu2 %vm363_vm0, %v3792_v57  ;;  %3185 = vmatmul.msk.bf16.vlgmr.msra.gmra.mxu3 %vm363_vm0, %v3792_v57 }
 0x23b   : > { %761 = vmatpush.bf16.msrb.mxu2 %v752_v53  ;;  %790 = vmatpush.bf16.msrb.mxu3 %v753_v55 }
 0x24a   : > { %3184 = vmatmul.msk.bf16.gmra.mxu2 %vm363_vm0, %v3801_v58  ;;  %3186 = vmatmul.msk.bf16.gmra.mxu3 %vm363_vm0, %v3801_v58 }
 0x25a   : > { %3199 = vmatmul.msk.bf16.vlgmr.msrb.gmra.mxu2 %vm363_vm0, %v3725_v6  ;;  %3203 = vmatmul.msk.bf16.vlgmr.msrb.gmra.mxu3 %vm363_vm0, %v3725_v6 }
 0x26a   : > { %3200 = vmatmul.msk.bf16.gmra.mxu2 %vm363_vm0, %v3734_v7  ;;  %3204 = vmatmul.msk.bf16.gmra.mxu3 %vm363_vm0, %v3734_v7 }
 0x27a   : > { %3201 = vmatmul.msk.bf16.gmra.mxu2 %vm363_vm0, %v3743_v8  ;;  %3205 = vmatmul.msk.bf16.gmra.mxu3 %vm363_vm0, %v3743_v8 }
 0x28a   : > { %3202 = vmatmul.msk.bf16.gmra.mxu2 %vm363_vm0, %v3752_v9  ;;  %3206 = vmatmul.msk.bf16.gmra.mxu3 %vm363_vm0, %v3752_v9 }
 0x2bd   : > { %v621_v59 = vpop.f32.mrf.mxu2  ;;  %v640_v60 = vpop.f32.mrf.mxu3 }
 0x2be   : > { %v650_v15 = vmul.f32 0.2, %v621_v59  ;;  %v651_v18 = vmul.f32 0.2, %v640_v60 }
 0x2c0   : > { %v658_v25 = vmax.f32 %v621_v59, %v650_v15  ;;  %v659_v26 = vmax.f32 %v640_v60, %v651_v18 }
 0x2c5   : > { %v623_v61 = vpop.f32.mrf.mxu2  ;;  %v642_v62 = vpop.f32.mrf.mxu3 }
 0x2c6   : > { %v652_v10 = vmul.f32 0.2, %v623_v61  ;;  %v653_v13 = vmul.f32 0.2, %v642_v62 }
 0x2c8   : > { %v660_v22 = vmax.f32 %v623_v61, %v652_v10  ;;  %v661_v24 = vmax.f32 %v642_v62, %v653_v13 }
 0x2ca   : > { %v666_v29 = vpack.c.bf16 %v660_v22, %v658_v25  ;;  %v667_v30 = vpack.c.bf16 %v661_v24, %v659_v26 }
 0x2cd   : > { %v626_v63 = vpop.f32.mrf.mxu2  ;;  %v645_v0 = vpop.f32.mrf.mxu3 }
 0x2ce   : > { %v654_v1 = vmul.f32 0.2, %v626_v63  ;;  %v655_v4 = vmul.f32 0.2, %v645_v0 }
 0x2d0   : > { %v662_v16 = vmax.f32 %v626_v63, %v654_v1  ;;  %v663_v19 = vmax.f32 %v645_v0, %v655_v4 }
 0x2d5   : > { %v628_v5 = vpop.f32.mrf.mxu2  ;;  %v647_v12 = vpop.f32.mrf.mxu3 }
 0x2d6   : > { %v656_v11 = vmul.f32 0.2, %v628_v5  ;;  %v657_v14 = vmul.f32 0.2, %v647_v12 }
 0x2d8   : > { %v664_v17 = vmax.f32 %v628_v5, %v656_v11  ;;  %v665_v20 = vmax.f32 %v647_v12, %v657_v14 }
 0x2da   : > { %v668_v21 = vpack.c.bf16 %v664_v17, %v662_v16  ;;  %v669_v23 = vpack.c.bf16 %v665_v20, %v663_v19 }
 0x2dc   : > { %692 = vmatpush.bf16.msrb.mxu0 %v668_v21  ;;  %711 = vmatpush.bf16.msrb.mxu1 %v669_v23 }
 0x2dd   : > { %v3823_v27 = vpop.f32.mrf.mxu2  ;;  %v3825_v28 = vpop.f32.mrf.mxu3 }
 0x2de   : > { %v812_v20 = vmul.f32 0.2, %v3823_v27  ;;  %v813_v22 = vmul.f32 0.2, %v3825_v28 }
 0x2e0   : > { %693 = vmatpush.bf16.msrb.mxu0 %v666_v29  ;;  %712 = vmatpush.bf16.msrb.mxu1 %v667_v30  ;;  %v828_v30 = vmax.f32 %v3823_v27, %v812_v20 }
 0x2e3   : > { %3195 = vmatmul.msk.bf16.vlgmr.msrb.gmra.mxu0 %vm554_vm2, %v3830_v31  ;;  %3197 = vmatmul.msk.bf16.vlgmr.msrb.gmra.mxu1 %vm554_vm2, %v3830_v31 }
 0x2e5   : > { %v765_v32 = vpop.f32.mrf.mxu2  ;;  %v794_v33 = vpop.f32.mrf.mxu3 }
 0x2e6   : > { %v814_v14 = vmul.f32 0.2, %v765_v32  ;;  %v815_v17 = vmul.f32 0.2, %v794_v33 }
 0x2e8   : > { %v830_v24 = vmax.f32 %v765_v32, %v814_v14  ;;  %v831_v26 = vmax.f32 %v794_v33, %v815_v17 }
 0x2ed   : > { %v768_v34 = vpop.f32.mrf.mxu2  ;;  %v797_v35 = vpop.f32.mrf.mxu3 }
 0x2ee   : > { %v816_v10 = vmul.f32 0.2, %v768_v34  ;;  %v817_v12 = vmul.f32 0.2, %v797_v35 }
 0x2f0   : > { %v832_v21 = vmax.f32 %v768_v34, %v816_v10  ;;  %v833_v23 = vmax.f32 %v797_v35, %v817_v12 }
 0x2f3   : > { %3196 = vmatmul.msk.bf16.gmra.mxu0 %vm554_vm2, %v3839_v37  ;;  %3198 = vmatmul.msk.bf16.gmra.mxu1 %vm554_vm2, %v3839_v37 }
 0x2f5   : > { %v770_v38 = vpop.f32.mrf.mxu2  ;;  %v799_v39 = vpop.f32.mrf.mxu3 }
 0x2f6   : > { %v818_v62 = vmul.f32 0.2, %v770_v38  ;;  %v819_v1 = vmul.f32 0.2, %v799_v39 }
 0x2f8   : > { %v834_v15 = vmax.f32 %v770_v38, %v818_v62  ;;  %v835_v18 = vmax.f32 %v799_v39, %v819_v1  ;;  %v829_v38 = vmax.f32 %v3825_v28, %v813_v22  ;;  %v844_v39 = vpack.c.bf16 %v830_v24, %v828_v30 }
 0x2fa   : > { %v846_v25 = vpack.c.bf16 %v834_v15, %v832_v21  ;;  %v847_v29 = vpack.c.bf16 %v835_v18, %v833_v23 }
 0x2fd   : > { %v773_v40 = vpop.f32.mrf.mxu2  ;;  %v802_v41 = vpop.f32.mrf.mxu3 }
 0x2fe   : > { %v820_v54 = vmul.f32 0.2, %v773_v40  ;;  %v821_v59 = vmul.f32 0.2, %v802_v41 }
 0x300   : > { %v836_v11 = vmax.f32 %v773_v40, %v820_v54  ;;  %v837_v13 = vmax.f32 %v802_v41, %v821_v59  ;;  %v845_v40 = vpack.c.bf16 %v831_v26, %v829_v38 }
 0x305   : > { %v775_v42 = vpop.f32.mrf.mxu2  ;;  %v804_v43 = vpop.f32.mrf.mxu3 }
 0x306   : > { %v822_v49 = vmul.f32 0.2, %v775_v42  ;;  %v823_v52 = vmul.f32 0.2, %v804_v43 }
 0x308   : > { %v838_v63 = vmax.f32 %v775_v42, %v822_v49  ;;  %v839_v4 = vmax.f32 %v804_v43, %v823_v52 }
 0x30a   : > { %v848_v16 = vpack.c.bf16 %v838_v63, %v836_v11  ;;  %v849_v19 = vpack.c.bf16 %v839_v4, %v837_v13 }
 0x30d   : > { %v778_v44 = vpop.f32.mrf.mxu2  ;;  %v807_v45 = vpop.f32.mrf.mxu3 }
 0x30e   : > { %v824_v46 = vmul.f32 0.2, %v778_v44  ;;  %v825_v47 = vmul.f32 0.2, %v807_v45 }
 0x310   : > { %v840_v55 = vmax.f32 %v778_v44, %v824_v46  ;;  %v841_v60 = vmax.f32 %v807_v45, %v825_v47 }
 0x315   : > { %v780_v48 = vpop.f32.mrf.mxu2  ;;  %v809_v51 = vpop.f32.mrf.mxu3 }
 0x316   : > { %v826_v50 = vmul.f32 0.2, %v780_v48  ;;  %v827_v53 = vmul.f32 0.2, %v809_v51 }
 0x318   : > { %v842_v56 = vmax.f32 %v780_v48, %v826_v50  ;;  %v843_v61 = vmax.f32 %v809_v51, %v827_v53 }
 0x31a   : > { %v850_v0 = vpack.c.bf16 %v842_v56, %v840_v55  ;;  %v851_v5 = vpack.c.bf16 %v843_v61, %v841_v60 }
 0x31c   : > { %856 = vmatpush.bf16.msra.mxu0 %v850_v0  ;;  %875 = vmatpush.bf16.msra.mxu1 %v851_v5 }
 0x320   : > { %857 = vmatpush.bf16.msra.mxu0 %v848_v16  ;;  %876 = vmatpush.bf16.msra.mxu1 %v849_v19 }
 0x324   : > { %858 = vmatpush.bf16.msra.mxu0 %v846_v25  ;;  %877 = vmatpush.bf16.msra.mxu1 %v847_v29 }
 0x328   : > { %859 = vmatpush.bf16.msra.mxu0 %v844_v39  ;;  %878 = vmatpush.bf16.msra.mxu1 %v845_v40  ;;  %v1068_v39 = vld [vmem:[%s3712_s17 + $0x20] sm:$0xff] }
 0x329   : > { %v1070_v40 = vld [vmem:[%s3712_s17 + $0x60] sm:$0xff] }
 0x32b   : > { %3207 = vmatmul.msk.bf16.vlgmr.msra.gmra.mxu0 %vm484_vm1, %v3761_v2  ;;  %3209 = vmatmul.msk.bf16.vlgmr.msra.gmra.mxu1 %vm484_vm1, %v3761_v2 }
 0x33b   : > { %3208 = vmatmul.msk.bf16.gmra.mxu0 %vm484_vm1, %v3770_v3  ;;  %3210 = vmatmul.msk.bf16.gmra.mxu1 %vm484_vm1, %v3770_v3 }
 0x360   : > { %v695_v27 = vpop.f32.mrf.mxu0  ;;  %v714_v32 = vpop.f32.mrf.mxu1 }
 0x361   : > { %v724_v28 = vpack.c.bf16 %v714_v32, %v695_v27  ;;  %v732_v33 = vadd.f32 %v714_v32, %v695_v27  ;;  %v1069_v32 = vld [vmem:[%s3712_s17 + $0x28] sm:$0xff] }
 0x363   : > { %728 = vst [vmem:[%s3859_s22] sm:$0xff] %v724_v28  ;;  %733 = vadd.xlane.f32.xlu0 %v732_v33  ;;  %v1071_v28 = vld [vmem:[%s3712_s17 + $0x68] sm:$0xff] }
 0x368   : > { %v697_v34 = vpop.f32.mrf.mxu0  ;;  %v716_v35 = vpop.f32.mrf.mxu1 }
 0x369   : > { %v725_v41 = vpack.c.bf16 %v716_v35, %v697_v34  ;;  %v735_v42 = vadd.f32 %v716_v35, %v697_v34 }
 0x36b   : > { %729 = vst [vmem:[%s3859_s22 + $0x20] sm:$0xff] %v725_v41  ;;  %736 = vadd.xlane.f32.xlu0 %v735_v42  ;;  %v1072_v42 = vpack.c.bf16 %v1070_v40, %v1068_v39 }
 0x370   : > { %v700_v43 = vpop.f32.mrf.mxu0  ;;  %v719_v44 = vpop.f32.mrf.mxu1 }
 0x371   : > { %v726_v45 = vpack.c.bf16 %v719_v44, %v700_v43  ;;  %v738_v46 = vadd.f32 %v719_v44, %v700_v43  ;;  %v1073_v44 = vpack.c.bf16 %v1071_v28, %v1069_v32 }
 0x373   : > { %730 = vst [vmem:[%s3859_s22 + $0x40] sm:$0xff] %v726_v45  ;;  %739 = vadd.xlane.f32.xlu1 %v738_v46 }
 0x378   : > { %v702_v47 = vpop.f32.mrf.mxu0  ;;  %v721_v48 = vpop.f32.mrf.mxu1 }
 0x379   : > { %v727_v49 = vpack.c.bf16 %v721_v48, %v702_v47  ;;  %v741_v50 = vadd.f32 %v721_v48, %v702_v47 }
 0x37b   : > { %731 = vst [vmem:[%s3859_s22 + $0x60] sm:$0xff] %v727_v49  ;;  %742 = vadd.xlane.f32.xlu1 %v741_v50 }
 0x3a8   : > { %v861_v51 = vpop.f32.mrf.mxu0  ;;  %v880_v52 = vpop.f32.mrf.mxu1 }
 0x3a9   : > { %v890_v5 = vmul.f32 0.2, %v861_v51  ;;  %v891_v12 = vmul.f32 0.2, %v880_v52 }
 0x3ab   : > { %v898_v19 = vmax.f32 %v861_v51, %v890_v5  ;;  %v899_v20 = vmax.f32 %v880_v52, %v891_v12 }
 0x3b0   : > { %v863_v53 = vpop.f32.mrf.mxu0  ;;  %v882_v54 = vpop.f32.mrf.mxu1 }
 0x3b1   : > { %v892_v62 = vmul.f32 0.2, %v863_v53  ;;  %v893_v1 = vmul.f32 0.2, %v882_v54 }
 0x3b3   : > { %v900_v15 = vmax.f32 %v863_v53, %v892_v62  ;;  %v901_v17 = vmax.f32 %v882_v54, %v893_v1 }
 0x3b5   : > { %v906_v21 = vpack.c.bf16 %v900_v15, %v898_v19  ;;  %v907_v22 = vpack.c.bf16 %v901_v17, %v899_v20 }
 0x3b8   : > { %v866_v55 = vpop.f32.mrf.mxu0  ;;  %v885_v56 = vpop.f32.mrf.mxu1 }
 0x3b9   : > { %v894_v59 = vmul.f32 0.2, %v866_v55  ;;  %v895_v60 = vmul.f32 0.2, %v885_v56 }
 0x3bb   : > { %v902_v10 = vmax.f32 %v866_v55, %v894_v59  ;;  %v903_v13 = vmax.f32 %v885_v56, %v895_v60 }
 0x3c0   : > { %v868_v61 = vpop.f32.mrf.mxu0  ;;  %v887_v0 = vpop.f32.mrf.mxu1 }
 0x3c1   : > { %v896_v63 = vmul.f32 0.2, %v868_v61  ;;  %v897_v4 = vmul.f32 0.2, %v887_v0 }
 0x3c3   : > { %v904_v11 = vmax.f32 %v868_v61, %v896_v63  ;;  %v905_v14 = vmax.f32 %v887_v0, %v897_v4 }
 0x3c5   : > { %v908_v16 = vpack.c.bf16 %v904_v11, %v902_v10  ;;  %v909_v18 = vpack.c.bf16 %v905_v14, %v903_v13 }
 0x3c7   : > { %916 = vmatpush.bf16.msrb.mxu0 %v908_v16  ;;  %930 = vmatpush.bf16.msrb.mxu1 %v909_v18 }
 0x3cb   : > { %917 = vmatpush.bf16.msrb.mxu0 %v906_v21  ;;  %931 = vmatpush.bf16.msrb.mxu1 %v907_v22 }
 0x3ce   : > { %3211 = vmatmul.msk.bf16.vlgmr.msrb.gmra.mxu0 %vm554_vm2, %v3779_v36  ;;  %3212 = vmatmul.msk.bf16.vlgmr.msrb.gmra.mxu1 %vm554_vm2, %v3779_v36 }
 0x44b   : > { %v919_v23 = vpop.f32.mrf.mxu0  ;;  %v933_v24 = vpop.f32.mrf.mxu1 }
 0x44c   : > { %v938_v25 = vmul.f32 0.2, %v919_v23  ;;  %v939_v26 = vmul.f32 0.2, %v933_v24 }
 0x44e   : > { %v942_v33 = vmax.f32 %v919_v23, %v938_v25  ;;  %v943_v35 = vmax.f32 %v933_v24, %v939_v26 }
 0x453   : > { %v921_v29 = vpop.f32.mrf.mxu0  ;;  %v935_v38 = vpop.f32.mrf.mxu1 }
 0x454   : > { %v940_v30 = vmul.f32 0.2, %v921_v29  ;;  %v941_v27 = vmul.f32 0.2, %v935_v38 }
 0x456   : > { %v944_v34 = vmax.f32 %v921_v29, %v940_v30  ;;  %v945_v41 = vmax.f32 %v935_v38, %v941_v27 }
 0x458   : > { %v946_v43 = vpack.c.bf16 %v944_v34, %v942_v33  ;;  %v947_v45 = vpack.c.bf16 %v945_v41, %v943_v35 }
 0x45a   : > { %955 = vmatpush.bf16.msra.mxu0 %v946_v43  ;;  %974 = vmatpush.bf16.msra.mxu1 %v947_v45 }
 0x45d   : > { %3213 = vmatmul.msk.bf16.vlgmr.msra.gmra.mxu0 %vm363_vm0, %v3792_v57  ;;  %3215 = vmatmul.msk.bf16.vlgmr.msra.gmra.mxu1 %vm363_vm0, %v3792_v57 }
 0x45e   : > { %1081 = vmatpush.bf16.msrb.mxu0 %v1072_v42  ;;  %1110 = vmatpush.bf16.msrb.mxu1 %v1073_v44 }
 0x46d   : > { %3214 = vmatmul.msk.bf16.gmra.mxu0 %vm363_vm0, %v3801_v58  ;;  %3216 = vmatmul.msk.bf16.gmra.mxu1 %vm363_vm0, %v3801_v58 }
 0x47d   : > { %3221 = vmatmul.msk.bf16.vlgmr.msrb.gmra.mxu0 %vm363_vm0, %v3725_v6  ;;  %3225 = vmatmul.msk.bf16.vlgmr.msrb.gmra.mxu1 %vm363_vm0, %v3725_v6 }
 0x48d   : > { %3222 = vmatmul.msk.bf16.gmra.mxu0 %vm363_vm0, %v3734_v7  ;;  %3226 = vmatmul.msk.bf16.gmra.mxu1 %vm363_vm0, %v3734_v7 }
 0x49d   : > { %3223 = vmatmul.msk.bf16.gmra.mxu0 %vm363_vm0, %v3743_v8  ;;  %3227 = vmatmul.msk.bf16.gmra.mxu1 %vm363_vm0, %v3743_v8 }
 0x4ad   : > { %3224 = vmatmul.msk.bf16.gmra.mxu0 %vm363_vm0, %v3752_v9  ;;  %3228 = vmatmul.msk.bf16.gmra.mxu1 %vm363_vm0, %v3752_v9 }
 0x4da   : > { %v957_v46 = vpop.f32.mrf.mxu0  ;;  %v976_v6 = vpop.f32.mrf.mxu1 }
 0x4db   : > { %v986_v59 = vmul.f32 0.2, %v957_v46  ;;  %v987_v62 = vmul.f32 0.2, %v976_v6 }
 0x4dd   : > { %v994_v10 = vmax.f32 %v957_v46, %v986_v59  ;;  %v995_v11 = vmax.f32 %v976_v6, %v987_v62 }
 0x4e2   : > { %v959_v47 = vpop.f32.mrf.mxu0  ;;  %v978_v48 = vpop.f32.mrf.mxu1 }
 0x4e3   : > { %v988_v53 = vmul.f32 0.2, %v959_v47  ;;  %v989_v56 = vmul.f32 0.2, %v978_v48 }
 0x4e5   : > { %v996_v0 = vmax.f32 %v959_v47, %v988_v53  ;;  %v997_v4 = vmax.f32 %v978_v48, %v989_v56 }
 0x4e7   : > { %v1002_v14 = vpack.c.bf16 %v996_v0, %v994_v10  ;;  %v1003_v15 = vpack.c.bf16 %v997_v4, %v995_v11 }
 0x4ea   : > { %v962_v49 = vpop.f32.mrf.mxu0  ;;  %v981_v50 = vpop.f32.mrf.mxu1 }
 0x4eb   : > { %v990_v51 = vmul.f32 0.2, %v962_v49  ;;  %v991_v7 = vmul.f32 0.2, %v981_v50 }
 0x4ed   : > { %v998_v60 = vmax.f32 %v962_v49, %v990_v51  ;;  %v999_v63 = vmax.f32 %v981_v50, %v991_v7 }
 0x4f2   : > { %v964_v52 = vpop.f32.mrf.mxu0  ;;  %v983_v55 = vpop.f32.mrf.mxu1 }
 0x4f3   : > { %v992_v54 = vmul.f32 0.2, %v964_v52  ;;  %v993_v8 = vmul.f32 0.2, %v983_v55 }
 0x4f5   : > { %v1000_v61 = vmax.f32 %v964_v52, %v992_v54  ;;  %v1001_v9 = vmax.f32 %v983_v55, %v993_v8 }
 0x4f7   : > { %v1004_v1 = vpack.c.bf16 %v1000_v61, %v998_v60  ;;  %v1005_v5 = vpack.c.bf16 %v1001_v9, %v999_v63 }
 0x4f9   : > { %1012 = vmatpush.bf16.msra.mxu2 %v1004_v1  ;;  %1031 = vmatpush.bf16.msra.mxu3 %v1005_v5 }
 0x4fa   : > { %v3897_v12 = vpop.f32.mrf.mxu0  ;;  %v3899_v13 = vpop.f32.mrf.mxu1 }
 0x4fb   : > { %v1132_v60 = vmul.f32 0.2, %v3897_v12  ;;  %v1133_v62 = vmul.f32 0.2, %v3899_v13 }
 0x4fd   : > { %1013 = vmatpush.bf16.msra.mxu2 %v1002_v14  ;;  %1032 = vmatpush.bf16.msra.mxu3 %v1003_v15  ;;  %v1148_v5 = vmax.f32 %v3897_v12, %v1132_v60  ;;  %v1149_v10 = vmax.f32 %v3899_v13, %v1133_v62 }
 0x500   : > { %3217 = vmatmul.msk.bf16.vlgmr.msra.gmra.mxu2 %vm554_vm2, %v3830_v31  ;;  %3219 = vmatmul.msk.bf16.vlgmr.msra.gmra.mxu3 %vm554_vm2, %v3830_v31 }
 0x502   : > { %v1085_v16 = vpop.f32.mrf.mxu0  ;;  %v1114_v17 = vpop.f32.mrf.mxu1 }
 0x503   : > { %v1134_v53 = vmul.f32 0.2, %v1085_v16  ;;  %v1135_v56 = vmul.f32 0.2, %v1114_v17 }
 0x505   : > { %v1150_v9 = vmax.f32 %v1085_v16, %v1134_v53  ;;  %v1151_v1 = vmax.f32 %v1114_v17, %v1135_v56 }
 0x507   : > { %v1164_v11 = vpack.c.bf16 %v1150_v9, %v1148_v5  ;;  %v1165_v14 = vpack.c.bf16 %v1151_v1, %v1149_v10  ;;  %v1388_v9 = vld [vmem:[%s3712_s17 + $0x30] sm:$0xff]  ;;  %v1391_v5 = vld [vmem:[%s3712_s17 + $0x78] sm:$0xff] }
 0x50a   : > { %v1088_v18 = vpop.f32.mrf.mxu0  ;;  %v1117_v19 = vpop.f32.mrf.mxu1 }
 0x50b   : > { %v1136_v50 = vmul.f32 0.2, %v1088_v18  ;;  %v1137_v7 = vmul.f32 0.2, %v1117_v19 }
 0x50d   : > { %v1152_v61 = vmax.f32 %v1088_v18, %v1136_v50  ;;  %v1153_v63 = vmax.f32 %v1117_v19, %v1137_v7 }
 0x510   : > { %3218 = vmatmul.msk.bf16.gmra.mxu2 %vm554_vm2, %v3839_v37  ;;  %3220 = vmatmul.msk.bf16.gmra.mxu3 %vm554_vm2, %v3839_v37 }
 0x512   : > { %v1090_v20 = vpop.f32.mrf.mxu0  ;;  %v1119_v21 = vpop.f32.mrf.mxu1 }
 0x513   : > { %v1138_v45 = vmul.f32 0.2, %v1090_v20  ;;  %v1139_v47 = vmul.f32 0.2, %v1119_v21 }
 0x515   : > { %v1154_v54 = vmax.f32 %v1090_v20, %v1138_v45  ;;  %v1155_v8 = vmax.f32 %v1119_v21, %v1139_v47 }
 0x517   : > { %v1166_v0 = vpack.c.bf16 %v1154_v54, %v1152_v61  ;;  %v1167_v4 = vpack.c.bf16 %v1155_v8, %v1153_v63 }
 0x51a   : > { %v1093_v22 = vpop.f32.mrf.mxu0  ;;  %v1122_v23 = vpop.f32.mrf.mxu1 }
 0x51b   : > { %v1140_v34 = vmul.f32 0.2, %v1093_v22  ;;  %v1141_v42 = vmul.f32 0.2, %v1122_v23 }
 0x51d   : > { %v1156_v51 = vmax.f32 %v1093_v22, %v1140_v34  ;;  %v1157_v52 = vmax.f32 %v1122_v23, %v1141_v42 }
 0x522   : > { %v1095_v24 = vpop.f32.mrf.mxu0  ;;  %v1124_v25 = vpop.f32.mrf.mxu1 }
 0x523   : > { %v1142_v40 = vmul.f32 0.2, %v1095_v24  ;;  %v1143_v28 = vmul.f32 0.2, %v1124_v25 }
 0x525   : > { %v1158_v46 = vmax.f32 %v1095_v24, %v1142_v40  ;;  %v1159_v48 = vmax.f32 %v1124_v25, %v1143_v28 }
 0x527   : > { %v1168_v55 = vpack.c.bf16 %v1158_v46, %v1156_v51  ;;  %v1169_v59 = vpack.c.bf16 %v1159_v48, %v1157_v52 }
 0x52a   : > { %v1098_v26 = vpop.f32.mrf.mxu0  ;;  %v1127_v29 = vpop.f32.mrf.mxu1 }
 0x52b   : > { %v1144_v30 = vmul.f32 0.2, %v1098_v26  ;;  %v1145_v38 = vmul.f32 0.2, %v1127_v29 }
 0x52d   : > { %v1160_v35 = vmax.f32 %v1098_v26, %v1144_v30  ;;  %v1161_v43 = vmax.f32 %v1127_v29, %v1145_v38 }
 0x532   : > { %v1100_v39 = vpop.f32.mrf.mxu0  ;;  %v1129_v32 = vpop.f32.mrf.mxu1 }
 0x533   : > { %v1146_v27 = vmul.f32 0.2, %v1100_v39  ;;  %v1147_v33 = vmul.f32 0.2, %v1129_v32 }
 0x535   : > { %v1162_v41 = vmax.f32 %v1100_v39, %v1146_v27  ;;  %v1163_v44 = vmax.f32 %v1129_v32, %v1147_v33 }
 0x537   : > { %v1170_v6 = vpack.c.bf16 %v1162_v41, %v1160_v35  ;;  %v1171_v49 = vpack.c.bf16 %v1163_v44, %v1161_v43 }
 0x539   : > { %1176 = vmatpush.bf16.msrb.mxu2 %v1170_v6  ;;  %1195 = vmatpush.bf16.msrb.mxu3 %v1171_v49 }
 0x53d   : > { %1177 = vmatpush.bf16.msrb.mxu2 %v1168_v55  ;;  %1196 = vmatpush.bf16.msrb.mxu3 %v1169_v59 }
 0x541   : > { %1178 = vmatpush.bf16.msrb.mxu2 %v1166_v0  ;;  %1197 = vmatpush.bf16.msrb.mxu3 %v1167_v4  ;;  %v1390_v0 = vld [vmem:[%s3712_s17 + $0x70] sm:$0xff]  ;;  %v1389_v4 = vld [vmem:[%s3712_s17 + $0x38] sm:$0xff] }
 0x545   : > { %1179 = vmatpush.bf16.msrb.mxu2 %v1164_v11  ;;  %1198 = vmatpush.bf16.msrb.mxu3 %v1165_v14 }
 0x548   : > { %3229 = vmatmul.msk.bf16.vlgmr.msrb.gmra.mxu2 %vm484_vm1, %v3761_v2  ;;  %3231 = vmatmul.msk.bf16.vlgmr.msrb.gmra.mxu3 %vm484_vm1, %v3761_v2 }
 0x558   : > { %3230 = vmatmul.msk.bf16.gmra.mxu2 %vm484_vm1, %v3770_v3  ;;  %3232 = vmatmul.msk.bf16.gmra.mxu3 %vm484_vm1, %v3770_v3 }
 0x583   : > { %v1015_v12 = vpop.f32.mrf.mxu2  ;;  %v1034_v13 = vpop.f32.mrf.mxu3 }
 0x584   : > { %v1044_v15 = vpack.c.bf16 %v1034_v13, %v1015_v12  ;;  %v1052_v16 = vadd.f32 %v1034_v13, %v1015_v12  ;;  %v1392_v13 = vpack.c.bf16 %v1390_v0, %v1388_v9 }
 0x586   : > { %1048 = vst [vmem:[%s3859_s22 + $0x8] sm:$0xff] %v1044_v15  ;;  %1053 = vadd.xlane.f32.xlu2 %v1052_v16  ;;  %v1393_v16 = vpack.c.bf16 %v1391_v5, %v1389_v4 }
 0x58b   : > { %v1017_v17 = vpop.f32.mrf.mxu2  ;;  %v1036_v18 = vpop.f32.mrf.mxu3 }
 0x58c   : > { %v1045_v19 = vpack.c.bf16 %v1036_v18, %v1017_v17  ;;  %v1055_v20 = vadd.f32 %v1036_v18, %v1017_v17  ;;  %v3944_v17 = vld [vmem:[%s4417_s1] sm:$0xff]  ;;  %v3971_v18 = vld [vmem:[%s4417_s1 + $0x18] sm:$0xff] }
 0x58e   : > { %1049 = vst [vmem:[%s3859_s22 + $0x28] sm:$0xff] %v1045_v19  ;;  %1056 = vadd.xlane.f32.xlu2 %v1055_v20 }
 0x593   : > { %v1020_v2 = vpop.f32.mrf.mxu2  ;;  %v1039_v21 = vpop.f32.mrf.mxu3 }
 0x594   : > { %v1046_v22 = vpack.c.bf16 %v1039_v21, %v1020_v2  ;;  %v1058_v23 = vadd.f32 %v1039_v21, %v1020_v2 }
 0x596   : > { %1050 = vst [vmem:[%s3859_s22 + $0x48] sm:$0xff] %v1046_v22  ;;  %1059 = vadd.xlane.f32.xlu0 %v1058_v23 }
 0x59b   : > { %v1022_v3 = vpop.f32.mrf.mxu2  ;;  %v1041_v24 = vpop.f32.mrf.mxu3 }
 0x59c   : > { %v1047_v25 = vpack.c.bf16 %v1041_v24, %v1022_v3  ;;  %v1061_v26 = vadd.f32 %v1041_v24, %v1022_v3 }
 0x59e   : > { %1051 = vst [vmem:[%s3859_s22 + $0x68] sm:$0xff] %v1047_v25  ;;  %1062 = vadd.xlane.f32.xlu1 %v1061_v26 }
 0x5cb   : > { %v1181_v29 = vpop.f32.mrf.mxu2  ;;  %v1200_v30 = vpop.f32.mrf.mxu3 }
 0x5cc   : > { %v1210_v44 = vmul.f32 0.2, %v1181_v29  ;;  %v1211_v6 = vmul.f32 0.2, %v1200_v30 }
 0x5ce   : > { %v1218_v52 = vmax.f32 %v1181_v29, %v1210_v44  ;;  %v1219_v53 = vmax.f32 %v1200_v30, %v1211_v6 }
 0x5d3   : > { %v1183_v38 = vpop.f32.mrf.mxu2  ;;  %v1202_v39 = vpop.f32.mrf.mxu3 }
 0x5d4   : > { %v1212_v34 = vmul.f32 0.2, %v1183_v38  ;;  %v1213_v42 = vmul.f32 0.2, %v1202_v39 }
 0x5d6   : > { %v1220_v49 = vmax.f32 %v1183_v38, %v1212_v34  ;;  %v1221_v51 = vmax.f32 %v1202_v39, %v1213_v42 }
 0x5d8   : > { %v1226_v54 = vpack.c.bf16 %v1220_v49, %v1218_v52  ;;  %v1227_v55 = vpack.c.bf16 %v1221_v51, %v1219_v53 }
 0x5db   : > { %v1186_v40 = vpop.f32.mrf.mxu2  ;;  %v1205_v27 = vpop.f32.mrf.mxu3 }
 0x5dc   : > { %v1214_v32 = vmul.f32 0.2, %v1186_v40  ;;  %v1215_v28 = vmul.f32 0.2, %v1205_v27 }
 0x5de   : > { %v1222_v45 = vmax.f32 %v1186_v40, %v1214_v32  ;;  %v1223_v47 = vmax.f32 %v1205_v27, %v1215_v28 }
 0x5e3   : > { %v1188_v33 = vpop.f32.mrf.mxu2  ;;  %v1207_v41 = vpop.f32.mrf.mxu3 }
 0x5e4   : > { %v1216_v35 = vmul.f32 0.2, %v1188_v33  ;;  %v1217_v43 = vmul.f32 0.2, %v1207_v41 }
 0x5e6   : > { %v1224_v46 = vmax.f32 %v1188_v33, %v1216_v35  ;;  %v1225_v48 = vmax.f32 %v1207_v41, %v1217_v43 }
 0x5e8   : > { %v1228_v50 = vpack.c.bf16 %v1224_v46, %v1222_v45  ;;  %v1229_v7 = vpack.c.bf16 %v1225_v48, %v1223_v47 }
 0x5ea   : > { %1236 = vmatpush.bf16.msra.mxu2 %v1228_v50  ;;  %1250 = vmatpush.bf16.msra.mxu3 %v1229_v7 }
 0x5ee   : > { %1237 = vmatpush.bf16.msra.mxu2 %v1226_v54  ;;  %1251 = vmatpush.bf16.msra.mxu3 %v1227_v55 }
 0x5f1   : > { %3233 = vmatmul.msk.bf16.vlgmr.msra.gmra.mxu2 %vm554_vm2, %v3779_v36  ;;  %3234 = vmatmul.msk.bf16.vlgmr.msra.gmra.mxu3 %vm554_vm2, %v3779_v36 }
 0x674   : > { %v1239_v56 = vpop.f32.mrf.mxu2  ;;  %v1253_v8 = vpop.f32.mrf.mxu3 }
 0x675   : > { %v1258_v59 = vmul.f32 0.2, %v1239_v56  ;;  %v1259_v60 = vmul.f32 0.2, %v1253_v8 }
 0x677   : > { %v1262_v10 = vmax.f32 %v1239_v56, %v1258_v59  ;;  %v1263_v14 = vmax.f32 %v1253_v8, %v1259_v60 }
 0x67c   : > { %v1241_v61 = vpop.f32.mrf.mxu2  ;;  %v1255_v63 = vpop.f32.mrf.mxu3 }
 0x67d   : > { %v1260_v62 = vmul.f32 0.2, %v1241_v61  ;;  %v1261_v1 = vmul.f32 0.2, %v1255_v63 }
 0x67f   : > { %v1264_v11 = vmax.f32 %v1241_v61, %v1260_v62  ;;  %v1265_v12 = vmax.f32 %v1255_v63, %v1261_v1 }
 0x681   : > { %v1266_v15 = vpack.c.bf16 %v1264_v11, %v1262_v10  ;;  %v1267_v36 = vpack.c.bf16 %v1265_v12, %v1263_v14 }
 0x683   : > { %1275 = vmatpush.bf16.msrb.mxu2 %v1266_v15  ;;  %1294 = vmatpush.bf16.msrb.mxu3 %v1267_v36 }
 0x686   : > { %3235 = vmatmul.msk.bf16.vlgmr.msrb.gmra.mxu2 %vm363_vm0, %v3792_v57  ;;  %3237 = vmatmul.msk.bf16.vlgmr.msrb.gmra.mxu3 %vm363_vm0, %v3792_v57  ;;  %v3953_v57 = vld [vmem:[%s4417_s1 + $0x8] sm:$0xff] }
 0x687   : > { %1401 = vmatpush.bf16.msra.mxu2 %v1392_v13  ;;  %1430 = vmatpush.bf16.msra.mxu3 %v1393_v16 }
 0x696   : > { %3236 = vmatmul.msk.bf16.gmra.mxu2 %vm363_vm0, %v3801_v58  ;;  %3238 = vmatmul.msk.bf16.gmra.mxu3 %vm363_vm0, %v3801_v58  ;;  %v3962_v58 = vld [vmem:[%s4417_s1 + $0x10] sm:$0xff] }
 0x6a6   : > { %3243 = vmatmul.msk.bf16.vlgmr.msra.gmra.mxu2 %vm363_vm0, %v3944_v17  ;;  %3247 = vmatmul.msk.bf16.vlgmr.msra.gmra.mxu3 %vm363_vm0, %v3944_v17 }
 0x6b6   : > { %3244 = vmatmul.msk.bf16.gmra.mxu2 %vm363_vm0, %v3953_v57  ;;  %3248 = vmatmul.msk.bf16.gmra.mxu3 %vm363_vm0, %v3953_v57 }
 0x6c6   : > { %3245 = vmatmul.msk.bf16.gmra.mxu2 %vm363_vm0, %v3962_v58  ;;  %3249 = vmatmul.msk.bf16.gmra.mxu3 %vm363_vm0, %v3962_v58 }
 0x6d6   : > { %3246 = vmatmul.msk.bf16.gmra.mxu2 %vm363_vm0, %v3971_v18  ;;  %3250 = vmatmul.msk.bf16.gmra.mxu3 %vm363_vm0, %v3971_v18 }
 0x709   : > { %v1277_v19 = vpop.f32.mrf.mxu2  ;;  %v1296_v20 = vpop.f32.mrf.mxu3 }
 0x70a   : > { %v1306_v40 = vmul.f32 0.2, %v1277_v19  ;;  %v1307_v28 = vmul.f32 0.2, %v1296_v20 }
 0x70c   : > { %v1314_v44 = vmax.f32 %v1277_v19, %v1306_v40  ;;  %v1315_v45 = vmax.f32 %v1296_v20, %v1307_v28 }
 0x711   : > { %v1279_v2 = vpop.f32.mrf.mxu2  ;;  %v1298_v21 = vpop.f32.mrf.mxu3 }
 0x712   : > { %v1308_v26 = vmul.f32 0.2, %v1279_v2  ;;  %v1309_v38 = vmul.f32 0.2, %v1298_v21 }
 0x714   : > { %v1316_v35 = vmax.f32 %v1279_v2, %v1308_v26  ;;  %v1317_v42 = vmax.f32 %v1298_v21, %v1309_v38 }
 0x716   : > { %v1322_v47 = vpack.c.bf16 %v1316_v35, %v1314_v44  ;;  %v1323_v48 = vpack.c.bf16 %v1317_v42, %v1315_v45  ;;  %v3996_v44 = vld [vmem:[%s4418_s2] sm:$0xff]  ;;  %v4005_v45 = vld [vmem:[%s4418_s2 + $0x8] sm:$0xff] }
 0x719   : > { %v1282_v22 = vpop.f32.mrf.mxu2  ;;  %v1301_v23 = vpop.f32.mrf.mxu3 }
 0x71a   : > { %v1310_v3 = vmul.f32 0.2, %v1282_v22  ;;  %v1311_v24 = vmul.f32 0.2, %v1301_v23 }
 0x71c   : > { %v1318_v27 = vmax.f32 %v1282_v22, %v1310_v3  ;;  %v1319_v33 = vmax.f32 %v1301_v23, %v1311_v24 }
 0x721   : > { %v1284_v25 = vpop.f32.mrf.mxu2  ;;  %v1303_v30 = vpop.f32.mrf.mxu3 }
 0x722   : > { %v1312_v29 = vmul.f32 0.2, %v1284_v25  ;;  %v1313_v39 = vmul.f32 0.2, %v1303_v30 }
 0x724   : > { %v1320_v32 = vmax.f32 %v1284_v25, %v1312_v29  ;;  %v1321_v34 = vmax.f32 %v1303_v30, %v1313_v39 }
 0x726   : > { %v1324_v41 = vpack.c.bf16 %v1320_v32, %v1318_v27  ;;  %v1325_v43 = vpack.c.bf16 %v1321_v34, %v1319_v33 }
 0x728   : > { %1332 = vmatpush.bf16.msra.mxu0 %v1324_v41  ;;  %1351 = vmatpush.bf16.msra.mxu1 %v1325_v43 }
 0x729   : > { %v3977_v46 = vpop.f32.mrf.mxu2  ;;  %v3979_v6 = vpop.f32.mrf.mxu3 }
 0x72a   : > { %v1452_v38 = vmul.f32 0.2, %v3977_v46  ;;  %v1453_v40 = vmul.f32 0.2, %v3979_v6 }
 0x72c   : > { %1333 = vmatpush.bf16.msra.mxu0 %v1322_v47  ;;  %1352 = vmatpush.bf16.msra.mxu1 %v1323_v48  ;;  %v1468_v35 = vmax.f32 %v3977_v46, %v1452_v38  ;;  %v1469_v41 = vmax.f32 %v3979_v6, %v1453_v40 }
 0x72f   : > { %3239 = vmatmul.msk.bf16.vlgmr.msra.gmra.mxu0 %vm554_vm2, %v3830_v31  ;;  %3241 = vmatmul.msk.bf16.vlgmr.msra.gmra.mxu1 %vm554_vm2, %v3830_v31 }
 0x731   : > { %v1405_v49 = vpop.f32.mrf.mxu2  ;;  %v1434_v50 = vpop.f32.mrf.mxu3 }
 0x732   : > { %v1454_v3 = vmul.f32 0.2, %v1405_v49  ;;  %v1455_v26 = vmul.f32 0.2, %v1434_v50 }
 0x734   : > { %v1470_v32 = vmax.f32 %v1405_v49, %v1454_v3  ;;  %v1471_v33 = vmax.f32 %v1434_v50, %v1455_v26 }
 0x736   : > { %v1484_v42 = vpack.c.bf16 %v1470_v32, %v1468_v35  ;;  %v1485_v43 = vpack.c.bf16 %v1471_v33, %v1469_v41  ;;  %v3265_v33 = vld [vmem:[%s3712_s17 + $0x80] sm:$0xff]  ;;  %v3266_v41 = vld [vmem:[%s3712_s17 + $0x88] sm:$0xff] }
 0x739   : > { %v1408_v51 = vpop.f32.mrf.mxu2  ;;  %v1437_v7 = vpop.f32.mrf.mxu3 }
 0x73a   : > { %v1456_v2 = vmul.f32 0.2, %v1408_v51  ;;  %v1457_v22 = vmul.f32 0.2, %v1437_v7 }
 0x73c   : > { %v1472_v39 = vmax.f32 %v1408_v51, %v1456_v2  ;;  %v1473_v27 = vmax.f32 %v1437_v7, %v1457_v22 }
 0x73f   : > { %3240 = vmatmul.msk.bf16.gmra.mxu0 %vm554_vm2, %v3839_v37  ;;  %3242 = vmatmul.msk.bf16.gmra.mxu1 %vm554_vm2, %v3839_v37 }
 0x741   : > { %v1410_v52 = vpop.f32.mrf.mxu2  ;;  %v1439_v53 = vpop.f32.mrf.mxu3 }
 0x742   : > { %v1458_v13 = vmul.f32 0.2, %v1410_v52  ;;  %v1459_v36 = vmul.f32 0.2, %v1439_v53 }
 0x744   : > { %v1474_v24 = vmax.f32 %v1410_v52, %v1458_v13  ;;  %v1475_v29 = vmax.f32 %v1439_v53, %v1459_v36 }
 0x746   : > { %v1486_v28 = vpack.c.bf16 %v1474_v24, %v1472_v39  ;;  %v1487_v34 = vpack.c.bf16 %v1475_v29, %v1473_v27  ;;  %v4018_v29 = vld [vmem:[%s4419_s3] sm:$0xff] }
 0x749   : > { %v1413_v54 = vpop.f32.mrf.mxu2  ;;  %v1442_v55 = vpop.f32.mrf.mxu3 }
 0x74a   : > { %v1460_v5 = vmul.f32 0.2, %v1413_v54  ;;  %v1461_v37 = vmul.f32 0.2, %v1442_v55 }
 0x74c   : > { %v1476_v21 = vmax.f32 %v1413_v54, %v1460_v5  ;;  %v1477_v23 = vmax.f32 %v1442_v55, %v1461_v37 }
 0x751   : > { %v1415_v56 = vpop.f32.mrf.mxu2  ;;  %v1444_v8 = vpop.f32.mrf.mxu3 }
 0x752   : > { %v1462_v63 = vmul.f32 0.2, %v1415_v56  ;;  %v1463_v1 = vmul.f32 0.2, %v1444_v8 }
 0x754   : > { %v1478_v15 = vmax.f32 %v1415_v56, %v1462_v63  ;;  %v1479_v19 = vmax.f32 %v1444_v8, %v1463_v1 }
 0x756   : > { %v1488_v25 = vpack.c.bf16 %v1478_v15, %v1476_v21  ;;  %v1489_v30 = vpack.c.bf16 %v1479_v19, %v1477_v23 }
 0x759   : > { %v1418_v59 = vpop.f32.mrf.mxu2  ;;  %v1447_v60 = vpop.f32.mrf.mxu3 }
 0x75a   : > { %v1464_v61 = vmul.f32 0.2, %v1418_v59  ;;  %v1465_v31 = vmul.f32 0.2, %v1447_v60 }
 0x75c   : > { %v1480_v10 = vmax.f32 %v1418_v59, %v1464_v61  ;;  %v1481_v14 = vmax.f32 %v1447_v60, %v1465_v31 }
 0x761   : > { %v1420_v62 = vpop.f32.mrf.mxu2  ;;  %v1449_v0 = vpop.f32.mrf.mxu3 }
 0x762   : > { %v1466_v9 = vmul.f32 0.2, %v1420_v62  ;;  %v1467_v4 = vmul.f32 0.2, %v1449_v0 }
 0x764   : > { %v1482_v11 = vmax.f32 %v1420_v62, %v1466_v9  ;;  %v1483_v12 = vmax.f32 %v1449_v0, %v1467_v4 }
 0x766   : > { %v1490_v16 = vpack.c.bf16 %v1482_v11, %v1480_v10  ;;  %v1491_v20 = vpack.c.bf16 %v1483_v12, %v1481_v14 }
 0x768   : > { %1496 = vmatpush.bf16.msrb.mxu0 %v1490_v16  ;;  %1515 = vmatpush.bf16.msrb.mxu1 %v1491_v20 }
 0x76c   : > { %1497 = vmatpush.bf16.msrb.mxu0 %v1488_v25  ;;  %1516 = vmatpush.bf16.msrb.mxu1 %v1489_v30 }
 0x770   : > { %1498 = vmatpush.bf16.msrb.mxu0 %v1486_v28  ;;  %1517 = vmatpush.bf16.msrb.mxu1 %v1487_v34  ;;  %v3267_v34 = vld [vmem:[%s3712_s17 + $0xc0] sm:$0xff] }
 0x774   : > { %1499 = vmatpush.bf16.msrb.mxu0 %v1484_v42  ;;  %1518 = vmatpush.bf16.msrb.mxu1 %v1485_v43  ;;  %v3268_v42 = vld [vmem:[%s3712_s17 + $0xc8] sm:$0xff] }
 0x777   : > { %3251 = vmatmul.msk.bf16.vlgmr.msrb.gmra.mxu0 %vm484_vm1, %v3996_v44  ;;  %3253 = vmatmul.msk.bf16.vlgmr.msrb.gmra.mxu1 %vm484_vm1, %v3996_v44 }
 0x787   : > { %3252 = vmatmul.msk.bf16.gmra.mxu0 %vm484_vm1, %v4005_v45  ;;  %3254 = vmatmul.msk.bf16.gmra.mxu1 %vm484_vm1, %v4005_v45 }
 0x7ac   : > { %v1335_v46 = vpop.f32.mrf.mxu0  ;;  %v1354_v6 = vpop.f32.mrf.mxu1 }
 0x7ad   : > { %v1364_v47 = vpack.c.bf16 %v1354_v6, %v1335_v46  ;;  %v1372_v48 = vadd.f32 %v1354_v6, %v1335_v46 }
 0x7af   : > { %1368 = vst [vmem:[%s3859_s22 + $0x10] sm:$0xff] %v1364_v47  ;;  %1373 = vadd.xlane.f32.xlu2 %v1372_v48  ;;  %v1718_v48 = vpack.c.bf16 %v3267_v34, %v3265_v33 }
 0x7b4   : > { %v1337_v49 = vpop.f32.mrf.mxu0  ;;  %v1356_v50 = vpop.f32.mrf.mxu1 }
 0x7b5   : > { %v1365_v51 = vpack.c.bf16 %v1356_v50, %v1337_v49  ;;  %v1375_v7 = vadd.f32 %v1356_v50, %v1337_v49  ;;  %v1719_v50 = vpack.c.bf16 %v3268_v42, %v3266_v41 }
 0x7b7   : > { %1369 = vst [vmem:[%s3859_s22 + $0x30] sm:$0xff] %v1365_v51  ;;  %1376 = vadd.xlane.f32.xlu0 %v1375_v7  ;;  %v4031_v7 = vld [vmem:[%s4420_s4] sm:$0xff] }
 0x7bc   : > { %v1340_v52 = vpop.f32.mrf.mxu0  ;;  %v1359_v53 = vpop.f32.mrf.mxu1 }
 0x7bd   : > { %v1366_v54 = vpack.c.bf16 %v1359_v53, %v1340_v52  ;;  %v1378_v55 = vadd.f32 %v1359_v53, %v1340_v52  ;;  %v4040_v52 = vld [vmem:[%s4420_s4 + $0x8] sm:$0xff] }
 0x7bf   : > { %1370 = vst [vmem:[%s3859_s22 + $0x50] sm:$0xff] %v1366_v54  ;;  %1379 = vadd.xlane.f32.xlu1 %v1378_v55 }
 0x7c4   : > { %v1342_v56 = vpop.f32.mrf.mxu0  ;;  %v1361_v8 = vpop.f32.mrf.mxu1 }
 0x7c5   : > { %v1367_v59 = vpack.c.bf16 %v1361_v8, %v1342_v56  ;;  %v1381_v60 = vadd.f32 %v1361_v8, %v1342_v56 }
 0x7c7   : > { %1371 = vst [vmem:[%s3859_s22 + $0x70] sm:$0xff] %v1367_v59  ;;  %1382 = vadd.xlane.f32.xlu2 %v1381_v60 }
 0x7f4   : > { %v1501_v61 = vpop.f32.mrf.mxu0  ;;  %v1520_v31 = vpop.f32.mrf.mxu1 }
 0x7f5   : > { %v1530_v13 = vmul.f32 0.2, %v1501_v61  ;;  %v1531_v36 = vmul.f32 0.2, %v1520_v31 }
 0x7f7   : > { %v1538_v3 = vmax.f32 %v1501_v61, %v1530_v13  ;;  %v1539_v24 = vmax.f32 %v1520_v31, %v1531_v36 }
 0x7fc   : > { %v1503_v62 = vpop.f32.mrf.mxu0  ;;  %v1522_v63 = vpop.f32.mrf.mxu1 }
 0x7fd   : > { %v1532_v10 = vmul.f32 0.2, %v1503_v62  ;;  %v1533_v14 = vmul.f32 0.2, %v1522_v63 }
 0x7ff   : > { %v1540_v2 = vmax.f32 %v1503_v62, %v1532_v10  ;;  %v1541_v22 = vmax.f32 %v1522_v63, %v1533_v14 }
 0x801   : > { %v1546_v25 = vpack.c.bf16 %v1540_v2, %v1538_v3  ;;  %v1547_v26 = vpack.c.bf16 %v1541_v22, %v1539_v24 }
 0x804   : > { %v1506_v9 = vpop.f32.mrf.mxu0  ;;  %v1525_v0 = vpop.f32.mrf.mxu1 }
 0x805   : > { %v1534_v1 = vmul.f32 0.2, %v1506_v9  ;;  %v1535_v4 = vmul.f32 0.2, %v1525_v0 }
 0x807   : > { %v1542_v15 = vmax.f32 %v1506_v9, %v1534_v1  ;;  %v1543_v19 = vmax.f32 %v1525_v0, %v1535_v4 }
 0x80c   : > { %v1508_v5 = vpop.f32.mrf.mxu0  ;;  %v1527_v37 = vpop.f32.mrf.mxu1 }
 0x80d   : > { %v1536_v11 = vmul.f32 0.2, %v1508_v5  ;;  %v1537_v12 = vmul.f32 0.2, %v1527_v37 }
 0x80f   : > { %v1544_v16 = vmax.f32 %v1508_v5, %v1536_v11  ;;  %v1545_v20 = vmax.f32 %v1527_v37, %v1537_v12 }
 0x811   : > { %v1548_v21 = vpack.c.bf16 %v1544_v16, %v1542_v15  ;;  %v1549_v23 = vpack.c.bf16 %v1545_v20, %v1543_v19 }
 0x813   : > { %1556 = vmatpush.bf16.msra.mxu0 %v1548_v21  ;;  %1570 = vmatpush.bf16.msra.mxu1 %v1549_v23  ;;  %v4069_v23 = vld [vmem:[%s4421_s5] sm:$0xff] }
 0x817   : > { %1557 = vmatpush.bf16.msra.mxu0 %v1546_v25  ;;  %1571 = vmatpush.bf16.msra.mxu1 %v1547_v26 }
 0x81a   : > { %3255 = vmatmul.msk.bf16.vlgmr.msra.gmra.mxu0 %vm554_vm2, %v4018_v29  ;;  %3256 = vmatmul.msk.bf16.vlgmr.msra.gmra.mxu1 %vm554_vm2, %v4018_v29 }
 0x897   : > { %v1559_v30 = vpop.f32.mrf.mxu0  ;;  %v1573_v38 = vpop.f32.mrf.mxu1 }
 0x898   : > { %v1578_v39 = vmul.f32 0.2, %v1559_v30  ;;  %v1579_v40 = vmul.f32 0.2, %v1573_v38 }
 0x89a   : > { %v1582_v43 = vmax.f32 %v1559_v30, %v1578_v39  ;;  %v1583_v6 = vmax.f32 %v1573_v38, %v1579_v40  ;;  %v4078_v30 = vld [vmem:[%s4421_s5 + $0x8] sm:$0xff] }
 0x89f   : > { %v1561_v27 = vpop.f32.mrf.mxu0  ;;  %v1575_v28 = vpop.f32.mrf.mxu1 }
 0x8a0   : > { %v1580_v32 = vmul.f32 0.2, %v1561_v27  ;;  %v1581_v35 = vmul.f32 0.2, %v1575_v28 }
 0x8a2   : > { %v1584_v46 = vmax.f32 %v1561_v27, %v1580_v32  ;;  %v1585_v47 = vmax.f32 %v1575_v28, %v1581_v35 }
 0x8a4   : > { %v1586_v49 = vpack.c.bf16 %v1584_v46, %v1582_v43  ;;  %v1587_v51 = vpack.c.bf16 %v1585_v47, %v1583_v6 }
 0x8a6   : > { %1595 = vmatpush.bf16.msrb.mxu0 %v1586_v49  ;;  %1614 = vmatpush.bf16.msrb.mxu1 %v1587_v51 }
 0x8a9   : > { %3257 = vmatmul.msk.bf16.vlgmr.msrb.gmra.mxu0 %vm363_vm0, %v4031_v7  ;;  %3259 = vmatmul.msk.bf16.vlgmr.msrb.gmra.mxu1 %vm363_vm0, %v4031_v7 }
 0x8aa   : > { %1727 = vmatpush.bf16.msra.mxu0 %v1718_v48  ;;  %1756 = vmatpush.bf16.msra.mxu1 %v1719_v50 }
 0x8b9   : > { %3258 = vmatmul.msk.bf16.gmra.mxu0 %vm363_vm0, %v4040_v52  ;;  %3260 = vmatmul.msk.bf16.gmra.mxu1 %vm363_vm0, %v4040_v52 }
 0x8c9   : > { %3269 = vmatmul.msk.bf16.vlgmr.msra.gmra.mxu0 %vm363_vm0, %v3944_v17  ;;  %3273 = vmatmul.msk.bf16.vlgmr.msra.gmra.mxu1 %vm363_vm0, %v3944_v17 }
 0x8d9   : > { %3270 = vmatmul.msk.bf16.gmra.mxu0 %vm363_vm0, %v3953_v57  ;;  %3274 = vmatmul.msk.bf16.gmra.mxu1 %vm363_vm0, %v3953_v57 }
 0x8e9   : > { %3271 = vmatmul.msk.bf16.gmra.mxu0 %vm363_vm0, %v3962_v58  ;;  %3275 = vmatmul.msk.bf16.gmra.mxu1 %vm363_vm0, %v3962_v58 }
 0x8f9   : > { %3272 = vmatmul.msk.bf16.gmra.mxu0 %vm363_vm0, %v3971_v18  ;;  %3276 = vmatmul.msk.bf16.gmra.mxu1 %vm363_vm0, %v3971_v18 }
 0x926   : > { %v1597_v53 = vpop.f32.mrf.mxu0  ;;  %v1616_v54 = vpop.f32.mrf.mxu1 }
 0x927   : > { %v1626_v4 = vmul.f32 0.2, %v1597_v53  ;;  %v1627_v11 = vmul.f32 0.2, %v1616_v54 }
 0x929   : > { %v1634_v36 = vmax.f32 %v1597_v53, %v1626_v4  ;;  %v1635_v19 = vmax.f32 %v1616_v54, %v1627_v11 }
 0x92e   : > { %v1599_v55 = vpop.f32.mrf.mxu0  ;;  %v1618_v56 = vpop.f32.mrf.mxu1 }
 0x92f   : > { %v1628_v62 = vmul.f32 0.2, %v1599_v55  ;;  %v1629_v0 = vmul.f32 0.2, %v1618_v56 }
 0x931   : > { %v1636_v12 = vmax.f32 %v1599_v55, %v1628_v62  ;;  %v1637_v15 = vmax.f32 %v1618_v56, %v1629_v0 }
 0x933   : > { %v1642_v21 = vpack.c.bf16 %v1636_v12, %v1634_v36  ;;  %v1643_v22 = vpack.c.bf16 %v1637_v15, %v1635_v19 }
 0x936   : > { %v1602_v8 = vpop.f32.mrf.mxu0  ;;  %v1621_v59 = vpop.f32.mrf.mxu1 }
 0x937   : > { %v1630_v60 = vmul.f32 0.2, %v1602_v8  ;;  %v1631_v61 = vmul.f32 0.2, %v1621_v59 }
 0x939   : > { %v1638_v5 = vmax.f32 %v1602_v8, %v1630_v60  ;;  %v1639_v37 = vmax.f32 %v1621_v59, %v1631_v61 }
 0x93e   : > { %v1604_v31 = vpop.f32.mrf.mxu0  ;;  %v1623_v9 = vpop.f32.mrf.mxu1 }
 0x93f   : > { %v1632_v63 = vmul.f32 0.2, %v1604_v31  ;;  %v1633_v1 = vmul.f32 0.2, %v1623_v9 }
 0x941   : > { %v1640_v10 = vmax.f32 %v1604_v31, %v1632_v63  ;;  %v1641_v14 = vmax.f32 %v1623_v9, %v1633_v1 }
 0x943   : > { %v1644_v13 = vpack.c.bf16 %v1640_v10, %v1638_v5  ;;  %v1645_v16 = vpack.c.bf16 %v1641_v14, %v1639_v37 }
 0x945   : > { %1652 = vmatpush.bf16.msrb.mxu2 %v1644_v13  ;;  %1671 = vmatpush.bf16.msrb.mxu3 %v1645_v16 }
 0x946   : > { %v4062_v20 = vpop.f32.mrf.mxu0  ;;  %v4064_v2 = vpop.f32.mrf.mxu1 }
 0x947   : > { %v1778_v14 = vmul.f32 0.2, %v4062_v20  ;;  %v1779_v13 = vmul.f32 0.2, %v4064_v2 }
 0x949   : > { %1653 = vmatpush.bf16.msrb.mxu2 %v1642_v21  ;;  %1672 = vmatpush.bf16.msrb.mxu3 %v1643_v22  ;;  %v1794_v22 = vmax.f32 %v4062_v20, %v1778_v14 }
 0x94c   : > { %3261 = vmatmul.msk.bf16.vlgmr.msrb.gmra.mxu2 %vm554_vm2, %v4069_v23  ;;  %3263 = vmatmul.msk.bf16.vlgmr.msrb.gmra.mxu3 %vm554_vm2, %v4069_v23 }
 0x94e   : > { %v1731_v3 = vpop.f32.mrf.mxu0  ;;  %v1760_v24 = vpop.f32.mrf.mxu1 }
 0x94f   : > { %v1780_v1 = vmul.f32 0.2, %v1731_v3  ;;  %v1781_v10 = vmul.f32 0.2, %v1760_v24 }
 0x951   : > { %v1796_v16 = vmax.f32 %v1731_v3, %v1780_v1  ;;  %v1797_v19 = vmax.f32 %v1760_v24, %v1781_v10 }
 0x956   : > { %v1734_v25 = vpop.f32.mrf.mxu0  ;;  %v1763_v26 = vpop.f32.mrf.mxu1 }
 0x957   : > { %v1782_v62 = vmul.f32 0.2, %v1734_v25  ;;  %v1783_v9 = vmul.f32 0.2, %v1763_v26 }
 0x959   : > { %v1798_v12 = vmax.f32 %v1734_v25, %v1782_v62  ;;  %v1799_v15 = vmax.f32 %v1763_v26, %v1783_v9 }
 0x95c   : > { %3262 = vmatmul.msk.bf16.gmra.mxu2 %vm554_vm2, %v4078_v30  ;;  %3264 = vmatmul.msk.bf16.gmra.mxu3 %vm554_vm2, %v4078_v30 }
 0x95e   : > { %v1736_v38 = vpop.f32.mrf.mxu0  ;;  %v1765_v39 = vpop.f32.mrf.mxu1 }
 0x95f   : > { %v1784_v56 = vmul.f32 0.2, %v1736_v38  ;;  %v1785_v60 = vmul.f32 0.2, %v1765_v39 }
 0x961   : > { %v1800_v4 = vmax.f32 %v1736_v38, %v1784_v56  ;;  %v1801_v11 = vmax.f32 %v1765_v39, %v1785_v60  ;;  %v1795_v38 = vmax.f32 %v4064_v2, %v1779_v13  ;;  %v1810_v39 = vpack.c.bf16 %v1796_v16, %v1794_v22  ;;  %v1054_v60 = vpop.xlane.xlu2 %1053 }
 0x963   : > { %v1812_v36 = vpack.c.bf16 %v1800_v4, %v1798_v12  ;;  %v1813_v21 = vpack.c.bf16 %v1801_v11, %v1799_v15 }
 0x966   : > { %v1739_v40 = vpop.f32.mrf.mxu0  ;;  %v1768_v27 = vpop.f32.mrf.mxu1 }
 0x967   : > { %v1786_v49 = vmul.f32 0.2, %v1739_v40  ;;  %v1787_v53 = vmul.f32 0.2, %v1768_v27 }
 0x969   : > { %v1802_v63 = vmax.f32 %v1739_v40, %v1786_v49  ;;  %v1803_v0 = vmax.f32 %v1768_v27, %v1787_v53  ;;  %v1811_v40 = vpack.c.bf16 %v1797_v19, %v1795_v38  ;;  %v1057_v38 = vpop.xlane.xlu2 %1056 }
 0x96e   : > { %v1741_v32 = vpop.f32.mrf.mxu0  ;;  %v1770_v28 = vpop.f32.mrf.mxu1 }
 0x96f   : > { %v1788_v43 = vmul.f32 0.2, %v1741_v32  ;;  %v1789_v47 = vmul.f32 0.2, %v1770_v28 }
 0x971   : > { %v1804_v8 = vmax.f32 %v1741_v32, %v1788_v43  ;;  %v1805_v61 = vmax.f32 %v1770_v28, %v1789_v47 }
 0x973   : > { %v1814_v5 = vpack.c.bf16 %v1804_v8, %v1802_v63  ;;  %v1815_v37 = vpack.c.bf16 %v1805_v61, %v1803_v0 }
 0x976   : > { %v1744_v33 = vpop.f32.mrf.mxu0  ;;  %v1773_v34 = vpop.f32.mrf.mxu1 }
 0x977   : > { %v1790_v35 = vmul.f32 0.2, %v1744_v33  ;;  %v1791_v41 = vmul.f32 0.2, %v1773_v34 }
 0x979   : > { %v1806_v50 = vmax.f32 %v1744_v33, %v1790_v35  ;;  %v1807_v54 = vmax.f32 %v1773_v34, %v1791_v41 }
 0x97e   : > { %v1746_v42 = vpop.f32.mrf.mxu0  ;;  %v1775_v6 = vpop.f32.mrf.mxu1 }
 0x97f   : > { %v1792_v46 = vmul.f32 0.2, %v1746_v42  ;;  %v1793_v48 = vmul.f32 0.2, %v1775_v6 }
 0x981   : > { %v1808_v51 = vmax.f32 %v1746_v42, %v1792_v46  ;;  %v1809_v55 = vmax.f32 %v1775_v6, %v1793_v48 }
 0x983   : > { %v1816_v59 = vpack.c.bf16 %v1808_v51, %v1806_v50  ;;  %v1817_v31 = vpack.c.bf16 %v1809_v55, %v1807_v54  ;;  %v734_v50 = vpop.xlane.xlu0 %733  ;;  %v740_v54 = vpop.xlane.xlu1 %739 }
 0x985   : > { %1822 = vmatpush.bf16.msra.mxu2 %v1816_v59  ;;  %1841 = vmatpush.bf16.msra.mxu3 %v1817_v31 }
 0x989   : > { %1823 = vmatpush.bf16.msra.mxu2 %v1814_v5  ;;  %1842 = vmatpush.bf16.msra.mxu3 %v1815_v37 }
 0x98b   : > { %v737_v55 = vpop.xlane.xlu0 %736  ;;  %v743_v15 = vpop.xlane.xlu1 %742 }
 0x98d   : > { %1824 = vmatpush.bf16.msra.mxu2 %v1812_v36  ;;  %1843 = vmatpush.bf16.msra.mxu3 %v1813_v21 }
 0x991   : > { %1825 = vmatpush.bf16.msra.mxu2 %v1810_v39  ;;  %1844 = vmatpush.bf16.msra.mxu3 %v1811_v40 }
 0x993   : > { %v1060_v16 = vpop.xlane.xlu0 %1059  ;;  %v1063_v39 = vpop.xlane.xlu1 %1062 }
 0x994   : > { %3277 = vmatmul.msk.bf16.vlgmr.msra.gmra.mxu2 %vm484_vm1, %v3996_v44  ;;  %3279 = vmatmul.msk.bf16.vlgmr.msra.gmra.mxu3 %vm484_vm1, %v3996_v44 }
 0x99b   : > { %v1377_v40 = vpop.xlane.xlu0 %1376 }
 0x9a4   : > { %3278 = vmatmul.msk.bf16.gmra.mxu2 %vm484_vm1, %v4005_v45  ;;  %3280 = vmatmul.msk.bf16.gmra.mxu3 %vm484_vm1, %v4005_v45 }
 0x9cf   : > { %v1655_v20 = vpop.f32.mrf.mxu2  ;;  %v1674_v2 = vpop.f32.mrf.mxu3 }
 0x9d0   : > { %v1684_v3 = vpack.c.bf16 %v1674_v2, %v1655_v20  ;;  %v1692_v24 = vadd.f32 %v1674_v2, %v1655_v20  ;;  %v1374_v20 = vpop.xlane.xlu2 %1373  ;;  %v1064_v2 = vadd.f32 %v1054_v60, %v734_v50 }
 0x9d2   : > { %1688 = vst [vmem:[%s3859_s22 + $0x18] sm:$0xff] %v1684_v3  ;;  %1693 = vadd.xlane.f32.xlu0 %v1692_v24  ;;  %v1384_v3 = vadd.f32 %v1374_v20, %v1064_v2  ;;  %v1380_v24 = vpop.xlane.xlu1 %1379 }
 0x9d7   : > { %v1657_v25 = vpop.f32.mrf.mxu2  ;;  %v1676_v26 = vpop.f32.mrf.mxu3 }
 0x9d8   : > { %v1685_v27 = vpack.c.bf16 %v1676_v26, %v1657_v25  ;;  %v1695_v32 = vadd.f32 %v1676_v26, %v1657_v25 }
 0x9da   : > { %1689 = vst [vmem:[%s3859_s22 + $0x38] sm:$0xff] %v1685_v27  ;;  %1696 = vadd.xlane.f32.xlu1 %v1695_v32  ;;  %v1065_v27 = vadd.f32 %v1057_v38, %v737_v55 }
 0x9dc   : > { %v1385_v32 = vadd.f32 %v1377_v40, %v1065_v27 }
 0x9df   : > { %v1660_v28 = vpop.f32.mrf.mxu2  ;;  %v1679_v33 = vpop.f32.mrf.mxu3 }
 0x9e0   : > { %v1686_v34 = vpack.c.bf16 %v1679_v33, %v1660_v28  ;;  %v1698_v35 = vadd.f32 %v1679_v33, %v1660_v28  ;;  %v1383_v28 = vpop.xlane.xlu2 %1382 }
 0x9e2   : > { %1690 = vst [vmem:[%s3859_s22 + $0x58] sm:$0xff] %v1686_v34  ;;  %1699 = vadd.xlane.f32.xlu2 %v1698_v35  ;;  %v1066_v35 = vadd.f32 %v1060_v16, %v740_v54 }
 0x9e7   : > { %v1662_v41 = vpop.f32.mrf.mxu2  ;;  %v1681_v42 = vpop.f32.mrf.mxu3 }
 0x9e8   : > { %v1687_v43 = vpack.c.bf16 %v1681_v42, %v1662_v41  ;;  %v1701_v46 = vadd.f32 %v1681_v42, %v1662_v41  ;;  %v1386_v41 = vadd.f32 %v1380_v24, %v1066_v35 }
 0x9ea   : > { %1691 = vst [vmem:[%s3859_s22 + $0x78] sm:$0xff] %v1687_v43  ;;  %1702 = vadd.xlane.f32.xlu0 %v1701_v46  ;;  %v1067_v46 = vadd.f32 %v1063_v39, %v743_v15 }
 0xa17   : > { %v1827_v6 = vpop.f32.mrf.mxu2  ;;  %v1846_v47 = vpop.f32.mrf.mxu3 }
 0xa18   : > { %v1856_v0 = vmul.f32 0.2, %v1827_v6  ;;  %v1857_v5 = vmul.f32 0.2, %v1846_v47 }
 0xa1a   : > { %v1864_v36 = vmax.f32 %v1827_v6, %v1856_v0  ;;  %v1865_v19 = vmax.f32 %v1846_v47, %v1857_v5  ;;  %v1387_v6 = vadd.f32 %v1383_v28, %v1067_v46 }
 0xa1f   : > { %v1829_v48 = vpop.f32.mrf.mxu2  ;;  %v1848_v49 = vpop.f32.mrf.mxu3 }
 0xa20   : > { %v1858_v61 = vmul.f32 0.2, %v1829_v48  ;;  %v1859_v63 = vmul.f32 0.2, %v1848_v49 }
 0xa22   : > { %v1866_v37 = vmax.f32 %v1829_v48, %v1858_v61  ;;  %v1867_v12 = vmax.f32 %v1848_v49, %v1859_v63  ;;  %v3296_v61 = vld [vmem:[%s3712_s17 + $0x98] sm:$0xff] }
 0xa24   : > { %v1872_v21 = vpack.c.bf16 %v1866_v37, %v1864_v36  ;;  %v1873_v22 = vpack.c.bf16 %v1867_v12, %v1865_v19 }
 0xa27   : > { %v1832_v51 = vpop.f32.mrf.mxu2  ;;  %v1851_v53 = vpop.f32.mrf.mxu3 }
 0xa28   : > { %v1860_v56 = vmul.f32 0.2, %v1832_v51  ;;  %v1861_v8 = vmul.f32 0.2, %v1851_v53 }
 0xa2a   : > { %v1868_v1 = vmax.f32 %v1832_v51, %v1860_v56  ;;  %v1869_v10 = vmax.f32 %v1851_v53, %v1861_v8  ;;  %v3295_v8 = vld [vmem:[%s3712_s17 + $0x90] sm:$0xff] }
 0xa2f   : > { %v1834_v59 = vpop.f32.mrf.mxu2  ;;  %v1853_v62 = vpop.f32.mrf.mxu3 }
 0xa30   : > { %v1862_v31 = vmul.f32 0.2, %v1834_v59  ;;  %v1863_v9 = vmul.f32 0.2, %v1853_v62 }
 0xa32   : > { %v1870_v4 = vmax.f32 %v1834_v59, %v1862_v31  ;;  %v1871_v11 = vmax.f32 %v1853_v62, %v1863_v9  ;;  %v3297_v59 = vld [vmem:[%s3712_s17 + $0xd0] sm:$0xff]  ;;  %v3298_v31 = vld [vmem:[%s3712_s17 + $0xd8] sm:$0xff] }
 0xa33   : > { %v2040_v5 = vpack.c.bf16 %v3298_v31, %v3296_v61 }
 0xa34   : > { %v1874_v14 = vpack.c.bf16 %v1870_v4, %v1868_v1  ;;  %v1875_v13 = vpack.c.bf16 %v1871_v11, %v1869_v10  ;;  %v2039_v1 = vpack.c.bf16 %v3297_v59, %v3295_v8 }
 0xa36   : > { %1882 = vmatpush.bf16.msrb.mxu2 %v1874_v14  ;;  %1896 = vmatpush.bf16.msrb.mxu3 %v1875_v13 }
 0xa3a   : > { %1883 = vmatpush.bf16.msrb.mxu2 %v1872_v21  ;;  %1897 = vmatpush.bf16.msrb.mxu3 %v1873_v22 }
 0xa3d   : > { %3281 = vmatmul.msk.bf16.vlgmr.msrb.gmra.mxu2 %vm554_vm2, %v4018_v29  ;;  %3282 = vmatmul.msk.bf16.vlgmr.msrb.gmra.mxu3 %vm554_vm2, %v4018_v29 }
 0xa45   : > { %v1694_v25 = vpop.xlane.xlu0 %1693 }
 0xa46   : > { %v1704_v26 = vadd.f32 %v1694_v25, %v1384_v3 }
 0xa48   : > { %1709 = vst.msk [vmem:[%s4109_s21] sm:$0xff] %vm1708_vm3, %v1704_v26 }
 0xa4d   : > { %v1697_v33 = vpop.xlane.xlu1 %1696 }
 0xa4e   : > { %v1705_v34 = vadd.f32 %v1697_v33, %v1385_v32 }
 0xa50   : > { %1710 = vst.msk [vmem:[%s4109_s21 + $0x8] sm:$0xff] %vm1708_vm3, %v1705_v34 }
 0xa55   : > { %v1700_v42 = vpop.xlane.xlu2 %1699 }
 0xa56   : > { %v1706_v43 = vadd.f32 %v1700_v42, %v1386_v41 }
 0xa58   : > { %1711 = vst.msk [vmem:[%s4109_s21 + $0x10] sm:$0xff] %vm1708_vm3, %v1706_v43 }
 0xa5d   : > { %v1703_v47 = vpop.xlane.xlu0 %1702 }
 0xa5e   : > { %v1707_v48 = vadd.f32 %v1703_v47, %v1387_v6 }
 0xa60   : > { %1712 = vst.msk [vmem:[%s4109_s21 + $0x18] sm:$0xff] %vm1708_vm3, %v1707_v48 }
 0xac0   : > { %v1885_v49 = vpop.f32.mrf.mxu2  ;;  %v1899_v50 = vpop.f32.mrf.mxu3 }
 0xac1   : > { %v1904_v51 = vmul.f32 0.2, %v1885_v49  ;;  %v1905_v53 = vmul.f32 0.2, %v1899_v50 }
 0xac3   : > { %v1908_v62 = vmax.f32 %v1885_v49, %v1904_v51  ;;  %v1909_v9 = vmax.f32 %v1899_v50, %v1905_v53 }
 0xac8   : > { %v1887_v54 = vpop.f32.mrf.mxu2  ;;  %v1901_v56 = vpop.f32.mrf.mxu3 }
 0xac9   : > { %v1906_v55 = vmul.f32 0.2, %v1887_v54  ;;  %v1907_v60 = vmul.f32 0.2, %v1901_v56 }
 0xacb   : > { %v1910_v63 = vmax.f32 %v1887_v54, %v1906_v55  ;;  %v1911_v0 = vmax.f32 %v1901_v56, %v1907_v60 }
 0xacd   : > { %v1912_v4 = vpack.c.bf16 %v1910_v63, %v1908_v62  ;;  %v1913_v10 = vpack.c.bf16 %v1911_v0, %v1909_v9 }
 0xacf   : > { %1921 = vmatpush.bf16.msra.mxu2 %v1912_v4  ;;  %1940 = vmatpush.bf16.msra.mxu3 %v1913_v10 }
 0xad2   : > { %3283 = vmatmul.msk.bf16.vlgmr.msra.gmra.mxu2 %vm363_vm0, %v4031_v7  ;;  %3285 = vmatmul.msk.bf16.vlgmr.msra.gmra.mxu3 %vm363_vm0, %v4031_v7 }
 0xad3   : > { %2048 = vmatpush.bf16.msrb.mxu2 %v2039_v1  ;;  %2077 = vmatpush.bf16.msrb.mxu3 %v2040_v5 }
 0xae2   : > { %3284 = vmatmul.msk.bf16.gmra.mxu2 %vm363_vm0, %v4040_v52  ;;  %3286 = vmatmul.msk.bf16.gmra.mxu3 %vm363_vm0, %v4040_v52 }
 0xaf2   : > { %3299 = vmatmul.msk.bf16.vlgmr.msrb.gmra.mxu2 %vm363_vm0, %v3944_v17  ;;  %3303 = vmatmul.msk.bf16.vlgmr.msrb.gmra.mxu3 %vm363_vm0, %v3944_v17 }
 0xb02   : > { %3300 = vmatmul.msk.bf16.gmra.mxu2 %vm363_vm0, %v3953_v57  ;;  %3304 = vmatmul.msk.bf16.gmra.mxu3 %vm363_vm0, %v3953_v57 }
 0xb12   : > { %3301 = vmatmul.msk.bf16.gmra.mxu2 %vm363_vm0, %v3962_v58  ;;  %3305 = vmatmul.msk.bf16.gmra.mxu3 %vm363_vm0, %v3962_v58 }
 0xb22   : > { %3302 = vmatmul.msk.bf16.gmra.mxu2 %vm363_vm0, %v3971_v18  ;;  %3306 = vmatmul.msk.bf16.gmra.mxu3 %vm363_vm0, %v3971_v18 }
 0xb55   : > { %v1923_v11 = vpop.f32.mrf.mxu2  ;;  %v1942_v17 = vpop.f32.mrf.mxu3 }
 0xb56   : > { %v1952_v38 = vmul.f32 0.2, %v1923_v11  ;;  %v1953_v20 = vmul.f32 0.2, %v1942_v17 }
 0xb58   : > { %v1960_v27 = vmax.f32 %v1923_v11, %v1952_v38  ;;  %v1961_v32 = vmax.f32 %v1942_v17, %v1953_v20 }
 0xb5d   : > { %v1925_v37 = vpop.f32.mrf.mxu2  ;;  %v1944_v14 = vpop.f32.mrf.mxu3 }
 0xb5e   : > { %v1954_v36 = vmul.f32 0.2, %v1925_v37  ;;  %v1955_v22 = vmul.f32 0.2, %v1944_v14 }
 0xb60   : > { %v1962_v3 = vmax.f32 %v1925_v37, %v1954_v36  ;;  %v1963_v25 = vmax.f32 %v1944_v14, %v1955_v22 }
 0xb62   : > { %v1968_v34 = vpack.c.bf16 %v1962_v3, %v1960_v27  ;;  %v1969_v35 = vpack.c.bf16 %v1963_v25, %v1961_v32 }
 0xb65   : > { %v1928_v12 = vpop.f32.mrf.mxu2  ;;  %v1947_v13 = vpop.f32.mrf.mxu3 }
 0xb66   : > { %v1956_v15 = vmul.f32 0.2, %v1928_v12  ;;  %v1957_v57 = vmul.f32 0.2, %v1947_v13 }
 0xb68   : > { %v1964_v39 = vmax.f32 %v1928_v12, %v1956_v15  ;;  %v1965_v2 = vmax.f32 %v1947_v13, %v1957_v57 }
 0xb6d   : > { %v1930_v16 = vpop.f32.mrf.mxu2  ;;  %v1949_v21 = vpop.f32.mrf.mxu3 }
 0xb6e   : > { %v1958_v19 = vmul.f32 0.2, %v1930_v16  ;;  %v1959_v58 = vmul.f32 0.2, %v1949_v21 }
 0xb70   : > { %v1966_v40 = vmax.f32 %v1930_v16, %v1958_v19  ;;  %v1967_v18 = vmax.f32 %v1949_v21, %v1959_v58 }
 0xb72   : > { %v1970_v24 = vpack.c.bf16 %v1966_v40, %v1964_v39  ;;  %v1971_v26 = vpack.c.bf16 %v1967_v18, %v1965_v2 }
 0xb74   : > { %1978 = vmatpush.bf16.msrb.mxu0 %v1970_v24  ;;  %1997 = vmatpush.bf16.msrb.mxu1 %v1971_v26 }
 0xb75   : > { %v4147_v28 = vpop.f32.mrf.mxu2  ;;  %v4149_v33 = vpop.f32.mrf.mxu3 }
 0xb76   : > { %v2099_v39 = vmul.f32 0.2, %v4147_v28  ;;  %v2100_v20 = vmul.f32 0.2, %v4149_v33 }
 0xb78   : > { %1979 = vmatpush.bf16.msrb.mxu0 %v1968_v34  ;;  %1998 = vmatpush.bf16.msrb.mxu1 %v1969_v35  ;;  %v2115_v26 = vmax.f32 %v4147_v28, %v2099_v39  ;;  %v2116_v27 = vmax.f32 %v4149_v33, %v2100_v20 }
 0xb7b   : > { %3287 = vmatmul.msk.bf16.vlgmr.msrb.gmra.mxu0 %vm554_vm2, %v4069_v23  ;;  %3289 = vmatmul.msk.bf16.vlgmr.msrb.gmra.mxu1 %vm554_vm2, %v4069_v23 }
 0xb7d   : > { %v2052_v41 = vpop.f32.mrf.mxu2  ;;  %v2081_v42 = vpop.f32.mrf.mxu3 }
 0xb7e   : > { %v2101_v36 = vmul.f32 0.2, %v2052_v41  ;;  %v2102_v22 = vmul.f32 0.2, %v2081_v42 }
 0xb80   : > { %v2117_v18 = vmax.f32 %v2052_v41, %v2101_v36  ;;  %v2118_v24 = vmax.f32 %v2081_v42, %v2102_v22 }
 0xb82   : > { %v2131_v32 = vpack.c.bf16 %v2117_v18, %v2115_v26  ;;  %v2132_v34 = vpack.c.bf16 %v2118_v24, %v2116_v27  ;;  %v3325_v18 = vld [vmem:[%s3712_s17 + $0xa0] sm:$0xff]  ;;  %v3328_v26 = vld [vmem:[%s3712_s17 + $0xe8] sm:$0xff] }
 0xb85   : > { %v2055_v43 = vpop.f32.mrf.mxu2  ;;  %v2084_v46 = vpop.f32.mrf.mxu3 }
 0xb86   : > { %v2103_v13 = vmul.f32 0.2, %v2055_v43  ;;  %v2104_v57 = vmul.f32 0.2, %v2084_v46 }
 0xb88   : > { %v2119_v40 = vmax.f32 %v2055_v43, %v2103_v13  ;;  %v2120_v2 = vmax.f32 %v2084_v46, %v2104_v57 }
 0xb8b   : > { %3288 = vmatmul.msk.bf16.gmra.mxu0 %vm554_vm2, %v4078_v30  ;;  %3290 = vmatmul.msk.bf16.gmra.mxu1 %vm554_vm2, %v4078_v30 }
 0xb8d   : > { %v2057_v6 = vpop.f32.mrf.mxu2  ;;  %v2086_v47 = vpop.f32.mrf.mxu3 }
 0xb8e   : > { %v2105_v10 = vmul.f32 0.2, %v2057_v6  ;;  %v2106_v37 = vmul.f32 0.2, %v2086_v47 }
 0xb90   : > { %v2121_v19 = vmax.f32 %v2057_v6, %v2105_v10  ;;  %v2122_v58 = vmax.f32 %v2086_v47, %v2106_v37 }
 0xb92   : > { %v2133_v3 = vpack.c.bf16 %v2121_v19, %v2119_v40  ;;  %v2134_v25 = vpack.c.bf16 %v2122_v58, %v2120_v2 }
 0xb95   : > { %v2060_v48 = vpop.f32.mrf.mxu2  ;;  %v2089_v49 = vpop.f32.mrf.mxu3 }
 0xb96   : > { %v2107_v63 = vmul.f32 0.2, %v2060_v48  ;;  %v2108_v1 = vmul.f32 0.2, %v2089_v49 }
 0xb98   : > { %v2123_v15 = vmax.f32 %v2060_v48, %v2107_v63  ;;  %v2124_v16 = vmax.f32 %v2089_v49, %v2108_v1 }
 0xb9d   : > { %v2062_v50 = vpop.f32.mrf.mxu2  ;;  %v2091_v51 = vpop.f32.mrf.mxu3 }
 0xb9e   : > { %v2109_v59 = vmul.f32 0.2, %v2062_v50  ;;  %v2110_v31 = vmul.f32 0.2, %v2091_v51 }
 0xba0   : > { %v2125_v11 = vmax.f32 %v2062_v50, %v2109_v59  ;;  %v2126_v14 = vmax.f32 %v2091_v51, %v2110_v31 }
 0xba2   : > { %v2135_v21 = vpack.c.bf16 %v2125_v11, %v2123_v15  ;;  %v2136_v38 = vpack.c.bf16 %v2126_v14, %v2124_v16 }
 0xba5   : > { %v2065_v53 = vpop.f32.mrf.mxu2  ;;  %v2094_v54 = vpop.f32.mrf.mxu3 }
 0xba6   : > { %v2111_v55 = vmul.f32 0.2, %v2065_v53  ;;  %v2112_v56 = vmul.f32 0.2, %v2094_v54 }
 0xba8   : > { %v2127_v9 = vmax.f32 %v2065_v53, %v2111_v55  ;;  %v2128_v4 = vmax.f32 %v2094_v54, %v2112_v56 }
 0xbad   : > { %v2067_v8 = vpop.f32.mrf.mxu2  ;;  %v2096_v61 = vpop.f32.mrf.mxu3 }
 0xbae   : > { %v2113_v60 = vmul.f32 0.2, %v2067_v8  ;;  %v2114_v62 = vmul.f32 0.2, %v2096_v61 }
 0xbb0   : > { %v2129_v0 = vmax.f32 %v2067_v8, %v2113_v60  ;;  %v2130_v5 = vmax.f32 %v2096_v61, %v2114_v62 }
 0xbb2   : > { %v2137_v17 = vpack.c.bf16 %v2129_v0, %v2127_v9  ;;  %v2138_v12 = vpack.c.bf16 %v2130_v5, %v2128_v4 }
 0xbb4   : > { %2143 = vmatpush.bf16.msra.mxu0 %v2137_v17  ;;  %2162 = vmatpush.bf16.msra.mxu1 %v2138_v12 }
 0xbb8   : > { %2144 = vmatpush.bf16.msra.mxu0 %v2135_v21  ;;  %2163 = vmatpush.bf16.msra.mxu1 %v2136_v38 }
 0xbbc   : > { %2145 = vmatpush.bf16.msra.mxu0 %v2133_v3  ;;  %2164 = vmatpush.bf16.msra.mxu1 %v2134_v25  ;;  %v3327_v3 = vld [vmem:[%s3712_s17 + $0xe0] sm:$0xff]  ;;  %v3326_v25 = vld [vmem:[%s3712_s17 + $0xa8] sm:$0xff] }
 0xbc0   : > { %2146 = vmatpush.bf16.msra.mxu0 %v2131_v32  ;;  %2165 = vmatpush.bf16.msra.mxu1 %v2132_v34 }
 0xbc3   : > { %3307 = vmatmul.msk.bf16.vlgmr.msra.gmra.mxu0 %vm484_vm1, %v3996_v44  ;;  %3309 = vmatmul.msk.bf16.vlgmr.msra.gmra.mxu1 %vm484_vm1, %v3996_v44 }
 0xbd3   : > { %3308 = vmatmul.msk.bf16.gmra.mxu0 %vm484_vm1, %v4005_v45  ;;  %3310 = vmatmul.msk.bf16.gmra.mxu1 %vm484_vm1, %v4005_v45 }
 0xbf8   : > { %v1981_v28 = vpop.f32.mrf.mxu0  ;;  %v2000_v33 = vpop.f32.mrf.mxu1 }
 0xbf9   : > { %v2010_v35 = vpack.c.bf16 %v2000_v33, %v1981_v28  ;;  %v2019_v41 = vadd.f32 %v2000_v33, %v1981_v28  ;;  %v2359_v33 = vpack.c.bf16 %v3327_v3, %v3325_v18 }
 0xbfb   : > { %3291 = vst [vmem:[%s3859_s22 + $0x80] sm:$0xff] %v2010_v35  ;;  %2020 = vadd.xlane.f32.xlu1 %v2019_v41  ;;  %v2360_v41 = vpack.c.bf16 %v3328_v26, %v3326_v25 }
 0xc00   : > { %v1983_v42 = vpop.f32.mrf.mxu0  ;;  %v2002_v43 = vpop.f32.mrf.mxu1 }
 0xc01   : > { %v2011_v46 = vpack.c.bf16 %v2002_v43, %v1983_v42  ;;  %v2022_v6 = vadd.f32 %v2002_v43, %v1983_v42  ;;  %v4194_v42 = vld [vmem:[%s4417_s1] sm:$0xff]  ;;  %v4221_v43 = vld [vmem:[%s4417_s1 + $0x18] sm:$0xff] }
 0xc03   : > { %3292 = vst [vmem:[%s3859_s22 + $0xa0] sm:$0xff] %v2011_v46  ;;  %2023 = vadd.xlane.f32.xlu2 %v2022_v6 }
 0xc08   : > { %v1986_v44 = vpop.f32.mrf.mxu0  ;;  %v2005_v47 = vpop.f32.mrf.mxu1 }
 0xc09   : > { %v2012_v48 = vpack.c.bf16 %v2005_v47, %v1986_v44  ;;  %v2025_v49 = vadd.f32 %v2005_v47, %v1986_v44 }
 0xc0b   : > { %3293 = vst [vmem:[%s3859_s22 + $0xc0] sm:$0xff] %v2012_v48  ;;  %2026 = vadd.xlane.f32.xlu0 %v2025_v49 }
 0xc10   : > { %v1988_v45 = vpop.f32.mrf.mxu0  ;;  %v2007_v50 = vpop.f32.mrf.mxu1 }
 0xc11   : > { %v2013_v51 = vpack.c.bf16 %v2007_v50, %v1988_v45  ;;  %v2028_v53 = vadd.f32 %v2007_v50, %v1988_v45 }
 0xc13   : > { %3294 = vst [vmem:[%s3859_s22 + $0xe0] sm:$0xff] %v2013_v51  ;;  %2029 = vadd.xlane.f32.xlu1 %v2028_v53 }
 0xc40   : > { %v2148_v54 = vpop.f32.mrf.mxu0  ;;  %v2167_v55 = vpop.f32.mrf.mxu1 }
 0xc41   : > { %v2177_v5 = vmul.f32 0.2, %v2148_v54  ;;  %v2178_v17 = vmul.f32 0.2, %v2167_v55 }
 0xc43   : > { %v2185_v16 = vmax.f32 %v2148_v54, %v2177_v5  ;;  %v2186_v36 = vmax.f32 %v2167_v55, %v2178_v17 }
 0xc48   : > { %v2150_v56 = vpop.f32.mrf.mxu0  ;;  %v2169_v8 = vpop.f32.mrf.mxu1 }
 0xc49   : > { %v2179_v63 = vmul.f32 0.2, %v2150_v56  ;;  %v2180_v1 = vmul.f32 0.2, %v2169_v8 }
 0xc4b   : > { %v2187_v12 = vmax.f32 %v2150_v56, %v2179_v63  ;;  %v2188_v15 = vmax.f32 %v2169_v8, %v2180_v1 }
 0xc4d   : > { %v2193_v19 = vpack.c.bf16 %v2187_v12, %v2185_v16  ;;  %v2194_v21 = vpack.c.bf16 %v2188_v15, %v2186_v36 }
 0xc50   : > { %v2153_v59 = vpop.f32.mrf.mxu0  ;;  %v2172_v60 = vpop.f32.mrf.mxu1 }
 0xc51   : > { %v2181_v61 = vmul.f32 0.2, %v2153_v59  ;;  %v2182_v31 = vmul.f32 0.2, %v2172_v60 }
 0xc53   : > { %v2189_v10 = vmax.f32 %v2153_v59, %v2181_v61  ;;  %v2190_v37 = vmax.f32 %v2172_v60, %v2182_v31 }
 0xc58   : > { %v2155_v62 = vpop.f32.mrf.mxu0  ;;  %v2174_v0 = vpop.f32.mrf.mxu1 }
 0xc59   : > { %v2183_v9 = vmul.f32 0.2, %v2155_v62  ;;  %v2184_v4 = vmul.f32 0.2, %v2174_v0 }
 0xc5b   : > { %v2191_v11 = vmax.f32 %v2155_v62, %v2183_v9  ;;  %v2192_v14 = vmax.f32 %v2174_v0, %v2184_v4 }
 0xc5d   : > { %v2195_v13 = vpack.c.bf16 %v2191_v11, %v2189_v10  ;;  %v2196_v57 = vpack.c.bf16 %v2192_v14, %v2190_v37 }
 0xc5f   : > { %2203 = vmatpush.bf16.msrb.mxu0 %v2195_v13  ;;  %2217 = vmatpush.bf16.msrb.mxu1 %v2196_v57 }
 0xc63   : > { %2204 = vmatpush.bf16.msrb.mxu0 %v2193_v19  ;;  %2218 = vmatpush.bf16.msrb.mxu1 %v2194_v21 }
 0xc66   : > { %3311 = vmatmul.msk.bf16.vlgmr.msrb.gmra.mxu0 %vm554_vm2, %v4018_v29  ;;  %3312 = vmatmul.msk.bf16.vlgmr.msrb.gmra.mxu1 %vm554_vm2, %v4018_v29 }
 0xce3   : > { %v2206_v22 = vpop.f32.mrf.mxu0  ;;  %v2220_v58 = vpop.f32.mrf.mxu1 }
 0xce4   : > { %v2225_v38 = vmul.f32 0.2, %v2206_v22  ;;  %v2226_v39 = vmul.f32 0.2, %v2220_v58 }
 0xce6   : > { %v2229_v27 = vmax.f32 %v2206_v22, %v2225_v38  ;;  %v2230_v34 = vmax.f32 %v2220_v58, %v2226_v39 }
 0xceb   : > { %v2208_v40 = vpop.f32.mrf.mxu0  ;;  %v2222_v2 = vpop.f32.mrf.mxu1 }
 0xcec   : > { %v2227_v20 = vmul.f32 0.2, %v2208_v40  ;;  %v2228_v24 = vmul.f32 0.2, %v2222_v2 }
 0xcee   : > { %v2231_v32 = vmax.f32 %v2208_v40, %v2227_v20  ;;  %v2232_v28 = vmax.f32 %v2222_v2, %v2228_v24 }
 0xcf0   : > { %v2233_v35 = vpack.c.bf16 %v2231_v32, %v2229_v27  ;;  %v2234_v29 = vpack.c.bf16 %v2232_v28, %v2230_v34 }
 0xcf2   : > { %2242 = vmatpush.bf16.msra.mxu0 %v2233_v35  ;;  %2261 = vmatpush.bf16.msra.mxu1 %v2234_v29 }
 0xcf5   : > { %3313 = vmatmul.msk.bf16.vlgmr.msra.gmra.mxu0 %vm363_vm0, %v4031_v7  ;;  %3315 = vmatmul.msk.bf16.vlgmr.msra.gmra.mxu1 %vm363_vm0, %v4031_v7  ;;  %v4203_v7 = vld [vmem:[%s4417_s1 + $0x8] sm:$0xff] }
 0xcf6   : > { %2368 = vmatpush.bf16.msrb.mxu0 %v2359_v33  ;;  %2397 = vmatpush.bf16.msrb.mxu1 %v2360_v41 }
 0xd05   : > { %3314 = vmatmul.msk.bf16.gmra.mxu0 %vm363_vm0, %v4040_v52  ;;  %3316 = vmatmul.msk.bf16.gmra.mxu1 %vm363_vm0, %v4040_v52  ;;  %v4212_v52 = vld [vmem:[%s4417_s1 + $0x10] sm:$0xff] }
 0xd15   : > { %3329 = vmatmul.msk.bf16.vlgmr.msrb.gmra.mxu0 %vm363_vm0, %v4194_v42  ;;  %3333 = vmatmul.msk.bf16.vlgmr.msrb.gmra.mxu1 %vm363_vm0, %v4194_v42 }
 0xd25   : > { %3330 = vmatmul.msk.bf16.gmra.mxu0 %vm363_vm0, %v4203_v7  ;;  %3334 = vmatmul.msk.bf16.gmra.mxu1 %vm363_vm0, %v4203_v7 }
 0xd35   : > { %3331 = vmatmul.msk.bf16.gmra.mxu0 %vm363_vm0, %v4212_v52  ;;  %3335 = vmatmul.msk.bf16.gmra.mxu1 %vm363_vm0, %v4212_v52 }
 0xd45   : > { %3332 = vmatmul.msk.bf16.gmra.mxu0 %vm363_vm0, %v4221_v43  ;;  %3336 = vmatmul.msk.bf16.gmra.mxu1 %vm363_vm0, %v4221_v43 }
 0xd72   : > { %v2244_v46 = vpop.f32.mrf.mxu0  ;;  %v2263_v6 = vpop.f32.mrf.mxu1 }
 0xd73   : > { %v2273_v59 = vmul.f32 0.2, %v2244_v46  ;;  %v2274_v31 = vmul.f32 0.2, %v2263_v6 }
 0xd75   : > { %v2281_v5 = vmax.f32 %v2244_v46, %v2273_v59  ;;  %v2282_v10 = vmax.f32 %v2263_v6, %v2274_v31 }
 0xd7a   : > { %v2246_v44 = vpop.f32.mrf.mxu0  ;;  %v2265_v47 = vpop.f32.mrf.mxu1 }
 0xd7b   : > { %v2275_v53 = vmul.f32 0.2, %v2246_v44  ;;  %v2276_v56 = vmul.f32 0.2, %v2265_v47 }
 0xd7d   : > { %v2283_v9 = vmax.f32 %v2246_v44, %v2275_v53  ;;  %v2284_v1 = vmax.f32 %v2265_v47, %v2276_v56 }
 0xd7f   : > { %v2289_v37 = vpack.c.bf16 %v2283_v9, %v2281_v5  ;;  %v2290_v14 = vpack.c.bf16 %v2284_v1, %v2282_v10  ;;  %v4246_v5 = vld [vmem:[%s4418_s2] sm:$0xff]  ;;  %v4255_v10 = vld [vmem:[%s4418_s2 + $0x8] sm:$0xff] }
 0xd82   : > { %v2249_v48 = vpop.f32.mrf.mxu0  ;;  %v2268_v49 = vpop.f32.mrf.mxu1 }
 0xd83   : > { %v2277_v45 = vmul.f32 0.2, %v2249_v48  ;;  %v2278_v50 = vmul.f32 0.2, %v2268_v49 }
 0xd85   : > { %v2285_v60 = vmax.f32 %v2249_v48, %v2277_v45  ;;  %v2286_v62 = vmax.f32 %v2268_v49, %v2278_v50 }
 0xd8a   : > { %v2251_v51 = vpop.f32.mrf.mxu0  ;;  %v2270_v55 = vpop.f32.mrf.mxu1 }
 0xd8b   : > { %v2279_v54 = vmul.f32 0.2, %v2251_v51  ;;  %v2280_v8 = vmul.f32 0.2, %v2270_v55 }
 0xd8d   : > { %v2287_v61 = vmax.f32 %v2251_v51, %v2279_v54  ;;  %v2288_v63 = vmax.f32 %v2270_v55, %v2280_v8 }
 0xd8f   : > { %v2291_v0 = vpack.c.bf16 %v2287_v61, %v2285_v60  ;;  %v2292_v4 = vpack.c.bf16 %v2288_v63, %v2286_v62 }
 0xd91   : > { %2299 = vmatpush.bf16.msra.mxu2 %v2291_v0  ;;  %2318 = vmatpush.bf16.msra.mxu3 %v2292_v4 }
 0xd92   : > { %v4227_v11 = vpop.f32.mrf.mxu0  ;;  %v4229_v17 = vpop.f32.mrf.mxu1 }
 0xd93   : > { %v2419_v56 = vmul.f32 0.2, %v4227_v11  ;;  %v2420_v59 = vmul.f32 0.2, %v4229_v17 }
 0xd95   : > { %2300 = vmatpush.bf16.msra.mxu2 %v2289_v37  ;;  %2319 = vmatpush.bf16.msra.mxu3 %v2290_v14  ;;  %v2435_v9 = vmax.f32 %v4227_v11, %v2419_v56  ;;  %v2436_v0 = vmax.f32 %v4229_v17, %v2420_v59 }
 0xd98   : > { %3317 = vmatmul.msk.bf16.vlgmr.msra.gmra.mxu2 %vm554_vm2, %v4069_v23  ;;  %3319 = vmatmul.msk.bf16.vlgmr.msra.gmra.mxu3 %vm554_vm2, %v4069_v23 }
 0xd9a   : > { %v2372_v12 = vpop.f32.mrf.mxu0  ;;  %v2401_v13 = vpop.f32.mrf.mxu1 }
 0xd9b   : > { %v2421_v45 = vmul.f32 0.2, %v2372_v12  ;;  %v2422_v53 = vmul.f32 0.2, %v2401_v13 }
 0xd9d   : > { %v2437_v61 = vmax.f32 %v2372_v12, %v2421_v45  ;;  %v2438_v62 = vmax.f32 %v2401_v13, %v2422_v53 }
 0xd9f   : > { %v2451_v1 = vpack.c.bf16 %v2437_v61, %v2435_v9  ;;  %v2452_v4 = vpack.c.bf16 %v2438_v62, %v2436_v0  ;;  %v3355_v62 = vld [vmem:[%s3712_s17 + $0xb0] sm:$0xff]  ;;  %v3356_v0 = vld [vmem:[%s3712_s17 + $0xb8] sm:$0xff] }
 0xda2   : > { %v2375_v15 = vpop.f32.mrf.mxu0  ;;  %v2404_v57 = vpop.f32.mrf.mxu1 }
 0xda3   : > { %v2423_v44 = vmul.f32 0.2, %v2375_v15  ;;  %v2424_v48 = vmul.f32 0.2, %v2404_v57 }
 0xda5   : > { %v2439_v8 = vmax.f32 %v2375_v15, %v2423_v44  ;;  %v2440_v60 = vmax.f32 %v2404_v57, %v2424_v48 }
 0xda8   : > { %3318 = vmatmul.msk.bf16.gmra.mxu2 %vm554_vm2, %v4078_v30  ;;  %3320 = vmatmul.msk.bf16.gmra.mxu3 %vm554_vm2, %v4078_v30 }
 0xdaa   : > { %v2377_v16 = vpop.f32.mrf.mxu0  ;;  %v2406_v36 = vpop.f32.mrf.mxu1 }
 0xdab   : > { %v2425_v33 = vmul.f32 0.2, %v2377_v16  ;;  %v2426_v29 = vmul.f32 0.2, %v2406_v36 }
 0xdad   : > { %v2441_v50 = vmax.f32 %v2377_v16, %v2425_v33  ;;  %v2442_v54 = vmax.f32 %v2406_v36, %v2426_v29 }
 0xdaf   : > { %v2453_v31 = vpack.c.bf16 %v2441_v50, %v2439_v8  ;;  %v2454_v63 = vpack.c.bf16 %v2442_v54, %v2440_v60  ;;  %v4268_v54 = vld [vmem:[%s4419_s3] sm:$0xff] }
 0xdb2   : > { %v2380_v19 = vpop.f32.mrf.mxu0  ;;  %v2409_v21 = vpop.f32.mrf.mxu1 }
 0xdb3   : > { %v2427_v26 = vmul.f32 0.2, %v2380_v19  ;;  %v2428_v30 = vmul.f32 0.2, %v2409_v21 }
 0xdb5   : > { %v2443_v47 = vmax.f32 %v2380_v19, %v2427_v26  ;;  %v2444_v49 = vmax.f32 %v2409_v21, %v2428_v30 }
 0xdba   : > { %v2382_v22 = vpop.f32.mrf.mxu0  ;;  %v2411_v58 = vpop.f32.mrf.mxu1 }
 0xdbb   : > { %v2429_v2 = vmul.f32 0.2, %v2382_v22  ;;  %v2430_v24 = vmul.f32 0.2, %v2411_v58 }
 0xdbd   : > { %v2445_v35 = vmax.f32 %v2382_v22, %v2429_v2  ;;  %v2446_v46 = vmax.f32 %v2411_v58, %v2430_v24 }
 0xdbf   : > { %v2455_v51 = vpack.c.bf16 %v2445_v35, %v2443_v47  ;;  %v2456_v55 = vpack.c.bf16 %v2446_v46, %v2444_v49 }
 0xdc2   : > { %v2385_v38 = vpop.f32.mrf.mxu0  ;;  %v2414_v39 = vpop.f32.mrf.mxu1 }
 0xdc3   : > { %v2431_v40 = vmul.f32 0.2, %v2385_v38  ;;  %v2432_v23 = vmul.f32 0.2, %v2414_v39 }
 0xdc5   : > { %v2447_v27 = vmax.f32 %v2385_v38, %v2431_v40  ;;  %v2448_v34 = vmax.f32 %v2414_v39, %v2432_v23 }
 0xdca   : > { %v2387_v20 = vpop.f32.mrf.mxu0  ;;  %v2416_v3 = vpop.f32.mrf.mxu1 }
 0xdcb   : > { %v2433_v18 = vmul.f32 0.2, %v2387_v20  ;;  %v2434_v25 = vmul.f32 0.2, %v2416_v3 }
 0xdcd   : > { %v2449_v32 = vmax.f32 %v2387_v20, %v2433_v18  ;;  %v2450_v28 = vmax.f32 %v2416_v3, %v2434_v25 }
 0xdcf   : > { %v2457_v41 = vpack.c.bf16 %v2449_v32, %v2447_v27  ;;  %v2458_v6 = vpack.c.bf16 %v2450_v28, %v2448_v34 }
 0xdd1   : > { %2463 = vmatpush.bf16.msrb.mxu2 %v2457_v41  ;;  %2482 = vmatpush.bf16.msrb.mxu3 %v2458_v6 }
 0xdd5   : > { %2464 = vmatpush.bf16.msrb.mxu2 %v2455_v51  ;;  %2483 = vmatpush.bf16.msrb.mxu3 %v2456_v55 }
 0xdd9   : > { %2465 = vmatpush.bf16.msrb.mxu2 %v2453_v31  ;;  %2484 = vmatpush.bf16.msrb.mxu3 %v2454_v63  ;;  %v3357_v63 = vld [vmem:[%s3712_s17 + $0xf0] sm:$0xff] }
 0xddd   : > { %2466 = vmatpush.bf16.msrb.mxu2 %v2451_v1  ;;  %2485 = vmatpush.bf16.msrb.mxu3 %v2452_v4  ;;  %v3358_v1 = vld [vmem:[%s3712_s17 + $0xf8] sm:$0xff]  ;;  %s3522_s17 = sshra.s32 %s3021_s18, 4  ;;  %s3523_s17 = int_to_ptr.hbm [resolvable:$true] %s3522_s17 }
 0xdde   : > { %s3524_s11 = scalar_lea.hbm %s3523_s17, 256  ;;  %p3529_p4 = scmp.lt.s32.totalorder %s3523_s17, %s4422_s6 }
 0xddf   : > { %p3525_p13 = scmp.ne.s32.totalorder %s3523_s17, %s3524_s11  ;;  %p3530_p5 = scmp.lt.s32.totalorder %s3528_s20, %s3524_s11 }
 0xde0   : > { %3337 = vmatmul.msk.bf16.vlgmr.msrb.gmra.mxu2 %vm484_vm1, %v4246_v5  ;;  %3339 = vmatmul.msk.bf16.vlgmr.msrb.gmra.mxu3 %vm484_vm1, %v4246_v5 }
 0xde1   : > { %p3526_p0 = pnand %p3525_p13, %p3672_p11  ;;  %p3531_p7 = por %p3530_p5, %p3529_p4 }
 0xde3   : > { %p3527_p3 = pneg %p3526_p0 }
 0xde5   : > { %p3532_p8 = pnand %p3531_p7, %p3527_p3 }
 0xdf0   : > { %3338 = vmatmul.msk.bf16.gmra.mxu2 %vm484_vm1, %v4255_v10  ;;  %3340 = vmatmul.msk.bf16.gmra.mxu3 %vm484_vm1, %v4255_v10 }
 0xe1b   : > { %v2302_v11 = vpop.f32.mrf.mxu2  ;;  %v2321_v17 = vpop.f32.mrf.mxu3 }
 0xe1c   : > { %v2331_v37 = vpack.c.bf16 %v2321_v17, %v2302_v11  ;;  %v2339_v14 = vadd.f32 %v2321_v17, %v2302_v11 }
 0xe1e   : > { %3321 = vst [vmem:[%s3859_s22 + $0x88] sm:$0xff] %v2331_v37  ;;  %2340 = vadd.xlane.f32.xlu2 %v2339_v14  ;;  %v2679_v14 = vpack.c.bf16 %v3357_v63, %v3355_v62 }
 0xe23   : > { %v2304_v12 = vpop.f32.mrf.mxu2  ;;  %v2323_v13 = vpop.f32.mrf.mxu3 }
 0xe24   : > { %v2332_v15 = vpack.c.bf16 %v2323_v13, %v2304_v12  ;;  %v2342_v57 = vadd.f32 %v2323_v13, %v2304_v12  ;;  %v2680_v13 = vpack.c.bf16 %v3358_v1, %v3356_v0 }
 0xe26   : > { %3322 = vst [vmem:[%s3859_s22 + $0xa8] sm:$0xff] %v2332_v15  ;;  %2343 = vadd.xlane.f32.xlu0 %v2342_v57  ;;  %v4281_v57 = vld [vmem:[%s4420_s4] sm:$0xff] }
 0xe2b   : > { %v2307_v16 = vpop.f32.mrf.mxu2  ;;  %v2326_v36 = vpop.f32.mrf.mxu3 }
 0xe2c   : > { %v2333_v19 = vpack.c.bf16 %v2326_v36, %v2307_v16  ;;  %v2345_v21 = vadd.f32 %v2326_v36, %v2307_v16  ;;  %v4290_v16 = vld [vmem:[%s4420_s4 + $0x8] sm:$0xff] }
 0xe2e   : > { %3323 = vst [vmem:[%s3859_s22 + $0xc8] sm:$0xff] %v2333_v19  ;;  %2346 = vadd.xlane.f32.xlu1 %v2345_v21 }
 0xe33   : > { %v2309_v22 = vpop.f32.mrf.mxu2  ;;  %v2328_v58 = vpop.f32.mrf.mxu3 }
 0xe34   : > { %v2334_v38 = vpack.c.bf16 %v2328_v58, %v2309_v22  ;;  %v2348_v39 = vadd.f32 %v2328_v58, %v2309_v22 }
 0xe36   : > { %3324 = vst [vmem:[%s3859_s22 + $0xe8] sm:$0xff] %v2334_v38  ;;  %2349 = vadd.xlane.f32.xlu2 %v2348_v39 }
 0xe63   : > { %v2468_v40 = vpop.f32.mrf.mxu2  ;;  %v2487_v23 = vpop.f32.mrf.mxu3 }
 0xe64   : > { %v2497_v33 = vmul.f32 0.2, %v2468_v40  ;;  %v2498_v29 = vmul.f32 0.2, %v2487_v23 }
 0xe66   : > { %v2505_v45 = vmax.f32 %v2468_v40, %v2497_v33  ;;  %v2506_v50 = vmax.f32 %v2487_v23, %v2498_v29 }
 0xe6b   : > { %v2470_v20 = vpop.f32.mrf.mxu2  ;;  %v2489_v2 = vpop.f32.mrf.mxu3 }
 0xe6c   : > { %v2499_v27 = vmul.f32 0.2, %v2470_v20  ;;  %v2500_v34 = vmul.f32 0.2, %v2489_v2 }
 0xe6e   : > { %v2507_v44 = vmax.f32 %v2470_v20, %v2499_v27  ;;  %v2508_v48 = vmax.f32 %v2489_v2, %v2500_v34 }
 0xe70   : > { %v2513_v51 = vpack.c.bf16 %v2507_v44, %v2505_v45  ;;  %v2514_v53 = vpack.c.bf16 %v2508_v48, %v2506_v50  ;;  %v4328_v45 = vld [vmem:[%s4421_s5 + $0x8] sm:$0xff] }
 0xe73   : > { %v2473_v18 = vpop.f32.mrf.mxu2  ;;  %v2492_v3 = vpop.f32.mrf.mxu3 }
 0xe74   : > { %v2501_v24 = vmul.f32 0.2, %v2473_v18  ;;  %v2502_v25 = vmul.f32 0.2, %v2492_v3 }
 0xe76   : > { %v2509_v35 = vmax.f32 %v2473_v18, %v2501_v24  ;;  %v2510_v46 = vmax.f32 %v2492_v3, %v2502_v25 }
 0xe7b   : > { %v2475_v26 = vpop.f32.mrf.mxu2  ;;  %v2494_v30 = vpop.f32.mrf.mxu3 }
 0xe7c   : > { %v2503_v32 = vmul.f32 0.2, %v2475_v26  ;;  %v2504_v28 = vmul.f32 0.2, %v2494_v30 }
 0xe7e   : > { %v2511_v41 = vmax.f32 %v2475_v26, %v2503_v32  ;;  %v2512_v6 = vmax.f32 %v2494_v30, %v2504_v28 }
 0xe80   : > { %v2515_v47 = vpack.c.bf16 %v2511_v41, %v2509_v35  ;;  %v2516_v49 = vpack.c.bf16 %v2512_v6, %v2510_v46  ;;  %v4319_v6 = vld [vmem:[%s4421_s5] sm:$0xff] }
 0xe82   : > { %2523 = vmatpush.bf16.msra.mxu2 %v2515_v47  ;;  %2537 = vmatpush.bf16.msra.mxu3 %v2516_v49 }
 0xe86   : > { %2524 = vmatpush.bf16.msra.mxu2 %v2513_v51  ;;  %2538 = vmatpush.bf16.msra.mxu3 %v2514_v53 }
 0xe89   : > { %3341 = vmatmul.msk.bf16.vlgmr.msra.gmra.mxu2 %vm554_vm2, %v4268_v54  ;;  %3342 = vmatmul.msk.bf16.vlgmr.msra.gmra.mxu3 %vm554_vm2, %v4268_v54 }
 0xf0c   : > { %v2526_v55 = vpop.f32.mrf.mxu2  ;;  %v2540_v56 = vpop.f32.mrf.mxu3 }
 0xf0d   : > { %v2545_v8 = vmul.f32 0.2, %v2526_v55  ;;  %v2546_v59 = vmul.f32 0.2, %v2540_v56 }
 0xf0f   : > { %v2549_v4 = vmax.f32 %v2526_v55, %v2545_v8  ;;  %v2550_v17 = vmax.f32 %v2540_v56, %v2546_v59 }
 0xf14   : > { %v2528_v60 = vpop.f32.mrf.mxu2  ;;  %v2542_v31 = vpop.f32.mrf.mxu3 }
 0xf15   : > { %v2547_v61 = vmul.f32 0.2, %v2528_v60  ;;  %v2548_v9 = vmul.f32 0.2, %v2542_v31 }
 0xf17   : > { %v2551_v11 = vmax.f32 %v2528_v60, %v2547_v61  ;;  %v2552_v37 = vmax.f32 %v2542_v31, %v2548_v9 }
 0xf19   : > { %v2553_v12 = vpack.c.bf16 %v2551_v11, %v2549_v4  ;;  %v2554_v15 = vpack.c.bf16 %v2552_v37, %v2550_v17 }
 0xf1b   : > { %2562 = vmatpush.bf16.msrb.mxu2 %v2553_v12  ;;  %2581 = vmatpush.bf16.msrb.mxu3 %v2554_v15 }
 0xf1e   : > { %3343 = vmatmul.msk.bf16.vlgmr.msrb.gmra.mxu2 %vm363_vm0, %v4281_v57  ;;  %3345 = vmatmul.msk.bf16.vlgmr.msrb.gmra.mxu3 %vm363_vm0, %v4281_v57 }
 0xf1f   : > { %2688 = vmatpush.bf16.msra.mxu2 %v2679_v14  ;;  %2717 = vmatpush.bf16.msra.mxu3 %v2680_v13 }
 0xf2e   : > { %3344 = vmatmul.msk.bf16.gmra.mxu2 %vm363_vm0, %v4290_v16  ;;  %3346 = vmatmul.msk.bf16.gmra.mxu3 %vm363_vm0, %v4290_v16 }
 0xf3e   : > { %3359 = vmatmul.msk.bf16.vlgmr.msra.gmra.mxu2 %vm363_vm0, %v4194_v42  ;;  %3363 = vmatmul.msk.bf16.vlgmr.msra.gmra.mxu3 %vm363_vm0, %v4194_v42 }
 0xf4e   : > { %3360 = vmatmul.msk.bf16.gmra.mxu2 %vm363_vm0, %v4203_v7  ;;  %3364 = vmatmul.msk.bf16.gmra.mxu3 %vm363_vm0, %v4203_v7 }
 0xf5e   : > { %3361 = vmatmul.msk.bf16.gmra.mxu2 %vm363_vm0, %v4212_v52  ;;  %3365 = vmatmul.msk.bf16.gmra.mxu3 %vm363_vm0, %v4212_v52 }
 0xf6e   : > { %3362 = vmatmul.msk.bf16.gmra.mxu2 %vm363_vm0, %v4221_v43  ;;  %3366 = vmatmul.msk.bf16.gmra.mxu3 %vm363_vm0, %v4221_v43 }
 0xfa1   : > { %v2564_v36 = vpop.f32.mrf.mxu2  ;;  %v2583_v42 = vpop.f32.mrf.mxu3 }
 0xfa2   : > { %v2593_v18 = vmul.f32 0.2, %v2564_v36  ;;  %v2594_v25 = vmul.f32 0.2, %v2583_v42 }
 0xfa4   : > { %v2601_v28 = vmax.f32 %v2564_v36, %v2593_v18  ;;  %v2602_v33 = vmax.f32 %v2583_v42, %v2594_v25 }
 0xfa9   : > { %v2566_v19 = vpop.f32.mrf.mxu2  ;;  %v2585_v21 = vpop.f32.mrf.mxu3 }
 0xfaa   : > { %v2595_v40 = vmul.f32 0.2, %v2566_v19  ;;  %v2596_v2 = vmul.f32 0.2, %v2585_v21 }
 0xfac   : > { %v2603_v27 = vmax.f32 %v2566_v19, %v2595_v40  ;;  %v2604_v30 = vmax.f32 %v2585_v21, %v2596_v2 }
 0xfae   : > { %v2609_v41 = vpack.c.bf16 %v2603_v27, %v2601_v28  ;;  %v2610_v46 = vpack.c.bf16 %v2604_v30, %v2602_v33 }
 0xfb1   : > { %v2569_v22 = vpop.f32.mrf.mxu2  ;;  %v2588_v58 = vpop.f32.mrf.mxu3 }
 0xfb2   : > { %v2597_v38 = vmul.f32 0.2, %v2569_v22  ;;  %v2598_v7 = vmul.f32 0.2, %v2588_v58 }
 0xfb4   : > { %v2605_v3 = vmax.f32 %v2569_v22, %v2597_v38  ;;  %v2606_v26 = vmax.f32 %v2588_v58, %v2598_v7 }
 0xfb9   : > { %v2571_v39 = vpop.f32.mrf.mxu2  ;;  %v2590_v20 = vpop.f32.mrf.mxu3 }
 0xfba   : > { %v2599_v23 = vmul.f32 0.2, %v2571_v39  ;;  %v2600_v52 = vmul.f32 0.2, %v2590_v20 }
 0xfbc   : > { %v2607_v24 = vmax.f32 %v2571_v39, %v2599_v23  ;;  %v2608_v43 = vmax.f32 %v2590_v20, %v2600_v52 }
 0xfbe   : > { %v2611_v32 = vpack.c.bf16 %v2607_v24, %v2605_v3  ;;  %v2612_v34 = vpack.c.bf16 %v2608_v43, %v2606_v26 }
 0xfc0   : > { %2619 = vmatpush.bf16.msra.mxu0 %v2611_v32  ;;  %2638 = vmatpush.bf16.msra.mxu1 %v2612_v34 }
 0xfc1   : > { %v4312_v35 = vpop.f32.mrf.mxu2  ;;  %v4314_v29 = vpop.f32.mrf.mxu3 }
 0xfc2   : > { %v2739_v3 = vmul.f32 0.2, %v4312_v35  ;;  %v2740_v25 = vmul.f32 0.2, %v4314_v29 }
 0xfc4   : > { %2620 = vmatpush.bf16.msra.mxu0 %v2609_v41  ;;  %2639 = vmatpush.bf16.msra.mxu1 %v2610_v46  ;;  %v2755_v34 = vmax.f32 %v4312_v35, %v2739_v3  ;;  %v2756_v28 = vmax.f32 %v4314_v29, %v2740_v25 }
 0xfc7   : > { %3347 = vmatmul.msk.bf16.vlgmr.msra.gmra.mxu0 %vm554_vm2, %v4319_v6  ;;  %3349 = vmatmul.msk.bf16.vlgmr.msra.gmra.mxu1 %vm554_vm2, %v4319_v6 }
 0xfc9   : > { %v2692_v44 = vpop.f32.mrf.mxu2  ;;  %v2721_v47 = vpop.f32.mrf.mxu3 }
 0xfca   : > { %v2741_v40 = vmul.f32 0.2, %v2692_v44  ;;  %v2742_v2 = vmul.f32 0.2, %v2721_v47 }
 0xfcc   : > { %v2757_v43 = vmax.f32 %v2692_v44, %v2741_v40  ;;  %v2758_v32 = vmax.f32 %v2721_v47, %v2742_v2 }
 0xfce   : > { %v2771_v33 = vpack.c.bf16 %v2757_v43, %v2755_v34  ;;  %v2772_v41 = vpack.c.bf16 %v2758_v32, %v2756_v28 }
 0xfd1   : > { %v2695_v48 = vpop.f32.mrf.mxu2  ;;  %v2724_v49 = vpop.f32.mrf.mxu3 }
 0xfd2   : > { %v2743_v58 = vmul.f32 0.2, %v2695_v48  ;;  %v2744_v7 = vmul.f32 0.2, %v2724_v49 }
 0xfd4   : > { %v2759_v24 = vmax.f32 %v2695_v48, %v2743_v58  ;;  %v2760_v26 = vmax.f32 %v2724_v49, %v2744_v7 }
 0xfd7   : > { %3348 = vmatmul.msk.bf16.gmra.mxu0 %vm554_vm2, %v4328_v45  ;;  %3350 = vmatmul.msk.bf16.gmra.mxu1 %vm554_vm2, %v4328_v45 }
 0xfd9   : > { %v2697_v50 = vpop.f32.mrf.mxu2  ;;  %v2726_v51 = vpop.f32.mrf.mxu3 }
 0xfda   : > { %v2745_v15 = vmul.f32 0.2, %v2697_v50  ;;  %v2746_v19 = vmul.f32 0.2, %v2726_v51 }
 0xfdc   : > { %v2761_v23 = vmax.f32 %v2697_v50, %v2745_v15  ;;  %v2762_v52 = vmax.f32 %v2726_v51, %v2746_v19 }
 0xfde   : > { %v2773_v27 = vpack.c.bf16 %v2761_v23, %v2759_v24  ;;  %v2774_v30 = vpack.c.bf16 %v2762_v52, %v2760_v26 }
 0xfe1   : > { %v2700_v53 = vpop.f32.mrf.mxu2  ;;  %v2729_v55 = vpop.f32.mrf.mxu3 }
 0xfe2   : > { %v2747_v11 = vmul.f32 0.2, %v2700_v53  ;;  %v2748_v14 = vmul.f32 0.2, %v2729_v55 }
 0xfe4   : > { %v2763_v38 = vmax.f32 %v2700_v53, %v2747_v11  ;;  %v2764_v39 = vmax.f32 %v2729_v55, %v2748_v14 }
 0xfe9   : > { %v2702_v56 = vpop.f32.mrf.mxu2  ;;  %v2731_v8 = vpop.f32.mrf.mxu3 }
 0xfea   : > { %v2749_v63 = vmul.f32 0.2, %v2702_v56  ;;  %v2750_v1 = vmul.f32 0.2, %v2731_v8 }
 0xfec   : > { %v2765_v36 = vmax.f32 %v2702_v56, %v2749_v63  ;;  %v2766_v21 = vmax.f32 %v2731_v8, %v2750_v1 }
 0xfee   : > { %v2775_v20 = vpack.c.bf16 %v2765_v36, %v2763_v38  ;;  %v2776_v18 = vpack.c.bf16 %v2766_v21, %v2764_v39 }
 0xff1   : > { %v2705_v59 = vpop.f32.mrf.mxu2  ;;  %v2734_v60 = vpop.f32.mrf.mxu3 }
 0xff2   : > { %v2751_v61 = vmul.f32 0.2, %v2705_v59  ;;  %v2752_v31 = vmul.f32 0.2, %v2734_v60 }
 0xff4   : > { %v2767_v17 = vmax.f32 %v2705_v59, %v2751_v61  ;;  %v2768_v12 = vmax.f32 %v2734_v60, %v2752_v31 }
 0xff9   : > { %v2707_v62 = vpop.f32.mrf.mxu2  ;;  %v2736_v0 = vpop.f32.mrf.mxu3 }
 0xffa   : > { %v2753_v9 = vmul.f32 0.2, %v2707_v62  ;;  %v2754_v4 = vmul.f32 0.2, %v2736_v0 }
 0xffc   : > { %v2769_v37 = vmax.f32 %v2707_v62, %v2753_v9  ;;  %v2770_v13 = vmax.f32 %v2736_v0, %v2754_v4 }
 0xffe   : > { %v2777_v42 = vpack.c.bf16 %v2769_v37, %v2767_v17  ;;  %v2778_v22 = vpack.c.bf16 %v2770_v13, %v2768_v12 }
0x1000   : > { %2783 = vmatpush.bf16.msrb.mxu0 %v2777_v42  ;;  %2802 = vmatpush.bf16.msrb.mxu1 %v2778_v22 }
0x1004   : > { %2784 = vmatpush.bf16.msrb.mxu0 %v2775_v20  ;;  %2803 = vmatpush.bf16.msrb.mxu1 %v2776_v18 }
0x1008   : > { %2785 = vmatpush.bf16.msrb.mxu0 %v2773_v27  ;;  %2804 = vmatpush.bf16.msrb.mxu1 %v2774_v30 }
0x100c   : > { %2786 = vmatpush.bf16.msrb.mxu0 %v2771_v33  ;;  %2805 = vmatpush.bf16.msrb.mxu1 %v2772_v41 }
0x100f   : > { %3367 = vmatmul.msk.bf16.vlgmr.msrb.gmra.mxu0 %vm484_vm1, %v4246_v5  ;;  %3369 = vmatmul.msk.bf16.vlgmr.msrb.gmra.mxu1 %vm484_vm1, %v4246_v5 }
0x101f   : > { %3368 = vmatmul.msk.bf16.gmra.mxu0 %vm484_vm1, %v4255_v10  ;;  %3370 = vmatmul.msk.bf16.gmra.mxu1 %vm484_vm1, %v4255_v10 }
0x1044   : > { %v2622_v35 = vpop.f32.mrf.mxu0  ;;  %v2641_v29 = vpop.f32.mrf.mxu1 }
0x1045   : > { %v2651_v46 = vpack.c.bf16 %v2641_v29, %v2622_v35  ;;  %v2659_v44 = vadd.f32 %v2641_v29, %v2622_v35 }
0x1047   : > { %3351 = vst [vmem:[%s3859_s22 + $0x90] sm:$0xff] %v2651_v46  ;;  %2660 = vadd.xlane.f32.xlu0 %v2659_v44 }
0x104c   : > { %v2624_v47 = vpop.f32.mrf.mxu0  ;;  %v2643_v48 = vpop.f32.mrf.mxu1 }
0x104d   : > { %v2652_v49 = vpack.c.bf16 %v2643_v48, %v2624_v47  ;;  %v2662_v50 = vadd.f32 %v2643_v48, %v2624_v47 }
0x104f   : > { %3352 = vst [vmem:[%s3859_s22 + $0xb0] sm:$0xff] %v2652_v49  ;;  %2663 = vadd.xlane.f32.xlu1 %v2662_v50 }
0x1054   : > { %v2627_v5 = vpop.f32.mrf.mxu0  ;;  %v2646_v51 = vpop.f32.mrf.mxu1 }
0x1055   : > { %v2653_v53 = vpack.c.bf16 %v2646_v51, %v2627_v5  ;;  %v2665_v55 = vadd.f32 %v2646_v51, %v2627_v5 }
0x1057   : > { %3353 = vst [vmem:[%s3859_s22 + $0xd0] sm:$0xff] %v2653_v53  ;;  %2666 = vadd.xlane.f32.xlu2 %v2665_v55 }
0x105c   : > { %v2629_v10 = vpop.f32.mrf.mxu0  ;;  %v2648_v56 = vpop.f32.mrf.mxu1 }
0x105d   : > { %v2654_v8 = vpack.c.bf16 %v2648_v56, %v2629_v10  ;;  %v2668_v59 = vadd.f32 %v2648_v56, %v2629_v10 }
0x105f   : > { %3354 = vst [vmem:[%s3859_s22 + $0xf0] sm:$0xff] %v2654_v8  ;;  %2669 = vadd.xlane.f32.xlu0 %v2668_v59 }
0x108c   : > { %v2788_v60 = vpop.f32.mrf.mxu0  ;;  %v2807_v61 = vpop.f32.mrf.mxu1 }
0x108d   : > { %v2817_v13 = vmul.f32 0.2, %v2788_v60  ;;  %v2818_v42 = vmul.f32 0.2, %v2807_v61 }
0x108f   : > { %v2825_v39 = vmax.f32 %v2788_v60, %v2817_v13  ;;  %v2826_v40 = vmax.f32 %v2807_v61, %v2818_v42 }
0x1094   : > { %v2790_v31 = vpop.f32.mrf.mxu0  ;;  %v2809_v62 = vpop.f32.mrf.mxu1 }
0x1095   : > { %v2819_v11 = vmul.f32 0.2, %v2790_v31  ;;  %v2820_v14 = vmul.f32 0.2, %v2809_v62 }
0x1097   : > { %v2827_v22 = vmax.f32 %v2790_v31, %v2819_v11  ;;  %v2828_v38 = vmax.f32 %v2809_v62, %v2820_v14 }
0x1099   : > { %v2833_v23 = vpack.c.bf16 %v2827_v22, %v2825_v39  ;;  %v2834_v20 = vpack.c.bf16 %v2828_v38, %v2826_v40 }
0x109c   : > { %v2793_v63 = vpop.f32.mrf.mxu0  ;;  %v2812_v9 = vpop.f32.mrf.mxu1 }
0x109d   : > { %v2821_v0 = vmul.f32 0.2, %v2793_v63  ;;  %v2822_v1 = vmul.f32 0.2, %v2812_v9 }
0x109f   : > { %v2829_v15 = vmax.f32 %v2793_v63, %v2821_v0  ;;  %v2830_v19 = vmax.f32 %v2812_v9, %v2822_v1 }
0x10a4   : > { %v2795_v4 = vpop.f32.mrf.mxu0  ;;  %v2814_v37 = vpop.f32.mrf.mxu1 }
0x10a5   : > { %v2823_v17 = vmul.f32 0.2, %v2795_v4  ;;  %v2824_v12 = vmul.f32 0.2, %v2814_v37 }
0x10a7   : > { %v2831_v36 = vmax.f32 %v2795_v4, %v2823_v17  ;;  %v2832_v21 = vmax.f32 %v2814_v37, %v2824_v12 }
0x10a9   : > { %v2835_v58 = vpack.c.bf16 %v2831_v36, %v2829_v15  ;;  %v2836_v7 = vpack.c.bf16 %v2832_v21, %v2830_v19 }
0x10ab   : > { %2843 = vmatpush.bf16.msra.mxu0 %v2835_v58  ;;  %2857 = vmatpush.bf16.msra.mxu1 %v2836_v7 }
0x10af   : > { %2844 = vmatpush.bf16.msra.mxu0 %v2833_v23  ;;  %2858 = vmatpush.bf16.msra.mxu1 %v2834_v20 }
0x10b2   : > { %3371 = vmatmul.msk.bf16.vlgmr.msra.gmra.mxu0 %vm554_vm2, %v4268_v54  ;;  %3372 = vmatmul.msk.bf16.vlgmr.msra.gmra.mxu1 %vm554_vm2, %v4268_v54 }
0x112f   : > { %v2846_v2 = vpop.f32.mrf.mxu0  ;;  %v2860_v52 = vpop.f32.mrf.mxu1 }
0x1130   : > { %v2865_v18 = vmul.f32 0.2, %v2846_v2  ;;  %v2866_v3 = vmul.f32 0.2, %v2860_v52 }
0x1132   : > { %v2869_v27 = vmax.f32 %v2846_v2, %v2865_v18  ;;  %v2870_v30 = vmax.f32 %v2860_v52, %v2866_v3 }
0x1137   : > { %v2848_v24 = vpop.f32.mrf.mxu0  ;;  %v2862_v26 = vpop.f32.mrf.mxu1 }
0x1138   : > { %v2867_v25 = vmul.f32 0.2, %v2848_v24  ;;  %v2868_v43 = vmul.f32 0.2, %v2862_v26 }
0x113a   : > { %v2871_v32 = vmax.f32 %v2848_v24, %v2867_v25  ;;  %v2872_v34 = vmax.f32 %v2862_v26, %v2868_v43 }
0x113c   : > { %v2873_v28 = vpack.c.bf16 %v2871_v32, %v2869_v27  ;;  %v2874_v33 = vpack.c.bf16 %v2872_v34, %v2870_v30 }
0x113e   : > { %2882 = vmatpush.bf16.msrb.mxu0 %v2873_v28  ;;  %2901 = vmatpush.bf16.msrb.mxu1 %v2874_v33 }
0x1141   : > { %3373 = vmatmul.msk.bf16.vlgmr.msrb.gmra.mxu0 %vm363_vm0, %v4281_v57  ;;  %3375 = vmatmul.msk.bf16.vlgmr.msrb.gmra.mxu1 %vm363_vm0, %v4281_v57 }
0x1151   : > { %3374 = vmatmul.msk.bf16.gmra.mxu0 %vm363_vm0, %v4290_v16  ;;  %3376 = vmatmul.msk.bf16.gmra.mxu1 %vm363_vm0, %v4290_v16 }
0x11be   : > { %v2884_v54 = vpop.f32.mrf.mxu0  ;;  %v2903_v41 = vpop.f32.mrf.mxu1 }
0x11bf   : > { %v2913_v55 = vmul.f32 0.2, %v2884_v54  ;;  %v2914_v8 = vmul.f32 0.2, %v2903_v41 }
0x11c1   : > { %v2921_v63 = vmax.f32 %v2884_v54, %v2913_v55  ;;  %v2922_v9 = vmax.f32 %v2903_v41, %v2914_v8 }
0x11c6   : > { %v2886_v35 = vpop.f32.mrf.mxu0  ;;  %v2905_v29 = vpop.f32.mrf.mxu1 }
0x11c7   : > { %v2915_v50 = vmul.f32 0.2, %v2886_v35  ;;  %v2916_v53 = vmul.f32 0.2, %v2905_v29 }
0x11c9   : > { %v2923_v60 = vmax.f32 %v2886_v35, %v2915_v50  ;;  %v2924_v31 = vmax.f32 %v2905_v29, %v2916_v53 }
0x11cb   : > { %v2929_v0 = vpack.c.bf16 %v2923_v60, %v2921_v63  ;;  %v2930_v1 = vpack.c.bf16 %v2924_v31, %v2922_v9 }
0x11ce   : > { %v2889_v46 = vpop.f32.mrf.mxu0  ;;  %v2908_v44 = vpop.f32.mrf.mxu1 }
0x11cf   : > { %v2917_v47 = vmul.f32 0.2, %v2889_v46  ;;  %v2918_v48 = vmul.f32 0.2, %v2908_v44 }
0x11d1   : > { %v2925_v10 = vmax.f32 %v2889_v46, %v2917_v47  ;;  %v2926_v59 = vmax.f32 %v2908_v44, %v2918_v48 }
0x11d6   : > { %v2891_v49 = vpop.f32.mrf.mxu0  ;;  %v2910_v51 = vpop.f32.mrf.mxu1 }
0x11d7   : > { %v2919_v5 = vmul.f32 0.2, %v2891_v49  ;;  %v2920_v57 = vmul.f32 0.2, %v2910_v51 }
0x11d9   : > { %v2927_v56 = vmax.f32 %v2891_v49, %v2919_v5  ;;  %v2928_v16 = vmax.f32 %v2910_v51, %v2920_v57 }
0x11db   : > { %v2931_v61 = vpack.c.bf16 %v2927_v56, %v2925_v10  ;;  %v2932_v62 = vpack.c.bf16 %v2928_v16, %v2926_v59 }
0x11dd   : > { %2939 = vmatpush.bf16.msrb.mxu2 %v2931_v61  ;;  %2958 = vmatpush.bf16.msrb.mxu3 %v2932_v62 }
0x11e1   : > { %2940 = vmatpush.bf16.msrb.mxu2 %v2929_v0  ;;  %2959 = vmatpush.bf16.msrb.mxu3 %v2930_v1 }
0x11e4   : > { %3377 = vmatmul.msk.bf16.vlgmr.msrb.gmra.mxu2 %vm554_vm2, %v4319_v6  ;;  %3379 = vmatmul.msk.bf16.vlgmr.msrb.gmra.mxu3 %vm554_vm2, %v4319_v6 }
0x11f4   : > { %3378 = vmatmul.msk.bf16.gmra.mxu2 %vm554_vm2, %v4328_v45  ;;  %3380 = vmatmul.msk.bf16.gmra.mxu3 %vm554_vm2, %v4328_v45 }
0x1267   : > { %v2942_v4 = vpop.f32.mrf.mxu2  ;;  %v2961_v11 = vpop.f32.mrf.mxu3 }
0x1268   : > { %v2971_v17 = vpack.c.bf16 %v2961_v11, %v2942_v4  ;;  %v2979_v37 = vadd.f32 %v2961_v11, %v2942_v4 }
0x126a   : > { %3381 = vst [vmem:[%s3859_s22 + $0x98] sm:$0xff] %v2971_v17  ;;  %2980 = vadd.xlane.f32.xlu1 %v2979_v37 }
0x126f   : > { %v2944_v14 = vpop.f32.mrf.mxu2  ;;  %v2963_v12 = vpop.f32.mrf.mxu3 }
0x1270   : > { %v2972_v13 = vpack.c.bf16 %v2963_v12, %v2944_v14  ;;  %v2982_v15 = vadd.f32 %v2963_v12, %v2944_v14 }
0x1272   : > { %3382 = vst [vmem:[%s3859_s22 + $0xb8] sm:$0xff] %v2972_v13  ;;  %2983 = vadd.xlane.f32.xlu2 %v2982_v15 }
0x1277   : > { %v2947_v6 = vpop.f32.mrf.mxu2  ;;  %v2966_v36 = vpop.f32.mrf.mxu3 }
0x1278   : > { %v2973_v45 = vpack.c.bf16 %v2966_v36, %v2947_v6  ;;  %v2985_v42 = vadd.f32 %v2966_v36, %v2947_v6 }
0x127a   : > { %3383 = vst [vmem:[%s3859_s22 + $0xd8] sm:$0xff] %v2973_v45  ;;  %2986 = vadd.xlane.f32.xlu0 %v2985_v42 }
0x127f   : > { %v2949_v19 = vpop.f32.mrf.mxu2  ;;  %v2968_v21 = vpop.f32.mrf.mxu3 }
0x1280   : > { %v2974_v22 = vpack.c.bf16 %v2968_v21, %v2949_v19  ;;  %v2988_v58 = vadd.f32 %v2968_v21, %v2949_v19 }
0x1282   : > { %3384 = vst [vmem:[%s3859_s22 + $0xf8] sm:$0xff] %v2974_v22  ;;  %2989 = vadd.xlane.f32.xlu1 %v2988_v58 }
0x1283   : > { %3535 = shalt.err (!%p3532_p8)
}
0x1284   : > { %s3579_s16 = smov 512   ;;  %s3580_s22 = smov 1024   ;;  %v2021_v38 = vpop.xlane.xlu1 %2020  ;;  %v2024_v7 = vpop.xlane.xlu2 %2023  ;;  %vm2995_vm4 = vcmask 15368  }
0x1285   : > { %s3581_s23 = smov 32   ;;  %v2027_v40 = vpop.xlane.xlu0 %2026 }
0x1286   : > { %3406 = dma.vmem_to_hbm [thread:$0]  (%p3672_p11), %s3019_s8, 4096, %s3021_s18, %s3001_s28, %s3579_s16, %s3580_s22, %s3581_s23  }
0x128c   : > { %v2030_v39 = vpop.xlane.xlu1 %2029  ;;  %v2341_v23 = vpop.xlane.xlu2 %2340 }
0x128d   : > { %v2344_v2 = vpop.xlane.xlu0 %2343  ;;  %v2351_v24 = vadd.f32 %v2341_v23, %v2021_v38 }
0x128e   : > { %v2352_v32 = vadd.f32 %v2344_v2, %v2024_v7 }
0x1294   : > { %v2347_v20 = vpop.xlane.xlu1 %2346  ;;  %v2350_v52 = vpop.xlane.xlu2 %2349 }
0x1295   : > { %v2661_v3 = vpop.xlane.xlu0 %2660  ;;  %v2353_v54 = vadd.f32 %v2347_v20, %v2027_v40  ;;  %v2354_v46 = vadd.f32 %v2350_v52, %v2030_v39 }
0x1296   : > { %v2671_v25 = vadd.f32 %v2661_v3, %v2351_v24 }
0x129c   : > { %v2664_v18 = vpop.xlane.xlu1 %2663  ;;  %v2667_v26 = vpop.xlane.xlu2 %2666 }
0x129d   : > { %v2672_v30 = vadd.f32 %v2664_v18, %v2352_v32  ;;  %v2670_v34 = vpop.xlane.xlu0 %2669  ;;  %v2673_v41 = vadd.f32 %v2667_v26, %v2353_v54 }
0x129e   : > { %v2674_v44 = vadd.f32 %v2670_v34, %v2354_v46 }
0x12dd   : > { %v2981_v43 = vpop.xlane.xlu1 %2980 }
0x12de   : > { %v2991_v27 = vadd.f32 %v2981_v43, %v2671_v25 }
0x12e0   : > { %2996 = vst.msk [vmem:[%s4109_s21] sm:$0xff] %vm2995_vm4, %v2991_v27 }
0x12e5   : > { %v2984_v28 = vpop.xlane.xlu2 %2983 }
0x12e6   : > { %v2992_v33 = vadd.f32 %v2984_v28, %v2672_v30 }
0x12e8   : > { %2997 = vst.msk [vmem:[%s4109_s21 + $0x8] sm:$0xff] %vm2995_vm4, %v2992_v33 }
0x12ed   : > { %v2987_v35 = vpop.xlane.xlu0 %2986 }
0x12ee   : > { %v2993_v29 = vadd.f32 %v2987_v35, %v2673_v41 }
0x12f0   : > { %2998 = vst.msk [vmem:[%s4109_s21 + $0x10] sm:$0xff] %vm2995_vm4, %v2993_v29 }
0x12f5   : > { %v2990_v47 = vpop.xlane.xlu1 %2989 }
0x12f6   : > { %v2994_v48 = vadd.f32 %v2990_v47, %v2674_v44 }
0x12f8   : > { %2999 = vst.msk [vmem:[%s4109_s21 + $0x18] sm:$0xff] %vm2995_vm4, %v2994_v48 }
0x12f9 PF: > { %s3038_s13 = sand.u32 1, %s3562_s24   ;;  %p3413_p11 = pnand %p3124_p9, %p3676_p12 }
0x12fa   : > { %s3039_s12 = scalar_lea.sflag [#allocation4], %s3038_s13 }
0x12fb   : > { %p3414_p10 = pneg %p3413_p11 }
0x12fd   : > { %3557 = dma.done.wait (%p3414_p10), %s3039_s12, 4096  }
0x12fe   : > { %3559 = vsyncadd (%p3414_p10), %s3039_s12, 4294963200  ;;  %s4430_s29 = sld [smem:[#allocation8_spill]]  ;;  %p21_p1 = scmp.ge.s32.totalorder %s3647_s30, 4  }
0x12ff   : > { %s4431_s24 = smov %s3566_s25  ;;  %s4432_s25 = smov %s3570_s26 }
0x1300   : > { %s4434_s27 = smov %s3647_s30  ;;  %23 = sbr.rel (!%p21_p1) target bundleno = 5 (0x5), region = 103 }
0x1304   : > { %s4433_s26 = smov %s4430_s29 }
0x1305   :  { %3053 = vsyncpa [#allocation3], 1 }
0x1306   :  { %3055 = vsyncpa [#allocation3 + $0x1], 1 }
0x1307   :  { %3056 = vsyncpa [#allocation4], 1 }
0x1308   :  { %3058 = vsyncpa [#allocation4 + $0x1], 1 }

</bundles_post_ra>
